<compile_context>
chip_gen: v7x
topology: tpu7x:2x2x1
jax: 0.10.0
libtpu: 0.0.40
codegen_flags: <defaults>
</compile_context>

<pallas_src>
import functools
import math

import jax
import jax.numpy as jnp
import numpy as np
from jax import lax
from jax.experimental import pallas as pl
from jax.experimental.pallas import tpu as pltpu

_VPAD = 8  # per-head sublane padding of the V block (ones row + zero rows)


def _attention_block_kernel(x_ref, avg_ref, wqkv_ref, bqkv_ref, wproj_ref,
                            bproj_ref, out_ref, *, num_heads, eps, mm_dtype,
                            probs_dtype, approx_recip):
    x = x_ref[...]                                  # (Bb, C, T) float32
    Bb, C, T = x.shape
    H = num_heads
    ch = C // H
    chv = ch + _VPAD
    R = wqkv_ref.shape[0]                           # 3C + _VPAD*H

    # ---- GroupNorm stats: one lane-reduction pass + tiny block-diagonal averaging
    #      matmul (MXU) broadcasting per-group stats back to every row.
    row_sum = jnp.sum(x, axis=-1, keepdims=True)            # (Bb, C, 1)
    row_sumsq = jnp.sum(x * x, axis=-1, keepdims=True)      # (Bb, C, 1)
    avg_b = jnp.broadcast_to(avg_ref[...], (Bb, C, C))      # hoisted once, tiny
    mean = lax.dot_general(avg_b, row_sum, (((2,), (1,)), ((0,), (0,))),
                           preferred_element_type=jnp.float32)
    meansq = lax.dot_general(avg_b, row_sumsq, (((2,), (1,)), ((0,), (0,))),
                             preferred_element_type=jnp.float32)
    var = meansq - mean * mean                      # one-pass variance (see caveat)
    xn = (x - mean) * lax.rsqrt(var + eps)          # gamma/beta folded into W_qkv

    # ---- qkv = Conv1d(C, 3C, 1); rows pre-permuted to [Q | K | V_ext] with the
    #      GroupNorm affine + attention scale folded in.  V_ext carries a bias-only
    #      "ones" row per head so the PV matmul also produces the softmax denom.
    wqkv_b = jnp.broadcast_to(wqkv_ref[...].astype(mm_dtype), (Bb, R, C))
    qkv = lax.dot_general(wqkv_b, xn.astype(mm_dtype),
                          (((2,), (1,)), ((0,), (0,))),
                          preferred_element_type=jnp.float32) + bqkv_ref[...]
    qkv = qkv.astype(mm_dtype)                      # (Bb, R, T)

    # All slices / reshapes below are sublane-aligned (C, ch, chv, 2C multiples of
    # 8) -> layout-free, no VMEM relayout copies.
    q = qkv[:, 0:C, :].reshape(Bb * H, ch, T)
    k = qkv[:, C:2 * C, :].reshape(Bb * H, ch, T)
    v_ext = qkv[:, 2 * C:R, :].reshape(Bb * H, chv, T)      # rows [v | ones | 0..0]

    # ---- logits[g, t, s] = sum_c q[g,c,t] * k[g,c,s]  (batched over Bb*H heads)
    logits = lax.dot_general(q, k, (((1,), (1,)), ((0,), (0,))),
                             preferred_element_type=jnp.float32)    # (Bb*H, T, T)
    logits = logits - jnp.max(logits, axis=-1, keepdims=True)
    p = jnp.exp(logits.astype(probs_dtype))         # un-normalized probabilities

    # ---- deferred softmax normalization: PV matmul on raw probs; the appended
    #      ones row yields denom[g, t] in row `ch` of the result, so the (T,T)-size
    #      normalization multiply becomes a single (ch, T)-size multiply.
    a_ext = lax.dot_general(v_ext, p.astype(mm_dtype),
                            (((2,), (2,)), ((0,), (0,))),
                            preferred_element_type=jnp.float32)     # (Bb*H, chv, T)
    denom = a_ext[:, ch:ch + 1, :]                                  # (Bb*H, 1, T)
    a = a_ext[:, 0:ch, :] * pl.reciprocal(denom, approx=approx_recip)

    # ---- proj_out = Conv1d(C, C, 1) + residual
    wproj_b = jnp.broadcast_to(wproj_ref[...].astype(mm_dtype), (Bb, C, C))
    h = lax.dot_general(wproj_b, a.reshape(Bb, C, T).astype(mm_dtype),
                        (((2,), (1,)), ((0,), (0,))),
                        preferred_element_type=jnp.float32) + bproj_ref[...]
    out_ref[...] = x + h


def prepare_params(params, *, num_heads, groups, seq_len, mm_dtype=jnp.float32):
    """One-time host-side constant folding of the module parameters.

    * qkv conv rows permuted from per-head-interleaved [q_h|k_h|v_h] to contiguous
      [Q | K | V_ext] blocks (sublane-aligned slices inside the kernel).
    * GroupNorm gamma/beta folded into W_qkv / b_qkv.
    * QKVAttentionLegacy scale (1/sqrt(sqrt(ch)), applied to q and k) folded in.
    * The V block is extended with _VPAD bias-only rows per head (first one = 1.0)
      so the PV matmul also emits the softmax denominator (deferred normalization).
    * The GroupNorm block-diagonal averaging matrix (depends only on C, groups,
      seq_len) is built here, not per forward call.
    """
    gamma = np.asarray(params["gamma"], np.float32)
    beta = np.asarray(params["beta"], np.float32)
    wqkv = np.asarray(params["wqkv"], np.float32)
    bqkv = np.asarray(params["bqkv"], np.float32)
    wproj = np.asarray(params["wproj"], np.float32)
    bproj = np.asarray(params["bproj"], np.float32)

    C = gamma.shape[0]
    assert C % num_heads == 0 and C % groups == 0
    ch = C // num_heads          # ch % 8 == 0 keeps head slices (8,128)-aligned
    chv = ch + _VPAD
    T = int(seq_len)

    # Fold GroupNorm affine: W @ (xhat*g + b) + c = (W*g) @ xhat + (W@b + c)
    bqkv = wqkv @ beta + bqkv
    wqkv = wqkv * gamma[None, :]

    # Row indices of the interleaved per-head [q_h | k_h | v_h] conv-output layout.
    idx = np.arange(3 * C).reshape(num_heads, 3, ch)
    scale = 1.0 / math.sqrt(math.sqrt(ch))

    R = 3 * C + _VPAD * num_heads
    W = np.zeros((R, C), np.float32)
    b = np.zeros((R,), np.float32)
    W[0:C] = wqkv[idx[:, 0].reshape(-1)] * scale
    b[0:C] = bqkv[idx[:, 0].reshape(-1)] * scale
    W[C:2 * C] = wqkv[idx[:, 1].reshape(-1)] * scale
    b[C:2 * C] = bqkv[idx[:, 1].reshape(-1)] * scale
    for h in range(num_heads):
        r0 = 2 * C + h * chv
        W[r0:r0 + ch] = wqkv[idx[h, 2]]
        b[r0:r0 + ch] = bqkv[idx[h, 2]]
        b[r0 + ch] = 1.0         # bias-only "ones" row -> softmax denominator

    # Block-diagonal matrix mapping per-row lane sums -> broadcast per-group mean.
    cg = C // groups
    gid = np.arange(C) // cg
    avg = (gid[:, None] == gid[None, :]).astype(np.float32) / float(cg * T)

    return {
        "avg": jnp.asarray(avg, jnp.float32),
        "wqkv": jnp.asarray(W, mm_dtype),
        "bqkv": jnp.asarray(b.reshape(R, 1), jnp.float32),
        "wproj": jnp.asarray(wproj, mm_dtype),
        "bproj": jnp.asarray(bproj.reshape(C, 1), jnp.float32),
    }


def _pick_b_block(B):
    """Largest divisor of B that is <= 8 while keeping >= 2 grid steps."""
    best = 1
    for d in range(1, min(B, 8) + 1):
        if B % d == 0 and B // d >= 2:
            best = d
    return best


def _vmem_limit_bytes(b_blk, C, T, R, num_heads, mm_dtype, probs_dtype):
    """Working-set estimate with headroom, capped at ~70% of physical VMEM."""
    f32 = 4
    mm = 2 if mm_dtype == jnp.bfloat16 else 4
    pp = 2 if probs_dtype == jnp.bfloat16 else 4
    H = num_heads
    ch = C // H
    chv = ch + _VPAD
    est = 2 * 2 * b_blk * C * T * f32                                 # x/out dbl-buf
    est += 2 * (C * C * f32 + (R * C + C * C) * mm + (R + C) * f32)   # weights dbl-buf
    est += b_blk * C * T * (f32 + mm)                                 # xn (+ cast)
    est += b_blk * R * T * (f32 + mm)                                 # qkv (+ cast)
    est += b_blk * H * T * T * (2 * f32 + pp)                         # logits + probs
    est += b_blk * H * chv * T * f32                                  # a_ext
    est += b_blk * (C * C * f32 + (R * C + 2 * C * C) * mm)           # bcast weights
    try:
        cap = int(getattr(pltpu.get_tpu_info(), "vmem_capacity_bytes", 64 * 2**20))
    except Exception:
        cap = 64 * 2**20                                              # v7x-conservative
    need = max(int(1.5 * est), 16 * 2**20)
    return max(min(need, int(0.7 * cap)), 8 * 2**20)


@functools.partial(
    jax.jit,
    static_argnames=("num_heads", "eps", "mm_dtype", "probs_dtype",
                     "approx_recip", "b_block"))
def attention_block_forward(x, prepared, *, num_heads, eps=1e-5,
                            mm_dtype=jnp.float32, probs_dtype=jnp.float32,
                            approx_recip=False, b_block=None):
    """x: (B, C, *spatial) float32 NC(HW...); returns the same shape.

    `prepared` must come from prepare_params(..., seq_len=prod(spatial)).
    """
    B, C = x.shape[:2]
    spatial = x.shape[2:]
    T = int(np.prod(spatial))
    R = prepared["wqkv"].shape[0]

    Bb = _pick_b_block(B) if b_block is None else int(b_block)
    assert B % Bb == 0, "b_block must divide the batch size"

    x3 = x.reshape(B, C, T).astype(jnp.float32)

    kern = functools.partial(
        _attention_block_kernel, num_heads=num_heads, eps=eps, mm_dtype=mm_dtype,
        probs_dtype=probs_dtype, approx_recip=approx_recip)

    vmem_limit = _vmem_limit_bytes(Bb, C, T, R, num_heads, mm_dtype, probs_dtype)

    out = pl.pallas_call(
        kern,
        out_shape=jax.ShapeDtypeStruct((B, C, T), jnp.float32),
        grid_spec=pltpu.PrefetchScalarGridSpec(
            num_scalar_prefetch=0,
            grid=(B // Bb,),
            in_specs=[
                pl.BlockSpec((Bb, C, T), lambda b: (b, 0, 0)),   # x
                pl.BlockSpec((C, C), lambda b: (0, 0)),          # group-avg matrix
                pl.BlockSpec((R, C), lambda b: (0, 0)),          # W_qkv (folded/extended)
                pl.BlockSpec((R, 1), lambda b: (0, 0)),          # b_qkv (folded)
                pl.BlockSpec((C, C), lambda b: (0, 0)),          # W_proj
                pl.BlockSpec((C, 1), lambda b: (0, 0)),          # b_proj
            ],
            out_specs=pl.BlockSpec((Bb, C, T), lambda b: (b, 0, 0)),
        ),
        compiler_params=pltpu.CompilerParams(
            dimension_semantics=("parallel",),
            vmem_limit_bytes=vmem_limit),
    )(x3, prepared["avg"], prepared["wqkv"], prepared["bqkv"],
      prepared["wproj"], prepared["bproj"])

    return out.reshape((B, C) + spatial)


def default_fast_config():
    """bf16 MXU operands everywhere; bf16 softmax only where VPU/EUP are bf16-native."""
    try:
        kind = jax.devices()[0].device_kind.lower()
    except Exception:
        kind = ""
    new_gen = any(t in kind for t in ("v6", "v7"))   # v6e / v7x: bf16 VPU+EUP
    return dict(mm_dtype=jnp.bfloat16,
                probs_dtype=jnp.bfloat16 if new_gen else jnp.float32,
                approx_recip=True)


def attention_block_reference(x, params, *, num_heads, groups, eps=1e-5):
    """Pure-JAX reference mirroring the PyTorch forward (HIGHEST-precision matmuls)."""
    gamma, beta, wqkv, bqkv, wproj, bproj = (
        params["gamma"], params["beta"], params["wqkv"], params["bqkv"],
        params["wproj"], params["bproj"])
    hp = jax.lax.Precision.HIGHEST
    B, C = x.shape[:2]
    spatial = x.shape[2:]
    T = int(np.prod(spatial))
    x3 = x.reshape(B, C, T)

    xg = x3.reshape(B, groups, C // groups, T)
    mu = xg.mean(axis=(2, 3), keepdims=True)
    var = ((xg - mu) ** 2).mean(axis=(2, 3), keepdims=True)
    xn = ((xg - mu) / jnp.sqrt(var + eps)).reshape(B, C, T)
    xn = xn * gamma[None, :, None] + beta[None, :, None]

    qkv = jnp.einsum("oc,bct->bot", wqkv, xn, precision=hp) + bqkv[None, :, None]
    ch = C // num_heads
    qkv_h = qkv.reshape(B * num_heads, 3 * ch, T)
    q, k, v = qkv_h[:, :ch], qkv_h[:, ch:2 * ch], qkv_h[:, 2 * ch:]
    scale = 1.0 / math.sqrt(math.sqrt(ch))
    w = jnp.einsum("bct,bcs->bts", q * scale, k * scale, precision=hp)
    w = jax.nn.softmax(w, axis=-1)
    a = jnp.einsum("bts,bcs->bct", w, v, precision=hp).reshape(B, C, T)
    h = jnp.einsum("oc,bct->bot", wproj, a, precision=hp) + bproj[None, :, None]
    return (x3 + h).reshape((B, C) + spatial)


if __name__ == "__main__":
    # Small, lane-dense shapes consistent with the module: groups | C, heads | C,
    # T = H*W = 256 (multiple of 128), ch = 16 (multiple of 8).
    B, C, HH, WW = 2, 64, 16, 16
    NUM_HEADS = 4
    GROUPS = 32          # module default group_norm_num
    T = HH * WW

    key = jax.random.PRNGKey(0)
    kx, kg, kb, kw1, kb1, kw2, kb2, kx2 = jax.random.split(key, 8)
    x = jax.random.normal(kx, (B, C, HH, WW), dtype=jnp.float32)

    # Module-faithful init: proj_out is zero_module'd; GroupNorm affine made
    # non-trivial so the folded-affine path is exercised.
    params = {
        "gamma": 1.0 + 0.1 * jax.random.normal(kg, (C,), jnp.float32),
        "beta": 0.1 * jax.random.normal(kb, (C,), jnp.float32),
        "wqkv": 0.1 * jax.random.normal(kw1, (3 * C, C), jnp.float32),
        "bqkv": 0.01 * jax.random.normal(kb1, (3 * C,), jnp.float32),
        "wproj": jnp.zeros((C, C), jnp.float32),   # zero_module(Conv1d)
        "bproj": jnp.zeros((C,), jnp.float32),
    }

    # --- precise path (f32 MXU operands, exact reciprocal): module-faithful init
    prep = prepare_params(params, num_heads=NUM_HEADS, groups=GROUPS, seq_len=T)
    out = jax.block_until_ready(
        attention_block_forward(x, prep, num_heads=NUM_HEADS))
    ref = attention_block_reference(x, params, num_heads=NUM_HEADS, groups=GROUPS)
    np.testing.assert_allclose(np.asarray(out), np.asarray(ref), rtol=1e-4, atol=1e-4)

    # --- precise path with non-zero proj so attention / deferred softmax matter
    params_nz = dict(params)
    params_nz["wproj"] = 0.05 * jax.random.normal(kw2, (C, C), jnp.float32)
    params_nz["bproj"] = 0.01 * jax.random.normal(kb2, (C,), jnp.float32)
    prep_nz = prepare_params(params_nz, num_heads=NUM_HEADS, groups=GROUPS, seq_len=T)
    out_nz = jax.block_until_ready(
        attention_block_forward(x, prep_nz, num_heads=NUM_HEADS))
    ref_nz = attention_block_reference(x, params_nz, num_heads=NUM_HEADS, groups=GROUPS)
    np.testing.assert_allclose(np.asarray(out_nz), np.asarray(ref_nz),
                               rtol=1e-4, atol=1e-4)

    # --- multi-sample grid blocks (b_block > 1): B=4 with 2 samples per grid step
    x4 = jax.random.normal(kx2, (4, C, HH, WW), dtype=jnp.float32)
    out4 = jax.block_until_ready(
        attention_block_forward(x4, prep_nz, num_heads=NUM_HEADS, b_block=2))
    ref4 = attention_block_reference(x4, params_nz, num_heads=NUM_HEADS, groups=GROUPS)
    np.testing.assert_allclose(np.asarray(out4), np.asarray(ref4),
                               rtol=1e-4, atol=1e-4)

    # --- fast production path: bf16 MXU operands (f32 accumulate), approx EUP
    #     reciprocal; bf16 softmax/exp on v6e/v7x (f32 on v5e, no bf16 VPU/EUP).
    fast = default_fast_config()
    prep_fast = prepare_params(params_nz, num_heads=NUM_HEADS, groups=GROUPS,
                               seq_len=T, mm_dtype=fast["mm_dtype"])
    out_fast = jax.block_until_ready(
        attention_block_forward(x, prep_fast, num_heads=NUM_HEADS, **fast))
    np.testing.assert_allclose(np.asarray(out_fast), np.asarray(ref_nz),
                               rtol=5e-2, atol=5e-2)

    print("KERNEL_OK")
</pallas_src>

<mosaic_0001>
module attributes {stable_mosaic.version = 11 : i64} {
  func.func @_attention_block_kernel(%arg0: i32, %arg1: memref<1x64x256xf32, #tpu.memory_space<vmem>>, %arg2: memref<64x64xf32, #tpu.memory_space<vmem>>, %arg3: memref<224x64xf32, #tpu.memory_space<vmem>>, %arg4: memref<224x1xf32, #tpu.memory_space<vmem>>, %arg5: memref<64x64xf32, #tpu.memory_space<vmem>>, %arg6: memref<64x1xf32, #tpu.memory_space<vmem>>, %arg7: memref<1x64x256xf32, #tpu.memory_space<vmem>>) attributes {dimension_semantics = [#tpu.dimension_semantics<parallel>], iteration_bounds = array<i64: 2>, scalar_prefetch = 0 : i64, scratch_operands = 0 : i64, tpu.core_type = #tpu.core_type<tc>, window_params = [{transform_indices = @transform_0, window_bounds = array<i64: 1, 64, 256>}, {pipeline_mode = #tpu.pipeline_mode<synchronous>, transform_indices = @transform_1, window_bounds = array<i64: 64, 64>}, {pipeline_mode = #tpu.pipeline_mode<synchronous>, transform_indices = @transform_2, window_bounds = array<i64: 224, 64>}, {pipeline_mode = #tpu.pipeline_mode<synchronous>, transform_indices = @transform_3, window_bounds = array<i64: 224, 1>}, {pipeline_mode = #tpu.pipeline_mode<synchronous>, transform_indices = @transform_4, window_bounds = array<i64: 64, 64>}, {pipeline_mode = #tpu.pipeline_mode<synchronous>, transform_indices = @transform_5, window_bounds = array<i64: 64, 1>}, {transform_indices = @transform_6, window_bounds = array<i64: 1, 64, 256>}]} {
    %c0 = arith.constant 0 : index
    %c0_0 = arith.constant 0 : index
    %c0_1 = arith.constant 0 : index
    %0 = vector.load %arg1[%c0, %c0_0, %c0_1] : memref<1x64x256xf32, #tpu.memory_space<vmem>>, vector<1x64x256xf32>
    %cst = arith.constant dense<0.000000e+00> : vector<1x64xf32>
    %1 = vector.multi_reduction <add>, %0, %cst [2] : vector<1x64x256xf32> to vector<1x64xf32>
    %2 = vector.shape_cast %1 : vector<1x64xf32> to vector<1x64x1xf32>
    %3 = arith.mulf %0, %0 : vector<1x64x256xf32>
    %cst_2 = arith.constant dense<0.000000e+00> : vector<1x64xf32>
    %4 = vector.multi_reduction <add>, %3, %cst_2 [2] : vector<1x64x256xf32> to vector<1x64xf32>
    %5 = vector.shape_cast %4 : vector<1x64xf32> to vector<1x64x1xf32>
    %c0_3 = arith.constant 0 : index
    %c0_4 = arith.constant 0 : index
    %6 = vector.load %arg2[%c0_3, %c0_4] : memref<64x64xf32, #tpu.memory_space<vmem>>, vector<64x64xf32>
    %7 = vector.shape_cast %6 : vector<64x64xf32> to vector<1x64x64xf32>
    %cst_5 = arith.constant dense<0.000000e+00> : vector<1x64x1xf32>
    %8 = tpu.matmul %7, %2, %cst_5 {dimension_numbers = #tpu.dot_dimension_numbers<[2], [1], [1], [2], [0, 0, 0, 1, 1, 2], [0], [0]>} : vector<1x64x64xf32>, vector<1x64x1xf32>, vector<1x64x1xf32> -> vector<1x64x1xf32>
    %cst_6 = arith.constant dense<0.000000e+00> : vector<1x64x1xf32>
    %9 = tpu.matmul %7, %5, %cst_6 {dimension_numbers = #tpu.dot_dimension_numbers<[2], [1], [1], [2], [0, 0, 0, 1, 1, 2], [0], [0]>} : vector<1x64x64xf32>, vector<1x64x1xf32>, vector<1x64x1xf32> -> vector<1x64x1xf32>
    %10 = arith.mulf %8, %8 : vector<1x64x1xf32>
    %11 = arith.subf %9, %10 : vector<1x64x1xf32>
    %12 = vector.broadcast %8 : vector<1x64x1xf32> to vector<1x64x256xf32>
    %13 = arith.subf %0, %12 : vector<1x64x256xf32>
    %cst_7 = arith.constant 9.99999974E-6 : f32
    %14 = vector.broadcast %cst_7 : f32 to vector<1x64x1xf32>
    %15 = arith.addf %11, %14 : vector<1x64x1xf32>
    %16 = math.rsqrt %15 : vector<1x64x1xf32>
    %17 = vector.broadcast %16 : vector<1x64x1xf32> to vector<1x64x256xf32>
    %18 = arith.mulf %13, %17 : vector<1x64x256xf32>
    %c0_8 = arith.constant 0 : index
    %c0_9 = arith.constant 0 : index
    %19 = vector.load %arg3[%c0_8, %c0_9] : memref<224x64xf32, #tpu.memory_space<vmem>>, vector<224x64xf32>
    %20 = vector.shape_cast %19 : vector<224x64xf32> to vector<1x224x64xf32>
    %cst_10 = arith.constant dense<0.000000e+00> : vector<1x224x256xf32>
    %21 = tpu.matmul %20, %18, %cst_10 {dimension_numbers = #tpu.dot_dimension_numbers<[2], [1], [1], [2], [0, 0, 0, 1, 1, 2], [0], [0]>} : vector<1x224x64xf32>, vector<1x64x256xf32>, vector<1x224x256xf32> -> vector<1x224x256xf32>
    %c0_11 = arith.constant 0 : index
    %c0_12 = arith.constant 0 : index
    %22 = vector.load %arg4[%c0_11, %c0_12] : memref<224x1xf32, #tpu.memory_space<vmem>>, vector<224x1xf32>
    %23 = vector.shape_cast %22 : vector<224x1xf32> to vector<1x224x1xf32>
    %24 = vector.broadcast %23 : vector<1x224x1xf32> to vector<1x224x256xf32>
    %25 = arith.addf %21, %24 : vector<1x224x256xf32>
    %26 = vector.extract_strided_slice %25 {offsets = [0, 0, 0], sizes = [1, 64, 256], strides = [1, 1, 1]} : vector<1x224x256xf32> to vector<1x64x256xf32>
    %27 = vector.shape_cast %26 : vector<1x64x256xf32> to vector<4x16x256xf32>
    %28 = vector.extract_strided_slice %25 {offsets = [0, 64, 0], sizes = [1, 64, 256], strides = [1, 1, 1]} : vector<1x224x256xf32> to vector<1x64x256xf32>
    %29 = vector.shape_cast %28 : vector<1x64x256xf32> to vector<4x16x256xf32>
    %30 = vector.extract_strided_slice %25 {offsets = [0, 128, 0], sizes = [1, 96, 256], strides = [1, 1, 1]} : vector<1x224x256xf32> to vector<1x96x256xf32>
    %31 = vector.shape_cast %30 : vector<1x96x256xf32> to vector<4x24x256xf32>
    %cst_13 = arith.constant dense<0.000000e+00> : vector<4x256x256xf32>
    %32 = tpu.matmul %27, %29, %cst_13 {dimension_numbers = #tpu.dot_dimension_numbers<[1], [1], [2], [2], [0, 0, 0, 2, 1, 2], [0], [0]>} : vector<4x16x256xf32>, vector<4x16x256xf32>, vector<4x256x256xf32> -> vector<4x256x256xf32>
    %cst_14 = arith.constant dense<0xFF800000> : vector<4x256xf32>
    %33 = vector.multi_reduction <maximumf>, %32, %cst_14 [2] : vector<4x256x256xf32> to vector<4x256xf32>
    %34 = vector.shape_cast %33 : vector<4x256xf32> to vector<4x256x1xf32>
    %35 = vector.broadcast %34 : vector<4x256x1xf32> to vector<4x256x256xf32>
    %36 = arith.subf %32, %35 : vector<4x256x256xf32>
    %37 = math.exp %36 : vector<4x256x256xf32>
    %cst_15 = arith.constant dense<0.000000e+00> : vector<4x24x256xf32>
    %38 = tpu.matmul %31, %37, %cst_15 {dimension_numbers = #tpu.dot_dimension_numbers<[2], [2], [1], [1], [0, 0, 0, 1, 1, 1], [0], [0]>} : vector<4x24x256xf32>, vector<4x256x256xf32>, vector<4x24x256xf32> -> vector<4x24x256xf32>
    %39 = vector.extract_strided_slice %38 {offsets = [0, 16, 0], sizes = [4, 1, 256], strides = [1, 1, 1]} : vector<4x24x256xf32> to vector<4x1x256xf32>
    %40 = vector.extract_strided_slice %38 {offsets = [0, 0, 0], sizes = [4, 16, 256], strides = [1, 1, 1]} : vector<4x24x256xf32> to vector<4x16x256xf32>
    %41 = tpu.reciprocal %39 : vector<4x1x256xf32> -> vector<4x1x256xf32>
    %42 = vector.broadcast %41 : vector<4x1x256xf32> to vector<4x16x256xf32>
    %43 = arith.mulf %40, %42 : vector<4x16x256xf32>
    %c0_16 = arith.constant 0 : index
    %c0_17 = arith.constant 0 : index
    %44 = vector.load %arg5[%c0_16, %c0_17] : memref<64x64xf32, #tpu.memory_space<vmem>>, vector<64x64xf32>
    %45 = vector.shape_cast %44 : vector<64x64xf32> to vector<1x64x64xf32>
    %46 = vector.shape_cast %43 : vector<4x16x256xf32> to vector<1x64x256xf32>
    %cst_18 = arith.constant dense<0.000000e+00> : vector<1x64x256xf32>
    %47 = tpu.matmul %45, %46, %cst_18 {dimension_numbers = #tpu.dot_dimension_numbers<[2], [1], [1], [2], [0, 0, 0, 1, 1, 2], [0], [0]>} : vector<1x64x64xf32>, vector<1x64x256xf32>, vector<1x64x256xf32> -> vector<1x64x256xf32>
    %c0_19 = arith.constant 0 : index
    %c0_20 = arith.constant 0 : index
    %48 = vector.load %arg6[%c0_19, %c0_20] : memref<64x1xf32, #tpu.memory_space<vmem>>, vector<64x1xf32>
    %49 = vector.shape_cast %48 : vector<64x1xf32> to vector<1x64x1xf32>
    %50 = vector.broadcast %49 : vector<1x64x1xf32> to vector<1x64x256xf32>
    %51 = arith.addf %47, %50 : vector<1x64x256xf32>
    %52 = arith.addf %0, %51 : vector<1x64x256xf32>
    %c0_21 = arith.constant 0 : index
    %c0_22 = arith.constant 0 : index
    %c0_23 = arith.constant 0 : index
    %53 = vector.load %arg7[%c0_21, %c0_22, %c0_23] : memref<1x64x256xf32, #tpu.memory_space<vmem>>, vector<1x64x256xf32>
    tpu.vector_store %arg7[%c0_21, %c0_22, %c0_23], %52 {strides = array<i32>} : memref<1x64x256xf32, #tpu.memory_space<vmem>>, vector<1x64x256xf32>,
    return
  }
  func.func @transform_0(%arg0: i32) -> (i32, i32, i32) {
    %c0_i32 = arith.constant 0 : i32
    %c0_i32_0 = arith.constant 0 : i32
    %c0_i32_1 = arith.constant 0 : i32
    return %arg0, %c0_i32, %c0_i32_0 : i32, i32, i32
  }
  func.func @transform_1(%arg0: i32) -> (i32, i32) {
    %c0_i32 = arith.constant 0 : i32
    %c0_i32_0 = arith.constant 0 : i32
    %c0_i32_1 = arith.constant 0 : i32
    return %c0_i32, %c0_i32_0 : i32, i32
  }
  func.func @transform_2(%arg0: i32) -> (i32, i32) {
    %c0_i32 = arith.constant 0 : i32
    %c0_i32_0 = arith.constant 0 : i32
    %c0_i32_1 = arith.constant 0 : i32
    return %c0_i32, %c0_i32_0 : i32, i32
  }
  func.func @transform_3(%arg0: i32) -> (i32, i32) {
    %c0_i32 = arith.constant 0 : i32
    %c0_i32_0 = arith.constant 0 : i32
    %c0_i32_1 = arith.constant 0 : i32
    return %c0_i32, %c0_i32_0 : i32, i32
  }
  func.func @transform_4(%arg0: i32) -> (i32, i32) {
    %c0_i32 = arith.constant 0 : i32
    %c0_i32_0 = arith.constant 0 : i32
    %c0_i32_1 = arith.constant 0 : i32
    return %c0_i32, %c0_i32_0 : i32, i32
  }
  func.func @transform_5(%arg0: i32) -> (i32, i32) {
    %c0_i32 = arith.constant 0 : i32
    %c0_i32_0 = arith.constant 0 : i32
    %c0_i32_1 = arith.constant 0 : i32
    return %c0_i32, %c0_i32_0 : i32, i32
  }
  func.func @transform_6(%arg0: i32) -> (i32, i32, i32) {
    %c0_i32 = arith.constant 0 : i32
    %c0_i32_0 = arith.constant 0 : i32
    %c0_i32_1 = arith.constant 0 : i32
    return %arg0, %c0_i32, %c0_i32_0 : i32, i32, i32
  }
}

</mosaic_0001>

<bundles_post_ra>
// kernel: attention_block_forward.1
= control target key start
LH: loop header
LB: loop body
LE: loop exit
PB: predicated region body
PF: predicated region fallthrough
CT: control target
= control target key end

     0   :  { %s5963_s21 = smov 0   ;;  %s8128_s0 = inlined_call_operand.vmem [shape: f32[2,64,256], index: 0, kind: input, shape index: {}]   ;;  %s8129_s1 = inlined_call_operand.vmem [shape: f32[64,64], index: 1, kind: input, shape index: {}]   ;;  %s8130_s2 = inlined_call_operand.vmem [shape: f32[224,64], index: 2, kind: input, shape index: {}]   ;;  %s8131_s3 = inlined_call_operand.vmem [shape: f32[224,1], index: 3, kind: input, shape index: {}]   ;;  %s8132_s4 = inlined_call_operand.vmem [shape: f32[64,64], index: 4, kind: input, shape index: {}]   ;;  %s8133_s5 = inlined_call_operand.vmem [shape: f32[64,1], index: 5, kind: input, shape index: {}]   ;;  %s8134_s6 = inlined_call_operand.vmem [shape: f32[2,64,256], index: 6, kind: output, shape index: {}]  }
   0x1 LB: > { %s4721_s22 = sadd.s32 4294967295, %s5924_s21   ;;  %p4725_p0 = scmp.ge.s32.totalorder %s5924_s21, 1  ;;  %s5924_s21 = sphi %s5963_s21, %s16_s21  }
   0x2   : > { %p212_p1 = scmp.lt.s32.totalorder %s5924_s21, 3 }
   0x4   : > { %p213_p2 = pnand %p4725_p0, %p212_p1 }
   0x6   : > { %216 = sbr.rel (%p213_p2) target bundleno = 2185 (0x889), region = 44 }
   0xd   : > { %p242_p3 = scmp.lt.s32.totalorder %s4721_s22, 1  ;;  %v332_v48 = vld [vmem:[%s8129_s1] sm:$0xff]  ;;  %vm340_vm0 = vcmask 523264   ;;  %v5926_v49 = vmov 0   ;;  %vm1296_vm1 = vcmask 130048  }
   0xe   : > { %4962 = vmatprep.mubr.msk.f32.mxu0 %vm340_vm0, %v332_v48  ;;  %4990 = vmatprep.mubr.msk.f32.mxu1 %vm340_vm0, %v332_v48 }
   0xf   : > { %s8745_s22 = smov (!%p242_p3, %s4721_s22), 1  ;;  %5356 = vset.pattern.permute.xlu1 %v5926_v49  ;;  %5357 = vset.pattern.permute.xlu0 %v5926_v49 }
  0x10   : > { %s4912_s23 = sshll.u32 %s8745_s22, 7 }
  0x11   : > { %s5979_s26 = scalar_lea.vmem %s8128_s0, %s4912_s23  ;;  %s8091_s29 = scalar_lea.vmem %s8134_s6, %s4912_s23 }
  0x12   : > { %v5982_v0 = vld [vmem:[%s5979_s26 + $0x30] sm:$0xff]  ;;  %v5985_v1 = vld [vmem:[%s5979_s26 + $0x38] sm:$0xff]  ;;  %v5988_v2 = vld [vmem:[%s5979_s26] sm:$0xff] }
  0x13   : > { %v277_v3 = vadd.f32 %v5985_v1, %v5982_v0  ;;  %v5993_v4 = vld [vmem:[%s5979_s26 + $0x8] sm:$0xff]  ;;  %v292_v5 = vmul.f32 %v5988_v2, %v5988_v2  ;;  %v5998_v6 = vld [vmem:[%s5979_s26 + $0x10] sm:$0xff]  ;;  %v6001_v7 = vld [vmem:[%s5979_s26 + $0x18] sm:$0xff]  ;;  %v298_v17 = vmul.f32 %v5982_v0, %v5982_v0  ;;  %v299_v18 = vmul.f32 %v5985_v1, %v5985_v1 }
  0x14   : > { %v268_v8 = vadd.f32 %v5993_v4, %v5988_v2  ;;  %v293_v9 = vmul.f32 %v5993_v4, %v5993_v4  ;;  %v294_v10 = vmul.f32 %v5998_v6, %v5998_v6  ;;  %v295_v11 = vmul.f32 %v6001_v7, %v6001_v7  ;;  %v6014_v14 = vld [vmem:[%s5979_s26 + $0x20] sm:$0xff]  ;;  %v6017_v15 = vld [vmem:[%s5979_s26 + $0x28] sm:$0xff]  ;;  %v6030_v24 = vld [vmem:[%s5979_s26 + $0x50] sm:$0xff] }
  0x15   : > { %278 = vadd.xlane.f32.xlu1 %v277_v3  ;;  %v271_v13 = vadd.f32 %v6001_v7, %v5998_v6  ;;  %v274_v19 = vadd.f32 %v6017_v15, %v6014_v14  ;;  %v296_v20 = vmul.f32 %v6014_v14, %v6014_v14  ;;  %v297_v21 = vmul.f32 %v6017_v15, %v6017_v15  ;;  %v6033_v25 = vld [vmem:[%s5979_s26 + $0x58] sm:$0xff]  ;;  %v6036_v26 = vld [vmem:[%s5979_s26 + $0x40] sm:$0xff]  ;;  %v6039_v27 = vld [vmem:[%s5979_s26 + $0x48] sm:$0xff] }
  0x16   : > { %269 = vadd.xlane.f32.xlu0 %v268_v8  ;;  %v308_v12 = vadd.f32 %v293_v9, %v292_v5  ;;  %v311_v16 = vadd.f32 %v295_v11, %v294_v10  ;;  %v317_v22 = vadd.f32 %v299_v18, %v298_v17  ;;  %v283_v28 = vadd.f32 %v6033_v25, %v6030_v24  ;;  %v6054_v36 = vld [vmem:[%s5979_s26 + $0x70] sm:$0xff]  ;;  %v6057_v37 = vld [vmem:[%s5979_s26 + $0x78] sm:$0xff]  ;;  %v6060_v38 = vld [vmem:[%s5979_s26 + $0x60] sm:$0xff] }
  0x17   : > { %v314_v23 = vadd.f32 %v297_v21, %v296_v20  ;;  %v302_v29 = vmul.f32 %v6030_v24, %v6030_v24  ;;  %v303_v30 = vmul.f32 %v6033_v25, %v6033_v25  ;;  %v280_v31 = vadd.f32 %v6039_v27, %v6036_v26  ;;  %v6063_v39 = vld [vmem:[%s5979_s26 + $0x68] sm:$0xff]  ;;  %v335_v20 = vld [vmem:[%s8129_s1 + $0x18] sm:$0xff]  ;;  %v336_v21 = vld [vmem:[%s8129_s1 + $0x20] sm:$0xff] }
  0x18   : > { %v300_v32 = vmul.f32 %v6036_v26, %v6036_v26  ;;  %v301_v33 = vmul.f32 %v6039_v27, %v6039_v27  ;;  %v289_v40 = vadd.f32 %v6057_v37, %v6054_v36  ;;  %v306_v41 = vmul.f32 %v6054_v36, %v6054_v36  ;;  %v333_v17 = vld [vmem:[%s8129_s1 + $0x8] sm:$0xff] }
  0x19   : > { %309 = vadd.xlane.f32.xlu1 %v308_v12  ;;  %v323_v34 = vadd.f32 %v303_v30, %v302_v29  ;;  %v307_v42 = vmul.f32 %v6057_v37, %v6057_v37  ;;  %v286_v43 = vadd.f32 %v6063_v39, %v6060_v38  ;;  %v304_v44 = vmul.f32 %v6060_v38, %v6060_v38 }
  0x1a   : > { %272 = vadd.xlane.f32.xlu0 %v271_v13  ;;  %v320_v35 = vadd.f32 %v301_v33, %v300_v32  ;;  %v305_v45 = vmul.f32 %v6063_v39, %v6063_v39 }
  0x1b   : > { %v329_v46 = vadd.f32 %v307_v42, %v306_v41 }
  0x1c   : > { %v326_v47 = vadd.f32 %v305_v45, %v304_v44 }
  0x1d   : > { %312 = vadd.xlane.f32.xlu1 %v311_v16 }
  0x1e   : > { %275 = vadd.xlane.f32.xlu0 %v274_v19  ;;  %v334_v19 = vld [vmem:[%s8129_s1 + $0x10] sm:$0xff] }
  0x21   : > { %318 = vadd.xlane.f32.xlu1 %v317_v22  ;;  %v337_v22 = vld [vmem:[%s8129_s1 + $0x28] sm:$0xff] }
  0x22   : > { %315 = vadd.xlane.f32.xlu0 %v314_v23  ;;  %v338_v23 = vld [vmem:[%s8129_s1 + $0x30] sm:$0xff] }
  0x25   : > { %284 = vadd.xlane.f32.xlu1 %v283_v28  ;;  %v339_v28 = vld [vmem:[%s8129_s1 + $0x38] sm:$0xff] }
  0x26   : > { %281 = vadd.xlane.f32.xlu0 %v280_v31 }
  0x29   : > { %324 = vadd.xlane.f32.xlu1 %v323_v34 }
  0x2a   : > { %321 = vadd.xlane.f32.xlu0 %v320_v35 }
  0x2d   : > { %290 = vadd.xlane.f32.xlu1 %v289_v40 }
  0x2e   : > { %287 = vadd.xlane.f32.xlu0 %v286_v43 }
  0x31   : > { %330 = vadd.xlane.f32.xlu1 %v329_v46 }
  0x32   : > { %327 = vadd.xlane.f32.xlu0 %v326_v47 }
  0xa2   : > { %v279_v50 = vpop.xlane.xlu1 %278 }
  0xa3   : > { %v270_v51 = vpop.xlane.xlu0 %269 }
  0xa6   : > { %v310_v52 = vpop.xlane.xlu1 %309 }
  0xa7   : > { %v273_v53 = vpop.xlane.xlu0 %272 }
  0xa8   : > { %v5002_v54 = vpack.c.bf16 %v273_v53, %v270_v51 }
  0xaa   : > { %5003 = vmatprep.subr.bf16.mxu0 %v5002_v54  ;;  %v313_v55 = vpop.xlane.xlu1 %312 }
  0xab   : > { %v5018_v56 = vpack.c.bf16 %v313_v55, %v310_v52  ;;  %5005 = vmatpush3.bf16.msra.mxu0 %v5002_v54  ;;  %v276_v57 = vpop.xlane.xlu0 %275 }
  0xac   : > { %v5006_v58 = vpack.c.bf16 %v279_v50, %v276_v57 }
  0xad   : > { %5019 = vmatprep.subr.bf16.mxu1 %v5018_v56 }
  0xae   : > { %5007 = vmatprep.subr.bf16.mxu0 %v5006_v58  ;;  %5021 = vmatpush3.bf16.msra.mxu1 %v5018_v56  ;;  %v319_v59 = vpop.xlane.xlu1 %318 }
  0xaf   : > { %5009 = vmatpush3.bf16.msra.mxu0 %v5006_v58  ;;  %v316_v60 = vpop.xlane.xlu0 %315 }
  0xb0   : > { %v5022_v61 = vpack.c.bf16 %v319_v59, %v316_v60 }
  0xb2   : > { %5023 = vmatprep.subr.bf16.mxu1 %v5022_v61  ;;  %v285_v62 = vpop.xlane.xlu1 %284 }
  0xb3   : > { %5025 = vmatpush3.bf16.msra.mxu1 %v5022_v61  ;;  %v282_v63 = vpop.xlane.xlu0 %281 }
  0xb4   : > { %v5010_v3 = vpack.c.bf16 %v285_v62, %v282_v63 }
  0xb6   : > { %5011 = vmatprep.subr.bf16.mxu0 %v5010_v3  ;;  %v325_v5 = vpop.xlane.xlu1 %324 }
  0xb7   : > { %5013 = vmatpush3.bf16.msra.mxu0 %v5010_v3  ;;  %v322_v8 = vpop.xlane.xlu0 %321 }
  0xb8   : > { %v5026_v9 = vpack.c.bf16 %v325_v5, %v322_v8 }
  0xba   : > { %5027 = vmatprep.subr.bf16.mxu1 %v5026_v9  ;;  %v291_v10 = vpop.xlane.xlu1 %290 }
  0xbb   : > { %5029 = vmatpush3.bf16.msra.mxu1 %v5026_v9  ;;  %v288_v11 = vpop.xlane.xlu0 %287 }
  0xbc   : > { %v5014_v12 = vpack.c.bf16 %v291_v10, %v288_v11 }
  0xbe   : > { %5015 = vmatprep.subr.bf16.mxu0 %v5014_v12  ;;  %v331_v13 = vpop.xlane.xlu1 %330 }
  0xbf   : > { %5017 = vmatpush3.bf16.msra.mxu0 %v5014_v12  ;;  %v328_v16 = vpop.xlane.xlu0 %327 }
  0xc0   : > { %v5030_v18 = vpack.c.bf16 %v331_v13, %v328_v16 }
  0xc2   : > { %4963 = vmatmul.mubr.msk.f32.vlgmr.msra.gmra.mrb[0].mxu0 %vm340_vm0, %v333_v17  ;;  %5031 = vmatprep.subr.bf16.mxu1 %v5030_v18 }
  0xc3   : > { %5033 = vmatpush3.bf16.msra.mxu1 %v5030_v18  ;;  %4965 = vmatprep.mubr.msk.f32.mxu0 %vm340_vm0, %v334_v19 }
  0xc6   : > { %4966 = vmatmul.mubr.msk.f32.gmra.mrb[2].mxu0 %vm340_vm0, %v335_v20  ;;  %4991 = vmatmul.mubr.msk.f32.vlgmr.msra.gmra.mrb[0].mxu1 %vm340_vm0, %v333_v17 }
  0xc7   : > { %4993 = vmatprep.mubr.msk.f32.mxu1 %vm340_vm0, %v334_v19  ;;  %4968 = vmatprep.mubr.msk.f32.mxu0 %vm340_vm0, %v336_v21 }
  0xca   : > { %4994 = vmatmul.mubr.msk.f32.gmra.mrb[2].mxu1 %vm340_vm0, %v335_v20  ;;  %4969 = vmatmul.mubr.msk.f32.gmra.mrb[4].mxu0 %vm340_vm0, %v337_v22 }
  0xcb   : > { %4996 = vmatprep.mubr.msk.f32.mxu1 %vm340_vm0, %v336_v21  ;;  %4971 = vmatprep.mubr.msk.f32.mxu0 %vm340_vm0, %v338_v23 }
  0xce   : > { %4997 = vmatmul.mubr.msk.f32.gmra.mrb[4].mxu1 %vm340_vm0, %v337_v22  ;;  %4972 = vmatmul.mubr.msk.f32.gmra.mrb[6].mxu0 %vm340_vm0, %v339_v28 }
  0xcf   : > { %4999 = vmatprep.mubr.msk.f32.mxu1 %vm340_vm0, %v338_v23  ;;  %v748_v23 = vld [vmem:[%s8131_s3 + $0x8] sm:$0xff] }
  0xd2   : > { %5000 = vmatmul.mubr.msk.f32.gmra.mrb[6].mxu1 %vm340_vm0, %v339_v28 }
 0x195   : > { %v4964_v29 = vpop.f32.mrb[0].mxu0 }
 0x196   : > { %598 = vperm.xlu1 %5356, %v4964_v29   ;;  %v431_v30 = vpop.f32.mrb[1].mxu0  ;;  %v576_v31 = vmul.f32 %v4964_v29, %v4964_v29  ;;  %v750_v29 = vld [vmem:[%s8131_s3 + $0x18] sm:$0xff] }
 0x197   : > { %593 = vperm.xlu0 %5357, %v431_v30   ;;  %v575_v32 = vmul.f32 %v431_v30, %v431_v30 }
 0x199   : > { %v4967_v33 = vpop.f32.mrb[2].mxu0  ;;  %v4992_v34 = vpop.f32.mrb[0].mxu1 }
 0x19a   : > { %v584_v35 = vsub.f32 %v4992_v34, %v576_v31  ;;  %608 = vperm.xlu1 %5356, %v4967_v33   ;;  %v441_v40 = vpop.f32.mrb[3].mxu0  ;;  %v536_v41 = vpop.f32.mrb[1].mxu1  ;;  %v578_v43 = vmul.f32 %v4967_v33, %v4967_v33  ;;  %v756_v31 = vld [vmem:[%s8131_s3 + $0x48] sm:$0xff]  ;;  %v758_v33 = vld [vmem:[%s8131_s3 + $0x58] sm:$0xff]  ;;  %v749_v34 = vld [vmem:[%s8131_s3 + $0x10] sm:$0xff] }
 0x19b   : > { %v583_v42 = vsub.f32 %v536_v41, %v575_v32  ;;  %v577_v45 = vmul.f32 %v441_v40, %v441_v40  ;;  %v747_v32 = vld [vmem:[%s8131_s3] sm:$0xff] }
 0x19c   : > { %v648_v44 = vadd.f32 1e-05, %v584_v35  ;;  %v8135_v35 = vmov 0.0   ;;  %v755_v41 = vld [vmem:[%s8131_s3 + $0x40] sm:$0xff] }
 0x19d   : > { %v4995_v46 = vpop.f32.mrb[2].mxu1  ;;  %v4970_v47 = vpop.f32.mrb[4].mxu0  ;;  %v647_v52 = vadd.f32 1e-05, %v583_v42  ;;  %1063 = vmatprep.mubr.f32.mxu0 %v8135_v35  ;;  %1177 = vmatprep.mubr.f32.mxu1 %v8135_v35  ;;  %v759_v42 = vld [vmem:[%s8131_s3 + $0x60] sm:$0xff] }
 0x19e   : > { %5358 = vrsqrt.f32 %v648_v44  ;;  %v586_v48 = vsub.f32 %v4995_v46, %v578_v43  ;;  %603 = vperm.xlu1 %5356, %v441_v40   ;;  %v546_v49 = vpop.f32.mrb[3].mxu1  ;;  %v580_v50 = vmul.f32 %v4970_v47, %v4970_v47  ;;  %v451_v51 = vpop.f32.mrb[5].mxu0  ;;  %618 = vperm.xlu0 %5357, %v4970_v47   ;;  %v751_v40 = vld [vmem:[%s8131_s3 + $0x20] sm:$0xff]  ;;  %v757_v43 = vld [vmem:[%s8131_s3 + $0x50] sm:$0xff]  ;;  %v762_v46 = vld [vmem:[%s8131_s3 + $0x78] sm:$0xff] }
 0x19f   : > { %v585_v53 = vsub.f32 %v546_v49, %v577_v45  ;;  %v579_v54 = vmul.f32 %v451_v51, %v451_v51  ;;  %5360 = vrsqrt.f32 %v647_v52  ;;  %v761_v44 = vld [vmem:[%s8131_s3 + $0x70] sm:$0xff]  ;;  %v752_v45 = vld [vmem:[%s8131_s3 + $0x28] sm:$0xff]  ;;  %v754_v49 = vld [vmem:[%s8131_s3 + $0x38] sm:$0xff] }
 0x1a0   : > { %v650_v61 = vadd.f32 1e-05, %v586_v48  ;;  %v753_v47 = vld [vmem:[%s8131_s3 + $0x30] sm:$0xff]  ;;  %v763_v48 = vld [vmem:[%s8131_s3 + $0x80] sm:$0xff] }
 0x1a1   : > { %v4998_v55 = vpop.f32.mrb[4].mxu1  ;;  %v4973_v56 = vpop.f32.mrb[6].mxu0  ;;  %v649_v10 = vadd.f32 1e-05, %v585_v53  ;;  %v765_v52 = vld [vmem:[%s8131_s3 + $0x90] sm:$0xff]  ;;  %v767_v53 = vld [vmem:[%s8131_s3 + $0xa0] sm:$0xff] }
 0x1a2   : > { %v588_v57 = vsub.f32 %v4998_v55, %v580_v50  ;;  %613 = vperm.xlu1 %5356, %v451_v51   ;;  %v556_v58 = vpop.f32.mrb[5].mxu1  ;;  %v582_v59 = vmul.f32 %v4973_v56, %v4973_v56  ;;  %v461_v60 = vpop.f32.mrb[7].mxu0  ;;  %628 = vperm.xlu0 %5357, %v4973_v56   ;;  %v760_v50 = vld [vmem:[%s8131_s3 + $0x68] sm:$0xff]  ;;  %v766_v51 = vld [vmem:[%s8131_s3 + $0x98] sm:$0xff] }
 0x1a3   : > { %v587_v62 = vsub.f32 %v556_v58, %v579_v54  ;;  %v581_v63 = vmul.f32 %v461_v60, %v461_v60  ;;  %v769_v54 = vld [vmem:[%s8131_s3 + $0xb0] sm:$0xff] }
 0x1a4   : > { %v652_v3 = vadd.f32 1e-05, %v588_v57 }
 0x1a5   : > { %v5001_v5 = vpop.f32.mrb[6].mxu1  ;;  %v651_v16 = vadd.f32 1e-05, %v587_v62 }
 0x1a6   : > { %5362 = vrsqrt.f32 %v652_v3  ;;  %v590_v8 = vsub.f32 %v5001_v5, %v582_v59  ;;  %623 = vperm.xlu1 %5356, %v461_v60   ;;  %v566_v9 = vpop.f32.mrb[7].mxu1 }
 0x1a7   : > { %5364 = vrsqrt.f32 %v650_v61  ;;  %v589_v11 = vsub.f32 %v566_v9, %v581_v63 }
 0x1a8   : > { %v5359_v12 = vpop.eup %5358  ;;  %v654_v13 = vadd.f32 1e-05, %v590_v8 }
 0x1a9   : > { %v5361_v17 = vpop.eup %5360  ;;  %v653_v18 = vadd.f32 1e-05, %v589_v11 }
 0x1aa   : > { %5366 = vrsqrt.f32 %v654_v13  ;;  %670 = vperm.xlu1 %5356, %v5359_v12  }
 0x1ab   : > { %5368 = vrsqrt.f32 %v649_v10 }
 0x1ac   : > { %5370 = vrsqrt.f32 %v651_v16 }
 0x1ad   : > { %5372 = vrsqrt.f32 %v653_v18 }
 0x1ae   : > { %665 = vperm.xlu1 %5356, %v5361_v17  }
 0x1b0   : > { %v5363_v19 = vpop.eup %5362 }
 0x1b1   : > { %v5365_v20 = vpop.eup %5364  ;;  %690 = vperm.xlu0 %5357, %v5363_v19  }
 0x1b2   : > { %680 = vperm.xlu1 %5356, %v5365_v20  }
 0x1b4   : > { %v5367_v21 = vpop.eup %5366 }
 0x1b5   : > { %v5369_v22 = vpop.eup %5368  ;;  %700 = vperm.xlu0 %5357, %v5367_v21  }
 0x1b6   : > { %675 = vperm.xlu1 %5356, %v5369_v22   ;;  %v5371_v28 = vpop.eup %5370 }
 0x1b7   : > { %v5373_v30 = vpop.eup %5372 }
 0x1b9   : > { %782 = vperm.xlu0 %5357, %v748_v23  }
 0x1ba   : > { %685 = vperm.xlu1 %5356, %v5371_v28  }
 0x1bd   : > { %792 = vperm.xlu0 %5357, %v750_v29  }
 0x1be   : > { %695 = vperm.xlu1 %5356, %v5373_v30  }
 0x1c1   : > { %822 = vperm.xlu0 %5357, %v756_v31  }
 0x1c2   : > { %777 = vperm.xlu1 %5356, %v747_v32  }
 0x1c5   : > { %832 = vperm.xlu0 %5357, %v758_v33  }
 0x1c6   : > { %787 = vperm.xlu1 %5356, %v749_v34  }
 0x1c9   : > { %797 = vperm.xlu0 %5357, %v751_v40  }
 0x1ca   : > { %817 = vperm.xlu1 %5356, %v755_v41  }
 0x1cd   : > { %837 = vperm.xlu0 %5357, %v759_v42  }
 0x1ce   : > { %827 = vperm.xlu1 %5356, %v757_v43  }
 0x1d1   : > { %847 = vperm.xlu0 %5357, %v761_v44  }
 0x1d2   : > { %802 = vperm.xlu1 %5356, %v752_v45  }
 0x1d5   : > { %852 = vperm.xlu0 %5357, %v762_v46  }
 0x1d6   : > { %807 = vperm.xlu1 %5356, %v753_v47  }
 0x1d9   : > { %857 = vperm.xlu0 %5357, %v763_v48  }
 0x1da   : > { %812 = vperm.xlu1 %5356, %v754_v49  }
 0x1de   : > { %842 = vperm.xlu1 %5356, %v760_v50  }
 0x1e2   : > { %872 = vperm.xlu1 %5356, %v766_v51   ;;  %v739_v51 = vld [vmem:[%s8130_s2 + $0xa0] sm:$0xff] }
 0x1e6   : > { %867 = vperm.xlu1 %5356, %v765_v52   ;;  %v721_v52 = vld [vmem:[%s8130_s2 + $0x10] sm:$0xff] }
 0x1ea   : > { %877 = vperm.xlu1 %5356, %v767_v53   ;;  %v740_v53 = vld [vmem:[%s8130_s2 + $0xa8] sm:$0xff] }
 0x1ee   : > { %887 = vperm.xlu1 %5356, %v769_v54   ;;  %v722_v54 = vld [vmem:[%s8130_s2 + $0x18] sm:$0xff] }
 0x215   : > { %v599_v55 = vpop.permute.xlu1 %598 }
 0x216   : > { %v594_v60 = vpop.permute.xlu0 %593  ;;  %v633_v63 = vsub.f32 %v5998_v6, %v599_v55  ;;  %v634_v3 = vsub.f32 %v6001_v7, %v599_v55  ;;  %v741_v55 = vld [vmem:[%s8130_s2 + $0xb0] sm:$0xff] }
 0x217   : > { %v631_v5 = vsub.f32 %v5988_v2, %v594_v60  ;;  %v632_v8 = vsub.f32 %v5993_v4, %v594_v60  ;;  %v727_v60 = vld [vmem:[%s8130_s2 + $0x40] sm:$0xff] }
 0x219   : > { %v609_v56 = vpop.permute.xlu1 %608 }
 0x21a   : > { %v637_v6 = vsub.f32 %v5982_v0, %v609_v56  ;;  %v638_v7 = vsub.f32 %v5985_v1, %v609_v56  ;;  %v723_v56 = vld [vmem:[%s8130_s2 + $0x20] sm:$0xff] }
 0x21d   : > { %v604_v57 = vpop.permute.xlu1 %603  ;;  %v619_v62 = vpop.permute.xlu0 %618 }
 0x21e   : > { %v635_v2 = vsub.f32 %v6014_v14, %v604_v57  ;;  %v636_v4 = vsub.f32 %v6017_v15, %v604_v57  ;;  %v641_v30 = vsub.f32 %v6030_v24, %v619_v62  ;;  %v642_v31 = vsub.f32 %v6033_v25, %v619_v62  ;;  %v724_v57 = vld [vmem:[%s8130_s2 + $0x28] sm:$0xff]  ;;  %v729_v62 = vld [vmem:[%s8130_s2 + $0x50] sm:$0xff] }
 0x221   : > { %v614_v58 = vpop.permute.xlu1 %613  ;;  %v629_v16 = vpop.permute.xlu0 %628 }
 0x222   : > { %v639_v32 = vsub.f32 %v6036_v26, %v614_v58  ;;  %v640_v0 = vsub.f32 %v6039_v27, %v614_v58  ;;  %v645_v43 = vsub.f32 %v6054_v36, %v629_v16  ;;  %v646_v24 = vsub.f32 %v6057_v37, %v629_v16  ;;  %v719_v37 = vld [vmem:[%s8130_s2] sm:$0xff]  ;;  %v725_v58 = vld [vmem:[%s8130_s2 + $0x30] sm:$0xff] }
 0x223   : > { %v743_v16 = vld [vmem:[%s8130_s2 + $0xc0] sm:$0xff] }
 0x225   : > { %v624_v59 = vpop.permute.xlu1 %623 }
 0x226   : > { %v643_v25 = vsub.f32 %v6060_v38, %v624_v59  ;;  %v644_v26 = vsub.f32 %v6063_v39, %v624_v59  ;;  %v738_v38 = vld [vmem:[%s8130_s2 + $0x98] sm:$0xff]  ;;  %v720_v39 = vld [vmem:[%s8130_s2 + $0x8] sm:$0xff] }
 0x227   : > { %v726_v59 = vld [vmem:[%s8130_s2 + $0x38] sm:$0xff] }
 0x229   : > { %v671_v61 = vpop.permute.xlu1 %670 }
 0x22a   : > { %v705_v10 = vmul.f32 %v671_v61, %v633_v63  ;;  %v706_v11 = vmul.f32 %v671_v61, %v634_v3  ;;  %v728_v61 = vld [vmem:[%s8130_s2 + $0x48] sm:$0xff]  ;;  %v730_v63 = vld [vmem:[%s8130_s2 + $0x58] sm:$0xff]  ;;  %v731_v3 = vld [vmem:[%s8130_s2 + $0x60] sm:$0xff] }
 0x22d   : > { %v666_v9 = vpop.permute.xlu1 %665 }
 0x22e   : > { %v703_v12 = vmul.f32 %v666_v9, %v631_v5  ;;  %v704_v13 = vmul.f32 %v666_v9, %v632_v8  ;;  %v732_v5 = vld [vmem:[%s8130_s2 + $0x68] sm:$0xff]  ;;  %v733_v8 = vld [vmem:[%s8130_s2 + $0x70] sm:$0xff]  ;;  %v734_v9 = vld [vmem:[%s8130_s2 + $0x78] sm:$0xff] }
 0x230   : > { %v5034_v17 = vpack.c.bf16 %v706_v11, %v704_v13  ;;  %v5036_v18 = vpack.c.bf16 %v705_v10, %v703_v12  ;;  %v691_v20 = vpop.permute.xlu0 %690  ;;  %v735_v10 = vld [vmem:[%s8130_s2 + $0x80] sm:$0xff]  ;;  %v736_v11 = vld [vmem:[%s8130_s2 + $0x88] sm:$0xff]  ;;  %v737_v12 = vld [vmem:[%s8130_s2 + $0x90] sm:$0xff] }
 0x231   : > { %v681_v19 = vpop.permute.xlu1 %680  ;;  %v713_v34 = vmul.f32 %v691_v20, %v641_v30  ;;  %v714_v40 = vmul.f32 %v691_v20, %v642_v31  ;;  %v742_v13 = vld [vmem:[%s8130_s2 + $0xb8] sm:$0xff] }
 0x232   : > { %5035 = vmatprep.subr.bf16.mxu0 %v5034_v17  ;;  %5338 = vmatprep.subr.bf16.mxu1 %v5034_v17  ;;  %v709_v22 = vmul.f32 %v681_v19, %v637_v6  ;;  %v710_v23 = vmul.f32 %v681_v19, %v638_v7  ;;  %v744_v17 = vld [vmem:[%s8130_s2 + $0xc8] sm:$0xff]  ;;  %v746_v19 = vld [vmem:[%s8130_s2 + $0xd8] sm:$0xff] }
 0x233   : > { %5037 = vmatpush1.bf16.msra.mxu0 %v5036_v18  ;;  %5342 = vmatpush1.bf16.msra.mxu1 %v5036_v18  ;;  %v745_v18 = vld [vmem:[%s8130_s2 + $0xd0] sm:$0xff] }
 0x234   : > { %v701_v15 = vpop.permute.xlu0 %700 }
 0x235   : > { %v676_v21 = vpop.permute.xlu1 %675  ;;  %v717_v45 = vmul.f32 %v701_v15, %v645_v43  ;;  %v718_v47 = vmul.f32 %v701_v15, %v646_v24 }
 0x236   : > { %v707_v28 = vmul.f32 %v676_v21, %v635_v2  ;;  %v708_v29 = vmul.f32 %v676_v21, %v636_v4 }
 0x238   : > { %v5038_v33 = vpack.c.bf16 %v710_v23, %v708_v29  ;;  %v5040_v1 = vpack.c.bf16 %v709_v22, %v707_v28  ;;  %v6347_v22 = vpop.permute.xlu0 %782 }
 0x239   : > { %v686_v14 = vpop.permute.xlu1 %685 }
 0x23a   : > { %v711_v41 = vmul.f32 %v686_v14, %v639_v32  ;;  %v712_v42 = vmul.f32 %v686_v14, %v640_v0  ;;  %5039 = vmatprep.subr.bf16.mxu0 %v5038_v33  ;;  %5339 = vmatprep.subr.bf16.mxu1 %v5038_v33 }
 0x23b   : > { %5041 = vmatpush1.bf16.msra.mxu0 %v5040_v1  ;;  %5343 = vmatpush1.bf16.msra.mxu1 %v5040_v1 }
 0x23c   : > { %v5042_v27 = vpack.c.bf16 %v714_v40, %v712_v42  ;;  %v5044_v44 = vpack.c.bf16 %v713_v34, %v711_v41  ;;  %v6365_v40 = vpop.permute.xlu0 %792 }
 0x23d   : > { %v696_v46 = vpop.permute.xlu1 %695 }
 0x23e   : > { %v715_v48 = vmul.f32 %v696_v46, %v643_v25  ;;  %v716_v49 = vmul.f32 %v696_v46, %v644_v26  ;;  %5043 = vmatprep.subr.bf16.mxu0 %v5042_v27  ;;  %5340 = vmatprep.subr.bf16.mxu1 %v5042_v27 }
 0x23f   : > { %5045 = vmatpush1.bf16.msra.mxu0 %v5044_v44  ;;  %5344 = vmatpush1.bf16.msra.mxu1 %v5044_v44 }
 0x240   : > { %v5046_v36 = vpack.c.bf16 %v718_v47, %v716_v49  ;;  %v5048_v50 = vpack.c.bf16 %v717_v45, %v715_v48 }
 0x241   : > { %v6337_v6 = vpop.permute.xlu1 %777 }
 0x242   : > { %5047 = vmatprep.subr.bf16.mxu0 %v5046_v36  ;;  %5341 = vmatprep.subr.bf16.mxu1 %v5046_v36 }
 0x243   : > { %5049 = vmatpush1.bf16.msra.mxu0 %v5048_v50  ;;  %5345 = vmatpush1.bf16.msra.mxu1 %v5048_v50  ;;  %v823_v50 = vpop.permute.xlu0 %822 }
 0x245   : > { %v6356_v32 = vpop.permute.xlu1 %787 }
 0x246   : > { %4746 = vmatmul.mubr.msk.f32.vlgmr.msra.gmra.mrb[8].mxu0 %vm340_vm0, %v719_v37  ;;  %4765 = vmatmul.mubr.msk.f32.vlgmr.msra.gmra.mrb[8].mxu1 %vm340_vm0, %v738_v38 }
 0x247   : > { %1069 = vmatprep.mubr.f32.mxu0 %v8135_v35  ;;  %1183 = vmatprep.mubr.f32.mxu1 %v8135_v35 }
 0x249   : > { %v818_v45 = vpop.permute.xlu1 %817 }
 0x24a   : > { %4747 = vmatmul.mubr.msk.f32.gmra.mrb[10].mxu0 %vm340_vm0, %v720_v39  ;;  %4766 = vmatmul.mubr.msk.f32.gmra.mrb[10].mxu1 %vm340_vm0, %v739_v51  ;;  %v833_v51 = vpop.permute.xlu0 %832 }
 0x24b   : > { %1075 = vmatprep.mubr.f32.mxu0 %v8135_v35  ;;  %1189 = vmatprep.mubr.f32.mxu1 %v8135_v35 }
 0x24d   : > { %v828_v48 = vpop.permute.xlu1 %827 }
 0x24e   : > { %4748 = vmatmul.mubr.msk.f32.gmra.mrb[12].mxu0 %vm340_vm0, %v721_v52  ;;  %4767 = vmatmul.mubr.msk.f32.gmra.mrb[12].mxu1 %vm340_vm0, %v740_v53 }
 0x24f   : > { %1081 = vmatprep.mubr.f32.mxu0 %v8135_v35  ;;  %1195 = vmatprep.mubr.f32.mxu1 %v8135_v35 }
 0x251   : > { %v6390_v39 = vpop.permute.xlu1 %802 }
 0x252   : > { %4749 = vmatmul.mubr.msk.f32.gmra.mrb[14].mxu0 %vm340_vm0, %v722_v54  ;;  %4768 = vmatmul.mubr.msk.f32.gmra.mrb[14].mxu1 %vm340_vm0, %v741_v55 }
 0x253   : > { %1087 = vmatprep.mubr.f32.mxu0 %v8135_v35  ;;  %1201 = vmatprep.mubr.f32.mxu1 %v8135_v35 }
 0x256   : > { %4750 = vmatmul.mubr.msk.f32.gmra.mrb[16].mxu0 %vm340_vm0, %v723_v56  ;;  %4769 = vmatmul.mubr.msk.f32.gmra.mrb[16].mxu1 %vm340_vm0, %v742_v13 }
 0x257   : > { %1093 = vmatprep.mubr.f32.mxu0 %v8135_v35  ;;  %1207 = vmatprep.mubr.f32.mxu1 %v8135_v35 }
 0x25a   : > { %4751 = vmatmul.mubr.msk.f32.gmra.mrb[18].mxu0 %vm340_vm0, %v724_v57  ;;  %4770 = vmatmul.mubr.msk.f32.gmra.mrb[18].mxu1 %vm340_vm0, %v743_v16 }
 0x25b   : > { %1099 = vmatprep.mubr.f32.mxu0 %v8135_v35  ;;  %1213 = vmatprep.mubr.f32.mxu1 %v8135_v35 }
 0x25e   : > { %4752 = vmatmul.mubr.msk.f32.gmra.mrb[20].mxu0 %vm340_vm0, %v725_v58  ;;  %4771 = vmatmul.mubr.msk.f32.gmra.mrb[20].mxu1 %vm340_vm0, %v744_v17 }
 0x25f   : > { %1105 = vmatprep.mubr.f32.mxu0 %v8135_v35  ;;  %1219 = vmatprep.mubr.f32.mxu1 %v8135_v35 }
 0x262   : > { %4753 = vmatmul.mubr.msk.f32.gmra.mrb[22].mxu0 %vm340_vm0, %v726_v59  ;;  %4772 = vmatmul.mubr.msk.f32.gmra.mrb[22].mxu1 %vm340_vm0, %v745_v18  ;;  %v6392_v59 = vpop.permute.xlu1 %807 }
 0x263   : > { %1111 = vmatprep.mubr.f32.mxu0 %v8135_v35  ;;  %1225 = vmatprep.mubr.f32.mxu1 %v8135_v35 }
 0x266   : > { %4754 = vmatmul.mubr.msk.f32.gmra.mrb[24].mxu0 %vm340_vm0, %v727_v60  ;;  %4773 = vmatmul.mubr.msk.f32.gmra.mrb[24].mxu1 %vm340_vm0, %v746_v19 }
 0x267   : > { %1117 = vmatprep.mubr.f32.mxu0 %v8135_v35  ;;  %1457 = vmatprep.mubr.f32.mxu1 %v8135_v35 }
 0x26a   : > { %4755 = vmatmul.mubr.msk.f32.gmra.mrb[26].mxu0 %vm340_vm0, %v728_v61 }
 0x26b   : > { %1123 = vmatprep.mubr.f32.mxu0 %v8135_v35 }
 0x26e   : > { %4756 = vmatmul.mubr.msk.f32.gmra.mrb[28].mxu0 %vm340_vm0, %v729_v62 }
 0x26f   : > { %1129 = vmatprep.mubr.f32.mxu0 %v8135_v35 }
 0x272   : > { %4757 = vmatmul.mubr.msk.f32.gmra.mrb[30].mxu0 %vm340_vm0, %v730_v63  ;;  %v6394_v63 = vpop.permute.xlu0 %797 }
 0x273   : > { %1135 = vmatprep.mubr.f32.mxu0 %v8135_v35 }
 0x276   : > { %4758 = vmatmul.mubr.msk.f32.gmra.mrb[32].mxu0 %vm340_vm0, %v731_v3  ;;  %v838_v16 = vpop.permute.xlu0 %837 }
 0x277   : > { %1141 = vmatprep.mubr.f32.mxu0 %v8135_v35 }
 0x27a   : > { %4759 = vmatmul.mubr.msk.f32.gmra.mrb[34].mxu0 %vm340_vm0, %v732_v5 }
 0x27b   : > { %1147 = vmatprep.mubr.f32.mxu0 %v8135_v35 }
 0x27e   : > { %4760 = vmatmul.mubr.msk.f32.gmra.mrb[36].mxu0 %vm340_vm0, %v733_v8 }
 0x27f   : > { %1153 = vmatprep.mubr.f32.mxu0 %v8135_v35 }
 0x282   : > { %4761 = vmatmul.mubr.msk.f32.gmra.mrb[38].mxu0 %vm340_vm0, %v734_v9 }
 0x283   : > { %1159 = vmatprep.mubr.f32.mxu0 %v8135_v35 }
 0x286   : > { %4762 = vmatmul.mubr.msk.f32.gmra.mrb[40].mxu0 %vm340_vm0, %v735_v10  ;;  %v6396_v10 = vpop.permute.xlu1 %812 }
 0x287   : > { %1165 = vmatprep.mubr.f32.mxu0 %v8135_v35 }
 0x28a   : > { %4763 = vmatmul.mubr.msk.f32.gmra.mrb[42].mxu0 %vm340_vm0, %v736_v11 }
 0x28b   : > { %1171 = vmatprep.mubr.f32.mxu0 %v8135_v35 }
 0x28e   : > { %4764 = vmatmul.mubr.msk.f32.gmra.mrb[44].mxu0 %vm340_vm0, %v737_v12 }
 0x28f   : > { %1874 = vmatprep.mubr.f32.mxu0 %v8135_v35 }
 0x319   : > { %v1065_v7 = vpop.f32.mrb[8].mxu0  ;;  %v6340_v2 = vpop.f32.mrb[8].mxu1 }
 0x31a   : > { %8314 = vst [vmem:[#allocation2_spill] sm:$0xff] %v6340_v2  ;;  %v1066_v4 = vadd.f32 %v1065_v7, %v6337_v6  ;;  %v6343_v20 = vpop.f32.mrb[9].mxu0  ;;  %v6345_v21 = vpop.f32.mrb[9].mxu1 }
 0x31b   : > { %v843_v7 = vpop.permute.xlu1 %842 }
 0x31c   : > { %1232 = vxpose.xlu1.b32.start [1/2] (short) %v1066_v4, 128 }
 0x31d   : > { %v1071_v23 = vpop.f32.mrb[10].mxu0  ;;  %v6349_v28 = vpop.f32.mrb[10].mxu1 }
 0x31e   : > { %8315 = vst [vmem:[#allocation3_spill] sm:$0xff] %v6349_v28  ;;  %v1072_v29 = vadd.f32 %v1071_v23, %v6347_v22  ;;  %v6352_v30 = vpop.f32.mrb[11].mxu0  ;;  %v6354_v31 = vpop.f32.mrb[11].mxu1 }
 0x31f   : > { %8316 = vst [vmem:[#allocation4_spill] sm:$0xff] %v6354_v31 }
 0x320   : > { %1233 = vxpose.xlu1.b32.end [2/2] (short) %v1072_v29, 128 }
 0x321   : > { %v1077_v0 = vpop.f32.mrb[12].mxu0  ;;  %v6358_v33 = vpop.f32.mrb[12].mxu1 }
 0x322   : > { %8317 = vst [vmem:[#allocation5_spill] sm:$0xff] %v6358_v33  ;;  %v1078_v1 = vadd.f32 %v1077_v0, %v6356_v32  ;;  %v6361_v34 = vpop.f32.mrb[13].mxu0  ;;  %v6363_v14 = vpop.f32.mrb[13].mxu1 }
 0x323   : > { %8318 = vst [vmem:[#allocation6_spill] sm:$0xff] %v6363_v14 }
 0x324   : > { %1650 = vxpose.xlu0.b32.start [1/2] (short) %v1078_v1, 128  ;;  %v848_v1 = vpop.permute.xlu0 %847 }
 0x325   : > { %v1083_v15 = vpop.f32.mrb[14].mxu0  ;;  %v6367_v41 = vpop.f32.mrb[14].mxu1 }
 0x326   : > { %8319 = vst [vmem:[#allocation7_spill] sm:$0xff] %v6367_v41  ;;  %v1084_v42 = vadd.f32 %v1083_v15, %v6365_v40  ;;  %v6370_v43 = vpop.f32.mrb[15].mxu0  ;;  %v6372_v24 = vpop.f32.mrb[15].mxu1 }
 0x327   : > { %8320 = vst [vmem:[#allocation8_spill] sm:$0xff] %v6372_v24 }
 0x328   : > { %1651 = vxpose.xlu0.b32.end [2/2] (short) %v1084_v42, 128 }
 0x329   : > { %v6374_v25 = vpop.f32.mrb[16].mxu0 }
 0x32a   : > { %v6376_v26 = vpop.f32.mrb[17].mxu0 }
 0x32d   : > { %v6378_v27 = vpop.f32.mrb[18].mxu0 }
 0x32e   : > { %v6380_v44 = vpop.f32.mrb[19].mxu0 }
 0x331   : > { %v6382_v46 = vpop.f32.mrb[20].mxu0 }
 0x332   : > { %v6384_v47 = vpop.f32.mrb[21].mxu0 }
 0x335   : > { %v6386_v49 = vpop.f32.mrb[22].mxu0 }
 0x336   : > { %v6388_v36 = vpop.f32.mrb[23].mxu0 }
 0x339   : > { %v1113_v37 = vpop.f32.mrb[24].mxu0 }
 0x33a   : > { %v1115_v38 = vpop.f32.mrb[25].mxu0  ;;  %v1114_v53 = vadd.f32 %v1113_v37, %v818_v45 }
 0x33b   : > { %v1116_v56 = vadd.f32 %v1115_v38, %v818_v45  ;;  %v853_v38 = vpop.permute.xlu0 %852 }
 0x33d   : > { %v1119_v52 = vpop.f32.mrb[26].mxu0 }
 0x33e   : > { %v1120_v54 = vadd.f32 %v1119_v52, %v823_v50  ;;  %v1121_v55 = vpop.f32.mrb[27].mxu0 }
 0x33f   : > { %v1122_v57 = vadd.f32 %v1121_v55, %v823_v50  ;;  %v1080_v55 = vadd.f32 %v6361_v34, %v6356_v32  ;;  %v1068_v32 = vadd.f32 %v6343_v20, %v6337_v6  ;;  %v1096_v20 = vadd.f32 %v6378_v27, %v6390_v39 }
 0x340   : > { %v5052_v58 = vpack.c.bf16 %v1120_v54, %v1114_v53 }
 0x341   : > { %v5050_v60 = vpack.c.bf16 %v1122_v57, %v1116_v56  ;;  %v1125_v61 = vpop.f32.mrb[28].mxu0 }
 0x342   : > { %v1127_v62 = vpop.f32.mrb[29].mxu0  ;;  %v1126_v5 = vadd.f32 %v1125_v61, %v828_v48 }
 0x343   : > { %5051 = vmatprep.subr.bf16.mxu1 %v5050_v60  ;;  %v1128_v11 = vadd.f32 %v1127_v62, %v828_v48 }
 0x344   : > { %5053 = vmatpush1.bf16.msra.mxu1 %v5052_v58 }
 0x345   : > { %v1131_v3 = vpop.f32.mrb[30].mxu0 }
 0x346   : > { %v1132_v8 = vadd.f32 %v1131_v3, %v833_v51  ;;  %v1133_v9 = vpop.f32.mrb[31].mxu0  ;;  %v1086_v3 = vadd.f32 %v6370_v43, %v6365_v40 }
 0x347   : > { %v1134_v12 = vadd.f32 %v1133_v9, %v833_v51 }
 0x348   : > { %v5056_v13 = vpack.c.bf16 %v1132_v8, %v1126_v5 }
 0x349   : > { %v5054_v17 = vpack.c.bf16 %v1134_v12, %v1128_v11  ;;  %v1137_v18 = vpop.f32.mrb[32].mxu0  ;;  %v1074_v11 = vadd.f32 %v6352_v30, %v6347_v22  ;;  %v6418_v12 = vpop.permute.xlu1 %872  ;;  %v1092_v22 = vadd.f32 %v6376_v26, %v6394_v63 }
 0x34a   : > { %v1139_v19 = vpop.f32.mrb[33].mxu0  ;;  %v1138_v23 = vadd.f32 %v1137_v18, %v838_v16  ;;  %8326 = vst [vmem:[#allocation14_spill] sm:$0xff] %v6418_v12 }
 0x34b   : > { %5055 = vmatprep.subr.bf16.mxu0 %v5054_v17  ;;  %v1140_v15 = vadd.f32 %v1139_v19, %v838_v16  ;;  %v6434_v16 = vpop.permute.xlu0 %857 }
 0x34c   : > { %5057 = vmatpush1.bf16.msra.mxu0 %v5056_v13  ;;  %v1090_v13 = vadd.f32 %v6374_v25, %v6394_v63  ;;  %8330 = vst [vmem:[#allocation18_spill] sm:$0xff] %v6434_v16  ;;  %v1098_v25 = vadd.f32 %v6380_v44, %v6390_v39 }
 0x34d   : > { %v1143_v4 = vpop.f32.mrb[34].mxu0  ;;  %v6420_v40 = vpop.permute.xlu1 %867 }
 0x34e   : > { %v1144_v29 = vadd.f32 %v1143_v4, %v843_v7  ;;  %v1145_v0 = vpop.f32.mrb[35].mxu0  ;;  %8327 = vst [vmem:[#allocation15_spill] sm:$0xff] %v6420_v40 }
 0x34f   : > { %v1146_v42 = vadd.f32 %v1145_v0, %v843_v7 }
 0x350   : > { %v5060_v45 = vpack.c.bf16 %v1144_v29, %v1138_v23 }
 0x351   : > { %v5058_v50 = vpack.c.bf16 %v1146_v42, %v1140_v15  ;;  %v1149_v37 = vpop.f32.mrb[36].mxu0  ;;  %v6422_v43 = vpop.permute.xlu1 %877 }
 0x352   : > { %v1151_v48 = vpop.f32.mrb[37].mxu0  ;;  %v1150_v52 = vadd.f32 %v1149_v37, %v848_v1  ;;  %8328 = vst [vmem:[#allocation16_spill] sm:$0xff] %v6422_v43 }
 0x353   : > { %5059 = vmatprep.subr.bf16.mxu1 %v5058_v50  ;;  %v1152_v56 = vadd.f32 %v1151_v48, %v848_v1 }
 0x355   : > { %v1155_v51 = vpop.f32.mrb[38].mxu0  ;;  %v6426_v6 = vpop.permute.xlu1 %887 }
 0x356   : > { %v1156_v53 = vadd.f32 %v1155_v51, %v853_v38  ;;  %v1157_v54 = vpop.f32.mrb[39].mxu0  ;;  %8329 = vst [vmem:[#allocation17_spill] sm:$0xff] %v6426_v6 }
 0x357   : > { %v1158_v57 = vadd.f32 %v1157_v54, %v853_v38 }
 0x358   : > { %v5064_v58 = vpack.c.bf16 %v1156_v53, %v1150_v52 }
 0x359   : > { %v5062_v60 = vpack.c.bf16 %v1158_v57, %v1152_v56  ;;  %v6400_v61 = vpop.f32.mrb[40].mxu0  ;;  %1682 = vxpose.xlu1.b32.start [1/2] (short) %v1080_v55, 128  ;;  %v1104_v55 = vadd.f32 %v6384_v47, %v6392_v59 }
 0x35a   : > { %8321 = vst [vmem:[#allocation9_spill] sm:$0xff] %v6400_v61  ;;  %v6402_v62 = vpop.f32.mrb[41].mxu0 }
 0x35b   : > { %5063 = vmatprep.subr.bf16.mxu0 %v5062_v60 }
 0x35d   : > { %1683 = vxpose.xlu1.b32.end [2/2] (short) %v1086_v3, 128  ;;  %v6406_v5 = vpop.f32.mrb[42].mxu0  ;;  %v1102_v3 = vadd.f32 %v6382_v46, %v6392_v59 }
 0x35e   : > { %8322 = vst [vmem:[#allocation10_spill] sm:$0xff] %v6406_v5  ;;  %v6408_v8 = vpop.f32.mrb[43].mxu0 }
 0x35f   : > { %8323 = vst [vmem:[#allocation11_spill] sm:$0xff] %v6408_v8 }
 0x361   : > { %v6412_v34 = vpop.f32.mrb[44].mxu0  ;;  %1264 = vxpose.xlu0.b32.start [1/2] (short) %v1068_v32, 128 }
 0x362   : > { %8324 = vst [vmem:[#allocation12_spill] sm:$0xff] %v6412_v34  ;;  %v6414_v9 = vpop.f32.mrb[45].mxu0 }
 0x363   : > { %8325 = vst [vmem:[#allocation13_spill] sm:$0xff] %v6414_v9 }
 0x365   : > { %1265 = vxpose.xlu0.b32.end [2/2] (short) %v1074_v11, 128  ;;  %v1108_v11 = vadd.f32 %v6386_v49, %v6396_v10 }
 0x396   : > { %2067 = vxpose.xlu1.b32.start [1/2] (short) %v1090_v13, 128 }
 0x39a   : > { %2068 = vxpose.xlu1.b32.end [2/2] (short) %v1096_v20, 128 }
 0x39c   : > { %v1248_v30 = vpop.trf.xlu1 }
 0x39d   : > { %4774 = vmatmul.mubr.msk.f32.vlgmr.msra.gmra.mrb[26].mxu1 %vm1296_vm1, %v1248_v30 }
 0x39e   : > { %5061 = vmatpush1.bf16.msra.mxu1 %v5060_v45  ;;  %2099 = vxpose.xlu0.b32.start [1/2] (short) %v1092_v22, 128  ;;  %v6510_v22 = vpop.f32.mrb[16].mxu1 }
 0x39f   : > { %1463 = vmatprep.mubr.f32.mxu1 %v8135_v35  ;;  %8331 = vst [vmem:[#allocation19_spill] sm:$0xff] %v6510_v22  ;;  %v6514_v49 = vpop.f32.mrb[17].mxu1 }
 0x3a0   : > { %v1249_v17 = vpop.trf.xlu1  ;;  %8332 = vst [vmem:[#allocation20_spill] sm:$0xff] %v6514_v49 }
 0x3a1   : > { %4775 = vmatmul.mubr.msk.f32.gmra.mrb[28].mxu1 %vm1296_vm1, %v1249_v17 }
 0x3a2   : > { %2100 = vxpose.xlu0.b32.end [2/2] (short) %v1098_v25, 128  ;;  %1469 = vmatprep.mubr.f32.mxu1 %v8135_v35 }
 0x3a4   : > { %v1250_v27 = vpop.trf.xlu1  ;;  %v1666_v26 = vpop.trf.xlu0 }
 0x3a5   : > { %4806 = vmatmul.mubr.msk.f32.vlgmr.msra.gmra.mrb[46].mxu0 %vm1296_vm1, %v1666_v26  ;;  %4776 = vmatmul.mubr.msk.f32.gmra.mrb[30].mxu1 %vm1296_vm1, %v1250_v27 }
 0x3a6   : > { %5065 = vmatpush1.bf16.msra.mxu0 %v5064_v58  ;;  %1880 = vmatprep.mubr.f32.mxu0 %v8135_v35  ;;  %v1110_v58 = vadd.f32 %v6388_v36, %v6396_v10  ;;  %v6516_v10 = vpop.f32.mrb[18].mxu1 }
 0x3a7   : > { %1475 = vmatprep.mubr.f32.mxu1 %v8135_v35  ;;  %8333 = vst [vmem:[#allocation21_spill] sm:$0xff] %v6516_v10  ;;  %v6520_v17 = vpop.f32.mrb[19].mxu1 }
 0x3a8   : > { %v1251_v63 = vpop.trf.xlu1  ;;  %v1667_v18 = vpop.trf.xlu0  ;;  %8334 = vst [vmem:[#allocation22_spill] sm:$0xff] %v6520_v17 }
 0x3a9   : > { %4807 = vmatmul.mubr.msk.f32.gmra.mrb[48].mxu0 %vm1296_vm1, %v1667_v18  ;;  %4777 = vmatmul.mubr.msk.f32.gmra.mrb[32].mxu1 %vm1296_vm1, %v1251_v63  ;;  %v6524_v27 = vpop.f32.mrb[20].mxu1 }
 0x3aa   : > { %1886 = vmatprep.mubr.f32.mxu0 %v8135_v35  ;;  %1481 = vmatprep.mubr.f32.mxu1 %v8135_v35  ;;  %8335 = vst [vmem:[#allocation23_spill] sm:$0xff] %v6524_v27  ;;  %v6526_v26 = vpop.f32.mrb[21].mxu1 }
 0x3ab   : > { %8336 = vst [vmem:[#allocation24_spill] sm:$0xff] %v6526_v26 }
 0x3ac   : > { %v1252_v44 = vpop.trf.xlu1  ;;  %v1668_v39 = vpop.trf.xlu0 }
 0x3ad   : > { %4808 = vmatmul.mubr.msk.f32.gmra.mrb[50].mxu0 %vm1296_vm1, %v1668_v39  ;;  %4778 = vmatmul.mubr.msk.f32.gmra.mrb[34].mxu1 %vm1296_vm1, %v1252_v44  ;;  %v6530_v44 = vpop.f32.mrb[22].mxu1 }
 0x3ae   : > { %1892 = vmatprep.mubr.f32.mxu0 %v8135_v35  ;;  %1487 = vmatprep.mubr.f32.mxu1 %v8135_v35  ;;  %8337 = vst [vmem:[#allocation25_spill] sm:$0xff] %v6530_v44  ;;  %v6534_v39 = vpop.f32.mrb[23].mxu1 }
 0x3af   : > { %8338 = vst [vmem:[#allocation26_spill] sm:$0xff] %v6534_v39 }
 0x3b0   : > { %v1253_v19 = vpop.trf.xlu1  ;;  %v1669_v7 = vpop.trf.xlu0 }
 0x3b1   : > { %4809 = vmatmul.mubr.msk.f32.gmra.mrb[52].mxu0 %vm1296_vm1, %v1669_v7  ;;  %4779 = vmatmul.mubr.msk.f32.gmra.mrb[36].mxu1 %vm1296_vm1, %v1253_v19  ;;  %v6536_v19 = vpop.f32.mrb[24].mxu1 }
 0x3b2   : > { %1898 = vmatprep.mubr.f32.mxu0 %v8135_v35  ;;  %1493 = vmatprep.mubr.f32.mxu1 %v8135_v35  ;;  %8339 = vst [vmem:[#allocation27_spill] sm:$0xff] %v6536_v19  ;;  %v8341_v19 = vmov 0.0  }
 0x3b4   : > { %v1254_v4 = vpop.trf.xlu1  ;;  %v1670_v23 = vpop.trf.xlu0 }
 0x3b5   : > { %4810 = vmatmul.mubr.msk.f32.gmra.mrb[54].mxu0 %vm1296_vm1, %v1670_v23  ;;  %4780 = vmatmul.mubr.msk.f32.gmra.mrb[38].mxu1 %vm1296_vm1, %v1254_v4  ;;  %v6540_v23 = vpop.f32.mrb[25].mxu1 }
 0x3b6   : > { %1904 = vmatprep.mubr.f32.mxu0 %v8135_v35  ;;  %1499 = vmatprep.mubr.f32.mxu1 %v8135_v35  ;;  %8340 = vst [vmem:[#allocation28_spill] sm:$0xff] %v6540_v23 }
 0x3b8   : > { %v1255_v29 = vpop.trf.xlu1  ;;  %v1671_v0 = vpop.trf.xlu0 }
 0x3b9   : > { %4811 = vmatmul.mubr.msk.f32.gmra.mrb[56].mxu0 %vm1296_vm1, %v1671_v0  ;;  %4781 = vmatmul.mubr.msk.f32.gmra.mrb[40].mxu1 %vm1296_vm1, %v1255_v29 }
 0x3ba   : > { %1910 = vmatprep.mubr.f32.mxu0 %v8135_v35  ;;  %1505 = vmatprep.mubr.f32.mxu1 %v8135_v35 }
 0x3bc   : > { %v1256_v1 = vpop.trf.xlu1  ;;  %v1672_v15 = vpop.trf.xlu0 }
 0x3bd   : > { %4812 = vmatmul.mubr.msk.f32.gmra.mrb[58].mxu0 %vm1296_vm1, %v1672_v15  ;;  %4782 = vmatmul.mubr.msk.f32.gmra.mrb[42].mxu1 %vm1296_vm1, %v1256_v1 }
 0x3be   : > { %1916 = vmatprep.mubr.f32.mxu0 %v8135_v35  ;;  %1511 = vmatprep.mubr.f32.mxu1 %v8135_v35 }
 0x3c0   : > { %v1257_v42 = vpop.trf.xlu1  ;;  %v1673_v45 = vpop.trf.xlu0 }
 0x3c1   : > { %4813 = vmatmul.mubr.msk.f32.gmra.mrb[60].mxu0 %vm1296_vm1, %v1673_v45  ;;  %4783 = vmatmul.mubr.msk.f32.gmra.mrb[44].mxu1 %vm1296_vm1, %v1257_v42 }
 0x3c2   : > { %1922 = vmatprep.mubr.f32.mxu0 %v8135_v35  ;;  %1517 = vmatprep.mubr.f32.mxu1 %v8135_v35 }
 0x3c4   : > { %v1258_v50 = vpop.trf.xlu1  ;;  %v1674_v37 = vpop.trf.xlu0 }
 0x3c5   : > { %4814 = vmatmul.mubr.msk.f32.gmra.mrb[62].mxu0 %vm1296_vm1, %v1674_v37  ;;  %4784 = vmatmul.mubr.msk.f32.gmra.mrb[46].mxu1 %vm1296_vm1, %v1258_v50 }
 0x3c6   : > { %1928 = vmatprep.mubr.f32.mxu0 %v8135_v35  ;;  %1523 = vmatprep.mubr.f32.mxu1 %v8135_v35 }
 0x3c8   : > { %v1259_v48 = vpop.trf.xlu1  ;;  %v1675_v38 = vpop.trf.xlu0 }
 0x3c9   : > { %4815 = vmatmul.mubr.msk.f32.gmra.mrb[64].mxu0 %vm1296_vm1, %v1675_v38  ;;  %4785 = vmatmul.mubr.msk.f32.gmra.mrb[48].mxu1 %vm1296_vm1, %v1259_v48 }
 0x3ca   : > { %1934 = vmatprep.mubr.f32.mxu0 %v8135_v35  ;;  %1529 = vmatprep.mubr.f32.mxu1 %v8135_v35 }
 0x3cc   : > { %v1260_v51 = vpop.trf.xlu1  ;;  %v1676_v52 = vpop.trf.xlu0 }
 0x3cd   : > { %4816 = vmatmul.mubr.msk.f32.gmra.mrb[66].mxu0 %vm1296_vm1, %v1676_v52  ;;  %4786 = vmatmul.mubr.msk.f32.gmra.mrb[50].mxu1 %vm1296_vm1, %v1260_v51 }
 0x3ce   : > { %1940 = vmatprep.mubr.f32.mxu0 %v8135_v35  ;;  %1535 = vmatprep.mubr.f32.mxu1 %v8135_v35 }
 0x3d0   : > { %v1261_v53 = vpop.trf.xlu1  ;;  %v1677_v54 = vpop.trf.xlu0 }
 0x3d1   : > { %4817 = vmatmul.mubr.msk.f32.gmra.mrb[68].mxu0 %vm1296_vm1, %v1677_v54  ;;  %4787 = vmatmul.mubr.msk.f32.gmra.mrb[52].mxu1 %vm1296_vm1, %v1261_v53 }
 0x3d2   : > { %1946 = vmatprep.mubr.f32.mxu0 %v8135_v35  ;;  %1541 = vmatprep.mubr.f32.mxu1 %v8135_v35 }
 0x3d4   : > { %v1262_v56 = vpop.trf.xlu1  ;;  %2516 = vxpose.xlu1.b32.start [1/2] (short) %v1104_v55, 128  ;;  %v1678_v57 = vpop.trf.xlu0 }
 0x3d5   : > { %4818 = vmatmul.mubr.msk.f32.gmra.mrb[70].mxu0 %vm1296_vm1, %v1678_v57  ;;  %4788 = vmatmul.mubr.msk.f32.gmra.mrb[54].mxu1 %vm1296_vm1, %v1262_v56 }
 0x3d6   : > { %1952 = vmatprep.mubr.f32.mxu0 %v8135_v35  ;;  %1547 = vmatprep.mubr.f32.mxu1 %v8135_v35 }
 0x3d8   : > { %2517 = vxpose.xlu1.b32.end [2/2] (short) %v1110_v58, 128  ;;  %v1679_v47 = vpop.trf.xlu0  ;;  %v1263_v60 = vpop.trf.xlu1 }
 0x3d9   : > { %4819 = vmatmul.mubr.msk.f32.gmra.mrb[72].mxu0 %vm1296_vm1, %v1679_v47  ;;  %4789 = vmatmul.mubr.msk.f32.gmra.mrb[56].mxu1 %vm1296_vm1, %v1263_v60 }
 0x3da   : > { %1958 = vmatprep.mubr.f32.mxu0 %v8135_v35  ;;  %1553 = vmatprep.mubr.f32.mxu1 %v8135_v35 }
 0x3dc   : > { %v1680_v32 = vpop.trf.xlu0  ;;  %2484 = vxpose.xlu0.b32.start [1/2] (short) %v1102_v3, 128  ;;  %v1698_v36 = vpop.trf.xlu1 }
 0x3dd   : > { %4820 = vmatmul.mubr.msk.f32.gmra.mrb[74].mxu0 %vm1296_vm1, %v1680_v32 }
 0x3de   : > { %1964 = vmatprep.mubr.f32.mxu0 %v8135_v35 }
 0x3e0   : > { %2485 = vxpose.xlu0.b32.end [2/2] (short) %v1108_v11, 128  ;;  %v1681_v13 = vpop.trf.xlu0  ;;  %v1699_v20 = vpop.trf.xlu1 }
 0x3e1   : > { %4821 = vmatmul.mubr.msk.f32.gmra.mrb[76].mxu0 %vm1296_vm1, %v1681_v13 }
 0x3e2   : > { %1970 = vmatprep.mubr.f32.mxu0 %v8135_v35 }
 0x3e4   : > { %v1280_v46 = vpop.trf.xlu0  ;;  %v1700_v59 = vpop.trf.xlu1 }
 0x3e5   : > { %4790 = vmatmul.mubr.msk.f32.gmra.mrb[58].mxu1 %vm1296_vm1, %v1280_v46  ;;  %4822 = vmatmul.mubr.msk.f32.gmra.mrb[78].mxu0 %vm1296_vm1, %v1698_v36 }
 0x3e6   : > { %1559 = vmatprep.mubr.f32.mxu1 %v8135_v35  ;;  %1976 = vmatprep.mubr.f32.mxu0 %v8135_v35 }
 0x3e8   : > { %v1281_v30 = vpop.trf.xlu0  ;;  %v1701_v25 = vpop.trf.xlu1 }
 0x3e9   : > { %4791 = vmatmul.mubr.msk.f32.gmra.mrb[60].mxu1 %vm1296_vm1, %v1281_v30  ;;  %4823 = vmatmul.mubr.msk.f32.gmra.mrb[80].mxu0 %vm1296_vm1, %v1699_v20 }
 0x3ea   : > { %1565 = vmatprep.mubr.f32.mxu1 %v8135_v35  ;;  %1982 = vmatprep.mubr.f32.mxu0 %v8135_v35 }
 0x3ec   : > { %v1282_v63 = vpop.trf.xlu0  ;;  %v1702_v18 = vpop.trf.xlu1 }
 0x3ed   : > { %4792 = vmatmul.mubr.msk.f32.gmra.mrb[62].mxu1 %vm1296_vm1, %v1282_v63  ;;  %4824 = vmatmul.mubr.msk.f32.gmra.mrb[82].mxu0 %vm1296_vm1, %v1700_v59 }
 0x3ee   : > { %1571 = vmatprep.mubr.f32.mxu1 %v8135_v35  ;;  %1988 = vmatprep.mubr.f32.mxu0 %v8135_v35 }
 0x3f0   : > { %v1283_v7 = vpop.trf.xlu0  ;;  %v1703_v4 = vpop.trf.xlu1 }
 0x3f1   : > { %4793 = vmatmul.mubr.msk.f32.gmra.mrb[64].mxu1 %vm1296_vm1, %v1283_v7  ;;  %4825 = vmatmul.mubr.msk.f32.gmra.mrb[84].mxu0 %vm1296_vm1, %v1701_v25 }
 0x3f2   : > { %1577 = vmatprep.mubr.f32.mxu1 %v8135_v35  ;;  %1994 = vmatprep.mubr.f32.mxu0 %v8135_v35 }
 0x3f4   : > { %v1284_v29 = vpop.trf.xlu0  ;;  %v1704_v0 = vpop.trf.xlu1 }
 0x3f5   : > { %4794 = vmatmul.mubr.msk.f32.gmra.mrb[66].mxu1 %vm1296_vm1, %v1284_v29  ;;  %4826 = vmatmul.mubr.msk.f32.gmra.mrb[86].mxu0 %vm1296_vm1, %v1702_v18 }
 0x3f6   : > { %1583 = vmatprep.mubr.f32.mxu1 %v8135_v35  ;;  %2000 = vmatprep.mubr.f32.mxu0 %v8135_v35 }
 0x3f8   : > { %v1285_v1 = vpop.trf.xlu0  ;;  %v1705_v15 = vpop.trf.xlu1 }
 0x3f9   : > { %4795 = vmatmul.mubr.msk.f32.gmra.mrb[68].mxu1 %vm1296_vm1, %v1285_v1  ;;  %4827 = vmatmul.mubr.msk.f32.gmra.mrb[88].mxu0 %vm1296_vm1, %v1703_v4 }
 0x3fa   : > { %1589 = vmatprep.mubr.f32.mxu1 %v8135_v35  ;;  %2006 = vmatprep.mubr.f32.mxu0 %v8135_v35 }
 0x3fc   : > { %v1286_v42 = vpop.trf.xlu0  ;;  %v1706_v45 = vpop.trf.xlu1 }
 0x3fd   : > { %4796 = vmatmul.mubr.msk.f32.gmra.mrb[70].mxu1 %vm1296_vm1, %v1286_v42  ;;  %4828 = vmatmul.mubr.msk.f32.gmra.mrb[90].mxu0 %vm1296_vm1, %v1704_v0  ;;  %v764_v42 = vld [vmem:[%s8131_s3 + $0x88] sm:$0xff] }
 0x3fe   : > { %1595 = vmatprep.mubr.f32.mxu1 %v8135_v35  ;;  %2012 = vmatprep.mubr.f32.mxu0 %v8135_v35 }
 0x400   : > { %v1287_v50 = vpop.trf.xlu0  ;;  %v1707_v37 = vpop.trf.xlu1 }
 0x401   : > { %4797 = vmatmul.mubr.msk.f32.gmra.mrb[72].mxu1 %vm1296_vm1, %v1287_v50  ;;  %4829 = vmatmul.mubr.msk.f32.gmra.mrb[92].mxu0 %vm1296_vm1, %v1705_v15 }
 0x402   : > { %1601 = vmatprep.mubr.f32.mxu1 %v8135_v35  ;;  %2018 = vmatprep.mubr.f32.mxu0 %v8135_v35 }
 0x404   : > { %v1288_v48 = vpop.trf.xlu0  ;;  %v1708_v38 = vpop.trf.xlu1 }
 0x405   : > { %4798 = vmatmul.mubr.msk.f32.gmra.mrb[74].mxu1 %vm1296_vm1, %v1288_v48  ;;  %4830 = vmatmul.mubr.msk.f32.gmra.mrb[94].mxu0 %vm1296_vm1, %v1706_v45 }
 0x406   : > { %1607 = vmatprep.mubr.f32.mxu1 %v8135_v35  ;;  %2024 = vmatprep.mubr.f32.mxu0 %v8135_v35 }
 0x408   : > { %v1289_v51 = vpop.trf.xlu0  ;;  %v1709_v52 = vpop.trf.xlu1 }
 0x409   : > { %4799 = vmatmul.mubr.msk.f32.gmra.mrb[76].mxu1 %vm1296_vm1, %v1289_v51  ;;  %4831 = vmatmul.mubr.msk.f32.gmra.mrb[96].mxu0 %vm1296_vm1, %v1707_v37  ;;  %v768_v37 = vld [vmem:[%s8131_s3 + $0xa8] sm:$0xff] }
 0x40a   : > { %1613 = vmatprep.mubr.f32.mxu1 %v8135_v35  ;;  %2030 = vmatprep.mubr.f32.mxu0 %v8135_v35 }
 0x40c   : > { %v1290_v53 = vpop.trf.xlu0  ;;  %v1710_v54 = vpop.trf.xlu1 }
 0x40d   : > { %4800 = vmatmul.mubr.msk.f32.gmra.mrb[78].mxu1 %vm1296_vm1, %v1290_v53  ;;  %4832 = vmatmul.mubr.msk.f32.gmra.mrb[98].mxu0 %vm1296_vm1, %v1708_v38 }
 0x40e   : > { %1619 = vmatprep.mubr.f32.mxu1 %v8135_v35  ;;  %2036 = vmatprep.mubr.f32.mxu0 %v8135_v35 }
 0x410   : > { %v1291_v55 = vpop.trf.xlu0  ;;  %v1711_v56 = vpop.trf.xlu1 }
 0x411   : > { %4801 = vmatmul.mubr.msk.f32.gmra.mrb[80].mxu1 %vm1296_vm1, %v1291_v55  ;;  %4833 = vmatmul.mubr.msk.f32.gmra.mrb[100].mxu0 %vm1296_vm1, %v1709_v52 }
 0x412   : > { %1625 = vmatprep.mubr.f32.mxu1 %v8135_v35  ;;  %2042 = vmatprep.mubr.f32.mxu0 %v8135_v35 }
 0x414   : > { %v1292_v57 = vpop.trf.xlu0  ;;  %v1712_v58 = vpop.trf.xlu1 }
 0x415   : > { %4802 = vmatmul.mubr.msk.f32.gmra.mrb[82].mxu1 %vm1296_vm1, %v1292_v57  ;;  %4834 = vmatmul.mubr.msk.f32.gmra.mrb[102].mxu0 %vm1296_vm1, %v1710_v54 }
 0x416   : > { %1631 = vmatprep.mubr.f32.mxu1 %v8135_v35  ;;  %2048 = vmatprep.mubr.f32.mxu0 %v8135_v35 }
 0x418   : > { %v1293_v47 = vpop.trf.xlu0  ;;  %v1713_v60 = vpop.trf.xlu1 }
 0x419   : > { %4803 = vmatmul.mubr.msk.f32.gmra.mrb[84].mxu1 %vm1296_vm1, %v1293_v47  ;;  %4835 = vmatmul.mubr.msk.f32.gmra.mrb[104].mxu0 %vm1296_vm1, %v1711_v56 }
 0x41a   : > { %1637 = vmatprep.mubr.f32.mxu1 %v8135_v35  ;;  %2054 = vmatprep.mubr.f32.mxu0 %v8135_v35 }
 0x41c   : > { %v1294_v3 = vpop.trf.xlu0  ;;  %v2083_v32 = vpop.trf.xlu1 }
 0x41d   : > { %4804 = vmatmul.mubr.msk.f32.gmra.mrb[86].mxu1 %vm1296_vm1, %v1294_v3  ;;  %4836 = vmatmul.mubr.msk.f32.gmra.mrb[106].mxu0 %vm1296_vm1, %v1712_v58 }
 0x41e   : > { %1643 = vmatprep.mubr.f32.mxu1 %v8135_v35  ;;  %2060 = vmatprep.mubr.f32.mxu0 %v8135_v35 }
 0x420   : > { %v1295_v36 = vpop.trf.xlu0  ;;  %v2084_v11 = vpop.trf.xlu1 }
 0x421   : > { %4805 = vmatmul.mubr.msk.f32.gmra.mrb[88].mxu1 %vm1296_vm1, %v1295_v36  ;;  %4837 = vmatmul.mubr.msk.f32.gmra.mrb[108].mxu0 %vm1296_vm1, %v1713_v60 }
 0x422   : > { %2291 = vmatprep.mubr.f32.mxu1 %v8135_v35  ;;  %2708 = vmatprep.mubr.f32.mxu0 %v8135_v35 }
 0x424   : > { %v6592_v13 = vpop.trf.xlu0  ;;  %v2085_v20 = vpop.trf.xlu1 }
 0x425   : > { %4838 = vmatmul.mubr.msk.f32.vlgmr.msra.gmra.mrb[90].mxu1 %vm1296_vm1, %v2083_v32 }
 0x426   : > { %2297 = vmatprep.mubr.f32.mxu1 %v8135_v35 }
 0x428   : > { %v6596_v46 = vpop.trf.xlu0  ;;  %v2086_v59 = vpop.trf.xlu1 }
 0x429   : > { %4839 = vmatmul.mubr.msk.f32.gmra.mrb[92].mxu1 %vm1296_vm1, %v2084_v11 }
 0x42a   : > { %2303 = vmatprep.mubr.f32.mxu1 %v8135_v35 }
 0x42c   : > { %v6600_v30 = vpop.trf.xlu0  ;;  %v2087_v25 = vpop.trf.xlu1 }
 0x42d   : > { %4840 = vmatmul.mubr.msk.f32.gmra.mrb[94].mxu1 %vm1296_vm1, %v2085_v20 }
 0x42e   : > { %2309 = vmatprep.mubr.f32.mxu1 %v8135_v35 }
 0x430   : > { %v6604_v63 = vpop.trf.xlu0  ;;  %v2088_v18 = vpop.trf.xlu1 }
 0x431   : > { %4841 = vmatmul.mubr.msk.f32.gmra.mrb[96].mxu1 %vm1296_vm1, %v2086_v59 }
 0x432   : > { %2315 = vmatprep.mubr.f32.mxu1 %v8135_v35 }
 0x434   : > { %v6608_v7 = vpop.trf.xlu0  ;;  %v2089_v4 = vpop.trf.xlu1 }
 0x435   : > { %4842 = vmatmul.mubr.msk.f32.gmra.mrb[98].mxu1 %vm1296_vm1, %v2087_v25 }
 0x436   : > { %2321 = vmatprep.mubr.f32.mxu1 %v8135_v35 }
 0x438   : > { %v6612_v29 = vpop.trf.xlu0  ;;  %v2090_v0 = vpop.trf.xlu1 }
 0x439   : > { %4843 = vmatmul.mubr.msk.f32.gmra.mrb[100].mxu1 %vm1296_vm1, %v2088_v18 }
 0x43a   : > { %2327 = vmatprep.mubr.f32.mxu1 %v8135_v35 }
 0x43c   : > { %v6616_v1 = vpop.trf.xlu0  ;;  %v2091_v15 = vpop.trf.xlu1 }
 0x43d   : > { %4844 = vmatmul.mubr.msk.f32.gmra.mrb[102].mxu1 %vm1296_vm1, %v2089_v4 }
 0x43e   : > { %2333 = vmatprep.mubr.f32.mxu1 %v8135_v35 }
 0x440   : > { %v6623_v45 = vpop.trf.xlu0  ;;  %v2092_v50 = vpop.trf.xlu1 }
 0x441   : > { %862 = vperm.xlu0 %5357, %v764_v42   ;;  %4845 = vmatmul.mubr.msk.f32.gmra.mrb[104].mxu1 %vm1296_vm1, %v2090_v0 }
 0x442   : > { %2339 = vmatprep.mubr.f32.mxu1 %v8135_v35 }
 0x444   : > { %v6630_v48 = vpop.trf.xlu0  ;;  %v2093_v38 = vpop.trf.xlu1 }
 0x445   : > { %882 = vperm.xlu0 %5357, %v768_v37   ;;  %4846 = vmatmul.mubr.msk.f32.gmra.mrb[106].mxu1 %vm1296_vm1, %v2091_v15 }
 0x446   : > { %2345 = vmatprep.mubr.f32.mxu1 %v8135_v35 }
 0x448   : > { %v6634_v51 = vpop.trf.xlu0  ;;  %v2094_v52 = vpop.trf.xlu1 }
 0x449   : > { %4847 = vmatmul.mubr.msk.f32.gmra.mrb[108].mxu1 %vm1296_vm1, %v2092_v50 }
 0x44a   : > { %2351 = vmatprep.mubr.f32.mxu1 %v8135_v35 }
 0x44c   : > { %v6638_v53 = vpop.trf.xlu0  ;;  %v2095_v54 = vpop.trf.xlu1 }
 0x44d   : > { %4848 = vmatmul.mubr.msk.f32.gmra.mrb[110].mxu1 %vm1296_vm1, %v2093_v38 }
 0x44e   : > { %2357 = vmatprep.mubr.f32.mxu1 %v8135_v35 }
 0x450   : > { %v6642_v55 = vpop.trf.xlu0  ;;  %v2096_v56 = vpop.trf.xlu1 }
 0x451   : > { %4849 = vmatmul.mubr.msk.f32.gmra.mrb[112].mxu1 %vm1296_vm1, %v2094_v52 }
 0x452   : > { %2363 = vmatprep.mubr.f32.mxu1 %v8135_v35 }
 0x454   : > { %v6646_v57 = vpop.trf.xlu0  ;;  %v2097_v47 = vpop.trf.xlu1 }
 0x455   : > { %4850 = vmatmul.mubr.msk.f32.gmra.mrb[114].mxu1 %vm1296_vm1, %v2095_v54 }
 0x456   : > { %2369 = vmatprep.mubr.f32.mxu1 %v8135_v35 }
 0x458   : > { %v6650_v58 = vpop.trf.xlu0  ;;  %v2098_v3 = vpop.trf.xlu1 }
 0x459   : > { %4851 = vmatmul.mubr.msk.f32.gmra.mrb[116].mxu1 %vm1296_vm1, %v2096_v56 }
 0x45a   : > { %2375 = vmatprep.mubr.f32.mxu1 %v8135_v35 }
 0x45c   : > { %v6654_v60 = vpop.trf.xlu0  ;;  %v6684_v25 = vpop.trf.xlu1 }
 0x45d   : > { %4852 = vmatmul.mubr.msk.f32.gmra.mrb[118].mxu1 %vm1296_vm1, %v2097_v47 }
 0x45e   : > { %2381 = vmatprep.mubr.f32.mxu1 %v8135_v35 }
 0x460   : > { %v6658_v32 = vpop.trf.xlu0  ;;  %v6701_v15 = vpop.trf.xlu1 }
 0x461   : > { %4853 = vmatmul.mubr.msk.f32.gmra.mrb[120].mxu1 %vm1296_vm1, %v2098_v3 }
 0x462   : > { %2387 = vmatprep.mubr.f32.mxu1 %v8135_v35 }
 0x464   : > { %v2500_v36 = vpop.trf.xlu0 }
 0x465   : > { %4854 = vmatmul.mubr.msk.f32.gmra.mrb[122].mxu1 %vm1296_vm1, %v6592_v13  ;;  %4870 = vmatmul.mubr.msk.f32.vlgmr.msra.gmra.mrb[110].mxu0 %vm1296_vm1, %v2500_v36 }
 0x466   : > { %2393 = vmatprep.mubr.f32.mxu1 %v8135_v35  ;;  %2714 = vmatprep.mubr.f32.mxu0 %v8135_v35 }
 0x468   : > { %v2501_v11 = vpop.trf.xlu0 }
 0x469   : > { %4855 = vmatmul.mubr.msk.f32.gmra.mrb[124].mxu1 %vm1296_vm1, %v6596_v46  ;;  %4871 = vmatmul.mubr.msk.f32.gmra.mrb[112].mxu0 %vm1296_vm1, %v2501_v11 }
 0x46a   : > { %2399 = vmatprep.mubr.f32.mxu1 %v8135_v35  ;;  %2720 = vmatprep.mubr.f32.mxu0 %v8135_v35 }
 0x46c   : > { %v2502_v20 = vpop.trf.xlu0 }
 0x46d   : > { %4856 = vmatmul.mubr.msk.f32.gmra.mrb[126].mxu1 %vm1296_vm1, %v6600_v30  ;;  %4872 = vmatmul.mubr.msk.f32.gmra.mrb[114].mxu0 %vm1296_vm1, %v2502_v20 }
 0x46e   : > { %2405 = vmatprep.mubr.f32.mxu1 %v8135_v35  ;;  %2726 = vmatprep.mubr.f32.mxu0 %v8135_v35 }
 0x470   : > { %v6677_v13 = vpop.f32.mrb[26].mxu1  ;;  %v2503_v59 = vpop.trf.xlu0 }
 0x471   : > { %v6679_v46 = vpop.f32.mrb[27].mxu1  ;;  %4857 = vmatmul.mubr.msk.f32.gmra.mrb[128].mxu1 %vm1296_vm1, %v6604_v63  ;;  %4873 = vmatmul.mubr.msk.f32.gmra.mrb[116].mxu0 %vm1296_vm1, %v2503_v59  ;;  %v6737_v59 = vpop.trf.xlu1 }
 0x472   : > { %v2901_v30 = vmax.f32 %v6677_v13, %v6679_v46  ;;  %2411 = vmatprep.mubr.f32.mxu1 %v8135_v35  ;;  %2732 = vmatprep.mubr.f32.mxu0 %v8135_v35 }
 0x474   : > { %v6690_v18 = vpop.f32.mrb[28].mxu1  ;;  %2902 = vmax.xlane.f32.xlu0 %v2901_v30  ;;  %v2504_v4 = vpop.trf.xlu0 }
 0x475   : > { %v6692_v0 = vpop.f32.mrb[29].mxu1  ;;  %4858 = vmatmul.mubr.msk.f32.gmra.mrb[130].mxu1 %vm1296_vm1, %v6608_v7  ;;  %4874 = vmatmul.mubr.msk.f32.gmra.mrb[118].mxu0 %vm1296_vm1, %v2504_v4  ;;  %v6773_v23 = vpop.trf.xlu1 }
 0x476   : > { %v2904_v63 = vmax.f32 %v6690_v18, %v6692_v0  ;;  %2417 = vmatprep.mubr.f32.mxu1 %v8135_v35  ;;  %2738 = vmatprep.mubr.f32.mxu0 %v8135_v35 }
 0x478   : > { %2905 = vmax.xlane.f32.xlu1 %v2904_v63  ;;  %v6703_v42 = vpop.f32.mrb[46].mxu0  ;;  %v2505_v50 = vpop.trf.xlu0 }
 0x479   : > { %v6705_v37 = vpop.f32.mrb[47].mxu0  ;;  %4859 = vmatmul.mubr.msk.f32.gmra.mrb[132].mxu1 %vm1296_vm1, %v6612_v29  ;;  %4875 = vmatmul.mubr.msk.f32.gmra.mrb[120].mxu0 %vm1296_vm1, %v2505_v50  ;;  %v6710_v7 = vpop.f32.mrb[30].mxu1 }
 0x47a   : > { %v2997_v38 = vmax.f32 %v6703_v42, %v6705_v37  ;;  %2423 = vmatprep.mubr.f32.mxu1 %v8135_v35  ;;  %2744 = vmatprep.mubr.f32.mxu0 %v8135_v35  ;;  %v6716_v52 = vpop.f32.mrb[31].mxu1  ;;  %v6809_v41 = vpop.trf.xlu1 }
 0x47b   : > { %v2907_v54 = vmax.f32 %v6710_v7, %v6716_v52 }
 0x47c   : > { %v6720_v56 = vpop.f32.mrb[48].mxu0  ;;  %2998 = vmax.xlane.f32.xlu0 %v2997_v38  ;;  %v2506_v29 = vpop.trf.xlu0 }
 0x47d   : > { %v6722_v47 = vpop.f32.mrb[49].mxu0  ;;  %4860 = vmatmul.mubr.msk.f32.gmra.mrb[134].mxu1 %vm1296_vm1, %v6616_v1  ;;  %4876 = vmatmul.mubr.msk.f32.gmra.mrb[122].mxu0 %vm1296_vm1, %v2506_v29  ;;  %v6727_v3 = vpop.f32.mrb[32].mxu1 }
 0x47e   : > { %v3000_v36 = vmax.f32 %v6720_v56, %v6722_v47  ;;  %2429 = vmatprep.mubr.f32.mxu1 %v8135_v35  ;;  %2750 = vmatprep.mubr.f32.mxu0 %v8135_v35  ;;  %v6733_v11 = vpop.f32.mrb[33].mxu1  ;;  %v6845_v34 = vpop.trf.xlu1 }
 0x47f   : > { %v2910_v20 = vmax.f32 %v6727_v3, %v6733_v11 }
 0x480   : > { %3001 = vmax.xlane.f32.xlu1 %v3000_v36  ;;  %v6739_v1 = vpop.f32.mrb[50].mxu0  ;;  %2908 = vmax.xlane.f32.xlu0 %v2907_v54  ;;  %v2507_v30 = vpop.trf.xlu0 }
 0x481   : > { %v6741_v4 = vpop.f32.mrb[51].mxu0  ;;  %4861 = vmatmul.mubr.msk.f32.gmra.mrb[136].mxu1 %vm1296_vm1, %v6623_v45  ;;  %4877 = vmatmul.mubr.msk.f32.gmra.mrb[124].mxu0 %vm1296_vm1, %v2507_v30  ;;  %v6746_v63 = vpop.f32.mrb[34].mxu1 }
 0x482   : > { %v3003_v50 = vmax.f32 %v6739_v1, %v6741_v4  ;;  %2435 = vmatprep.mubr.f32.mxu1 %v8135_v35  ;;  %2756 = vmatprep.mubr.f32.mxu0 %v8135_v35  ;;  %v6752_v38 = vpop.f32.mrb[35].mxu1  ;;  %v6881_v2 = vpop.trf.xlu1 }
 0x483   : > { %v2913_v54 = vmax.f32 %v6746_v63, %v6752_v38 }
 0x484   : > { %2911 = vmax.xlane.f32.xlu1 %v2910_v20  ;;  %v6756_v29 = vpop.f32.mrb[52].mxu0  ;;  %3004 = vmax.xlane.f32.xlu0 %v3003_v50  ;;  %v2508_v45 = vpop.trf.xlu0 }
 0x485   : > { %v6758_v36 = vpop.f32.mrb[53].mxu0  ;;  %4862 = vmatmul.mubr.msk.f32.gmra.mrb[138].mxu1 %vm1296_vm1, %v6630_v48  ;;  %4878 = vmatmul.mubr.msk.f32.gmra.mrb[126].mxu0 %vm1296_vm1, %v2508_v45  ;;  %v6763_v30 = vpop.f32.mrb[36].mxu1 }
 0x486   : > { %v3006_v35 = vmax.f32 %v6756_v29, %v6758_v36  ;;  %2441 = vmatprep.mubr.f32.mxu1 %v8341_v19  ;;  %2762 = vmatprep.mubr.f32.mxu0 %v8341_v19  ;;  %v6769_v20 = vpop.f32.mrb[37].mxu1 }
 0x487   : > { %v2916_v50 = vmax.f32 %v6763_v30, %v6769_v20 }
 0x488   : > { %3007 = vmax.xlane.f32.xlu1 %v3006_v35  ;;  %v6775_v48 = vpop.f32.mrb[54].mxu0  ;;  %2914 = vmax.xlane.f32.xlu0 %v2913_v54  ;;  %v2509_v45 = vpop.trf.xlu0 }
 0x489   : > { %v6777_v44 = vpop.f32.mrb[55].mxu0  ;;  %4863 = vmatmul.mubr.msk.f32.gmra.mrb[140].mxu1 %vm1296_vm1, %v6634_v51  ;;  %4879 = vmatmul.mubr.msk.f32.gmra.mrb[128].mxu0 %vm1296_vm1, %v2509_v45  ;;  %v6782_v39 = vpop.f32.mrb[38].mxu1 }
 0x48a   : > { %v3009_v10 = vmax.f32 %v6775_v48, %v6777_v44  ;;  %2447 = vmatprep.mubr.f32.mxu1 %v8341_v19  ;;  %2768 = vmatprep.mubr.f32.mxu0 %v8341_v19  ;;  %v6788_v35 = vpop.f32.mrb[39].mxu1 }
 0x48b   : > { %v2919_v54 = vmax.f32 %v6782_v39, %v6788_v35 }
 0x48c   : > { %2917 = vmax.xlane.f32.xlu1 %v2916_v50  ;;  %v6792_v17 = vpop.f32.mrb[56].mxu0  ;;  %3010 = vmax.xlane.f32.xlu0 %v3009_v10  ;;  %v2510_v51 = vpop.trf.xlu0 }
 0x48d   : > { %v6794_v45 = vpop.f32.mrb[57].mxu0  ;;  %4864 = vmatmul.mubr.msk.f32.gmra.mrb[142].mxu1 %vm1296_vm1, %v6638_v53  ;;  %4880 = vmatmul.mubr.msk.f32.gmra.mrb[130].mxu0 %vm1296_vm1, %v2510_v51  ;;  %v6799_v22 = vpop.f32.mrb[40].mxu1 }
 0x48e   : > { %v3012_v49 = vmax.f32 %v6792_v17, %v6794_v45  ;;  %2453 = vmatprep.mubr.f32.mxu1 %v8341_v19  ;;  %2774 = vmatprep.mubr.f32.mxu0 %v8341_v19  ;;  %v6805_v50 = vpop.f32.mrb[41].mxu1 }
 0x48f   : > { %v2922_v10 = vmax.f32 %v6799_v22, %v6805_v50 }
 0x490   : > { %3013 = vmax.xlane.f32.xlu1 %v3012_v49  ;;  %v6811_v53 = vpop.f32.mrb[58].mxu0  ;;  %2920 = vmax.xlane.f32.xlu0 %v2919_v54  ;;  %v2511_v51 = vpop.trf.xlu0 }
 0x491   : > { %v6813_v26 = vpop.f32.mrb[59].mxu0  ;;  %4865 = vmatmul.mubr.msk.f32.gmra.mrb[144].mxu1 %vm1296_vm1, %v6642_v55  ;;  %4881 = vmatmul.mubr.msk.f32.gmra.mrb[132].mxu0 %vm1296_vm1, %v2511_v51  ;;  %v6818_v27 = vpop.f32.mrb[42].mxu1 }
 0x492   : > { %v3015_v33 = vmax.f32 %v6811_v53, %v6813_v26  ;;  %2459 = vmatprep.mubr.f32.mxu1 %v8341_v19  ;;  %2780 = vmatprep.mubr.f32.mxu0 %v8341_v19  ;;  %v6824_v49 = vpop.f32.mrb[43].mxu1 }
 0x493   : > { %v2925_v54 = vmax.f32 %v6818_v27, %v6824_v49 }
 0x494   : > { %2923 = vmax.xlane.f32.xlu1 %v2922_v10  ;;  %v6828_v24 = vpop.f32.mrb[60].mxu0  ;;  %3016 = vmax.xlane.f32.xlu0 %v3015_v33  ;;  %v2512_v55 = vpop.trf.xlu0 }
 0x495   : > { %v6830_v51 = vpop.f32.mrb[61].mxu0  ;;  %4866 = vmatmul.mubr.msk.f32.gmra.mrb[146].mxu1 %vm1296_vm1, %v6646_v57  ;;  %4882 = vmatmul.mubr.msk.f32.gmra.mrb[134].mxu0 %vm1296_vm1, %v2512_v55  ;;  %v6835_v6 = vpop.f32.mrb[44].mxu1 }
 0x496   : > { %v3018_v14 = vmax.f32 %v6828_v24, %v6830_v51  ;;  %2465 = vmatprep.mubr.f32.mxu1 %v8341_v19  ;;  %2786 = vmatprep.mubr.f32.mxu0 %v8341_v19  ;;  %v6841_v10 = vpop.f32.mrb[45].mxu1 }
 0x497   : > { %v2928_v33 = vmax.f32 %v6835_v6, %v6841_v10 }
 0x498   : > { %3019 = vmax.xlane.f32.xlu1 %v3018_v14  ;;  %v6847_v57 = vpop.f32.mrb[62].mxu0  ;;  %2926 = vmax.xlane.f32.xlu0 %v2925_v54  ;;  %v2513_v55 = vpop.trf.xlu0 }
 0x499   : > { %v6849_v28 = vpop.f32.mrb[63].mxu0  ;;  %4867 = vmatmul.mubr.msk.f32.gmra.mrb[148].mxu1 %vm1296_vm1, %v6650_v58  ;;  %4883 = vmatmul.mubr.msk.f32.gmra.mrb[136].mxu0 %vm1296_vm1, %v2513_v55  ;;  %v6854_v31 = vpop.f32.mrb[46].mxu1 }
 0x49a   : > { %v3021_v43 = vmax.f32 %v6847_v57, %v6849_v28  ;;  %2471 = vmatprep.mubr.f32.mxu1 %v8341_v19  ;;  %2792 = vmatprep.mubr.f32.mxu0 %v8341_v19  ;;  %v6860_v14 = vpop.f32.mrb[47].mxu1 }
 0x49b   : > { %8342 = vst [vmem:[#allocation29_spill] sm:$0xff] %v6860_v14  ;;  %v2931_v54 = vmax.f32 %v6854_v31, %v6860_v14 }
 0x49c   : > { %2929 = vmax.xlane.f32.xlu1 %v2928_v33  ;;  %v6864_v9 = vpop.f32.mrb[64].mxu0  ;;  %3022 = vmax.xlane.f32.xlu0 %v3021_v43  ;;  %v2514_v58 = vpop.trf.xlu0 }
 0x49d   : > { %v6866_v55 = vpop.f32.mrb[65].mxu0  ;;  %4868 = vmatmul.mubr.msk.f32.gmra.mrb[150].mxu1 %vm1296_vm1, %v6654_v60  ;;  %4884 = vmatmul.mubr.msk.f32.gmra.mrb[138].mxu0 %vm1296_vm1, %v2514_v58  ;;  %v6871_v40 = vpop.f32.mrb[48].mxu1  ;;  %v1164_v60 = vadd.f32 %v6402_v62, %v6434_v16 }
 0x49e   : > { %v3024_v5 = vmax.f32 %v6864_v9, %v6866_v55  ;;  %2477 = vmatprep.mubr.f32.mxu1 %v8341_v19  ;;  %2798 = vmatprep.mubr.f32.mxu0 %v8341_v19  ;;  %v6877_v33 = vpop.f32.mrb[49].mxu1 }
 0x49f   : > { %8343 = vst [vmem:[#allocation30_spill] sm:$0xff] %v6877_v33  ;;  %v2934_v43 = vmax.f32 %v6871_v40, %v6877_v33 }
 0x4a0   : > { %3025 = vmax.xlane.f32.xlu1 %v3024_v5  ;;  %v6885_v58 = vpop.f32.mrb[66].mxu0  ;;  %2932 = vmax.xlane.f32.xlu0 %v2931_v54  ;;  %v2515_v8 = vpop.trf.xlu0 }
 0x4a1   : > { %v6887_v61 = vpop.f32.mrb[67].mxu0  ;;  %4869 = vmatmul.mubr.msk.f32.gmra.mrb[152].mxu1 %vm1296_vm1, %v6658_v32  ;;  %4885 = vmatmul.mubr.msk.f32.gmra.mrb[140].mxu0 %vm1296_vm1, %v2515_v8  ;;  %v6892_v14 = vpop.f32.mrb[50].mxu1 }
 0x4a2   : > { %8344 = vst [vmem:[#allocation31_spill] sm:$0xff] %v6887_v61  ;;  %8345 = vst [vmem:[#allocation32_spill] sm:$0xff] %v6892_v14  ;;  %v3027_v33 = vmax.f32 %v6885_v58, %v6887_v61  ;;  %4117 = vmatprep.mubr.f32.mxu1 %v1164_v60  ;;  %2804 = vmatprep.mubr.f32.mxu0 %v8341_v19  ;;  %v6897_v62 = vpop.f32.mrb[51].mxu1 }
 0x4a3   : > { %8346 = vst [vmem:[#allocation33_spill] sm:$0xff] %v6897_v62  ;;  %v2937_v5 = vmax.f32 %v6892_v14, %v6897_v62  ;;  %v2539_v62 = vpop.trf.xlu1 }
 0x4a4   : > { %2935 = vmax.xlane.f32.xlu1 %v2934_v43  ;;  %v6901_v54 = vpop.f32.mrb[68].mxu0  ;;  %3028 = vmax.xlane.f32.xlu0 %v3027_v33  ;;  %v6903_v32 = vpop.f32.mrb[52].mxu1 }
 0x4a5   : > { %8347 = vst [vmem:[#allocation34_spill] sm:$0xff] %v6903_v32  ;;  %v6905_v8 = vpop.f32.mrb[69].mxu0  ;;  %4886 = vmatmul.mubr.msk.f32.gmra.mrb[142].mxu0 %vm1296_vm1, %v6684_v25  ;;  %v6909_v16 = vpop.f32.mrb[53].mxu1 }
 0x4a6   : > { %8348 = vst [vmem:[#allocation35_spill] sm:$0xff] %v6905_v8  ;;  %8349 = vst [vmem:[#allocation36_spill] sm:$0xff] %v6909_v16  ;;  %v3030_v60 = vmax.f32 %v6901_v54, %v6905_v8  ;;  %2810 = vmatprep.mubr.f32.mxu0 %v8341_v19  ;;  %v2940_v43 = vmax.f32 %v6903_v32, %v6909_v16 }
 0x4a8   : > { %3031 = vmax.xlane.f32.xlu1 %v3030_v60  ;;  %v6916_v33 = vpop.f32.mrb[70].mxu0  ;;  %2938 = vmax.xlane.f32.xlu0 %v2937_v5  ;;  %v6918_v14 = vpop.f32.mrb[54].mxu1 }
 0x4a9   : > { %8350 = vst [vmem:[#allocation37_spill] sm:$0xff] %v6918_v14  ;;  %v6920_v61 = vpop.f32.mrb[71].mxu0  ;;  %4887 = vmatmul.mubr.msk.f32.gmra.mrb[144].mxu0 %vm1296_vm1, %v6701_v15  ;;  %v6924_v25 = vpop.f32.mrb[55].mxu1 }
 0x4aa   : > { %8351 = vst [vmem:[#allocation38_spill] sm:$0xff] %v6920_v61  ;;  %8352 = vst [vmem:[#allocation39_spill] sm:$0xff] %v6924_v25  ;;  %v3033_v8 = vmax.f32 %v6916_v33, %v6920_v61  ;;  %2816 = vmatprep.mubr.f32.mxu0 %v8341_v19  ;;  %v2943_v60 = vmax.f32 %v6918_v14, %v6924_v25  ;;  %v2540_v25 = vpop.trf.xlu1 }
 0x4ac   : > { %2941 = vmax.xlane.f32.xlu1 %v2940_v43  ;;  %v6931_v16 = vpop.f32.mrb[72].mxu0  ;;  %3034 = vmax.xlane.f32.xlu0 %v3033_v8  ;;  %v6933_v5 = vpop.f32.mrb[56].mxu1 }
 0x4ad   : > { %8353 = vst [vmem:[#allocation40_spill] sm:$0xff] %v6931_v16  ;;  %8354 = vst [vmem:[#allocation41_spill] sm:$0xff] %v6933_v5  ;;  %v6935_v32 = vpop.f32.mrb[73].mxu0  ;;  %4888 = vmatmul.mubr.msk.f32.gmra.mrb[146].mxu0 %vm1296_vm1, %v6737_v59  ;;  %v6939_v15 = vpop.f32.mrb[57].mxu1 }
 0x4ae   : > { %8355 = vst [vmem:[#allocation42_spill] sm:$0xff] %v6935_v32  ;;  %8356 = vst [vmem:[#allocation43_spill] sm:$0xff] %v6939_v15  ;;  %v3036_v61 = vmax.f32 %v6931_v16, %v6935_v32  ;;  %2822 = vmatprep.mubr.f32.mxu0 %v8341_v19  ;;  %v2946_v43 = vmax.f32 %v6933_v5, %v6939_v15  ;;  %v2541_v15 = vpop.trf.xlu1 }
 0x4b0   : > { %3037 = vmax.xlane.f32.xlu1 %v3036_v61  ;;  %v6946_v8 = vpop.f32.mrb[74].mxu0  ;;  %2944 = vmax.xlane.f32.xlu0 %v2943_v60 }
 0x4b1   : > { %8357 = vst [vmem:[#allocation44_spill] sm:$0xff] %v6946_v8  ;;  %v6948_v14 = vpop.f32.mrb[75].mxu0  ;;  %4889 = vmatmul.mubr.msk.f32.gmra.mrb[148].mxu0 %vm1296_vm1, %v6773_v23 }
 0x4b2   : > { %8358 = vst [vmem:[#allocation45_spill] sm:$0xff] %v6948_v14  ;;  %v3039_v59 = vmax.f32 %v6946_v8, %v6948_v14  ;;  %2828 = vmatprep.mubr.f32.mxu0 %v8341_v19 }
 0x4b4   : > { %2947 = vmax.xlane.f32.xlu1 %v2946_v43  ;;  %v6955_v32 = vpop.f32.mrb[76].mxu0  ;;  %3040 = vmax.xlane.f32.xlu0 %v3039_v59 }
 0x4b5   : > { %8359 = vst [vmem:[#allocation46_spill] sm:$0xff] %v6955_v32  ;;  %v6957_v5 = vpop.f32.mrb[77].mxu0  ;;  %4890 = vmatmul.mubr.msk.f32.gmra.mrb[150].mxu0 %vm1296_vm1, %v6809_v41 }
 0x4b6   : > { %8360 = vst [vmem:[#allocation47_spill] sm:$0xff] %v6957_v5  ;;  %v3042_v61 = vmax.f32 %v6955_v32, %v6957_v5  ;;  %2834 = vmatprep.mubr.f32.mxu0 %v8341_v19 }
 0x4b8   : > { %3043 = vmax.xlane.f32.xlu1 %v3042_v61  ;;  %v6964_v23 = vpop.f32.mrb[58].mxu1  ;;  %v6966_v60 = vpop.f32.mrb[78].mxu0 }
 0x4b9   : > { %8361 = vst [vmem:[#allocation48_spill] sm:$0xff] %v6964_v23  ;;  %8362 = vst [vmem:[#allocation49_spill] sm:$0xff] %v6966_v60  ;;  %v6968_v43 = vpop.f32.mrb[59].mxu1  ;;  %4891 = vmatmul.mubr.msk.f32.gmra.mrb[152].mxu0 %vm1296_vm1, %v6845_v34  ;;  %v6972_v59 = vpop.f32.mrb[79].mxu0 }
 0x4ba   : > { %8363 = vst [vmem:[#allocation50_spill] sm:$0xff] %v6968_v43  ;;  %8364 = vst [vmem:[#allocation51_spill] sm:$0xff] %v6972_v59  ;;  %v2949_v41 = vmax.f32 %v6964_v23, %v6968_v43  ;;  %2840 = vmatprep.mubr.f32.mxu0 %v8341_v19  ;;  %v3045_v5 = vmax.f32 %v6966_v60, %v6972_v59  ;;  %v2542_v61 = vpop.trf.xlu1 }
 0x4bc   : > { %v6979_v32 = vpop.f32.mrb[60].mxu1  ;;  %2950 = vmax.xlane.f32.xlu0 %v2949_v41  ;;  %v6981_v14 = vpop.f32.mrb[80].mxu0 }
 0x4bd   : > { %8365 = vst [vmem:[#allocation52_spill] sm:$0xff] %v6981_v14  ;;  %v6983_v8 = vpop.f32.mrb[61].mxu1  ;;  %4892 = vmatmul.mubr.msk.f32.gmra.mrb[154].mxu0 %vm1296_vm1, %v6881_v2  ;;  %v6987_v34 = vpop.f32.mrb[81].mxu0 }
 0x4be   : > { %8366 = vst [vmem:[#allocation53_spill] sm:$0xff] %v6983_v8  ;;  %8367 = vst [vmem:[#allocation54_spill] sm:$0xff] %v6987_v34  ;;  %v2952_v43 = vmax.f32 %v6979_v32, %v6983_v8  ;;  %2846 = vmatprep.mubr.f32.mxu0 %v8341_v19  ;;  %v3048_v59 = vmax.f32 %v6981_v14, %v6987_v34  ;;  %v2543_v41 = vpop.trf.xlu1 }
 0x4c0   : > { %2953 = vmax.xlane.f32.xlu1 %v2952_v43  ;;  %v6994_v60 = vpop.f32.mrb[62].mxu1  ;;  %3046 = vmax.xlane.f32.xlu0 %v3045_v5  ;;  %v6999_v2 = vpop.f32.mrb[82].mxu0 }
 0x4c1   : > { %8368 = vst [vmem:[#allocation55_spill] sm:$0xff] %v6994_v60  ;;  %v6996_v23 = vpop.f32.mrb[63].mxu1  ;;  %4893 = vmatmul.mubr.msk.f32.gmra.mrb[156].mxu0 %vm1296_vm1, %v2539_v62  ;;  %8370 = vst [vmem:[#allocation57_spill] sm:$0xff] %v6999_v2  ;;  %v7004_v8 = vpop.f32.mrb[83].mxu0 }
 0x4c2   : > { %8369 = vst [vmem:[#allocation56_spill] sm:$0xff] %v6996_v23  ;;  %v2955_v16 = vmax.f32 %v6994_v60, %v6996_v23  ;;  %2852 = vmatprep.mubr.f32.mxu0 %v8341_v19  ;;  %8371 = vst [vmem:[#allocation58_spill] sm:$0xff] %v7004_v8  ;;  %v3051_v43 = vmax.f32 %v6999_v2, %v7004_v8 }
 0x4c4   : > { %3049 = vmax.xlane.f32.xlu1 %v3048_v59  ;;  %v7008_v34 = vpop.f32.mrb[64].mxu1  ;;  %2956 = vmax.xlane.f32.xlu0 %v2955_v16  ;;  %v7013_v62 = vpop.f32.mrb[84].mxu0 }
 0x4c5   : > { %v7010_v5 = vpop.f32.mrb[65].mxu1  ;;  %4894 = vmatmul.mubr.msk.f32.gmra.mrb[158].mxu0 %vm1296_vm1, %v2540_v25  ;;  %8373 = vst [vmem:[#allocation60_spill] sm:$0xff] %v7013_v62  ;;  %v7018_v60 = vpop.f32.mrb[85].mxu0 }
 0x4c6   : > { %8372 = vst [vmem:[#allocation59_spill] sm:$0xff] %v7010_v5  ;;  %v2958_v23 = vmax.f32 %v7008_v34, %v7010_v5  ;;  %2858 = vmatprep.mubr.f32.mxu0 %v8341_v19  ;;  %8374 = vst [vmem:[#allocation61_spill] sm:$0xff] %v7018_v60  ;;  %v3054_v8 = vmax.f32 %v7013_v62, %v7018_v60  ;;  %v2544_v59 = vpop.trf.xlu1 }
 0x4c8   : > { %2959 = vmax.xlane.f32.xlu1 %v2958_v23  ;;  %v7022_v2 = vpop.f32.mrb[66].mxu1  ;;  %3052 = vmax.xlane.f32.xlu0 %v3051_v43  ;;  %v7024_v16 = vpop.f32.mrb[86].mxu0 }
 0x4c9   : > { %8375 = vst [vmem:[#allocation62_spill] sm:$0xff] %v7022_v2  ;;  %8376 = vst [vmem:[#allocation63_spill] sm:$0xff] %v7024_v16  ;;  %v7026_v25 = vpop.f32.mrb[67].mxu1  ;;  %4895 = vmatmul.mubr.msk.f32.gmra.mrb[160].mxu0 %vm1296_vm1, %v2541_v15  ;;  %v7029_v14 = vpop.f32.mrb[87].mxu0 }
 0x4ca   : > { %8377 = vst [vmem:[#allocation64_spill] sm:$0xff] %v7026_v25  ;;  %8378 = vst [vmem:[#allocation65_spill] sm:$0xff] %v7029_v14  ;;  %v2961_v5 = vmax.f32 %v7022_v2, %v7026_v25  ;;  %2864 = vmatprep.mubr.f32.mxu0 %v8341_v19  ;;  %v3057_v60 = vmax.f32 %v7024_v16, %v7029_v14 }
 0x4cc   : > { %3055 = vmax.xlane.f32.xlu1 %v3054_v8  ;;  %v7036_v23 = vpop.f32.mrb[68].mxu1  ;;  %2962 = vmax.xlane.f32.xlu0 %v2961_v5  ;;  %v7038_v43 = vpop.f32.mrb[88].mxu0 }
 0x4cd   : > { %8379 = vst [vmem:[#allocation66_spill] sm:$0xff] %v7036_v23  ;;  %8380 = vst [vmem:[#allocation67_spill] sm:$0xff] %v7038_v43  ;;  %v7040_v62 = vpop.f32.mrb[69].mxu1  ;;  %4896 = vmatmul.mubr.msk.f32.gmra.mrb[162].mxu0 %vm1296_vm1, %v2542_v61  ;;  %v7043_v15 = vpop.f32.mrb[89].mxu0 }
 0x4ce   : > { %8381 = vst [vmem:[#allocation68_spill] sm:$0xff] %v7040_v62  ;;  %8382 = vst [vmem:[#allocation69_spill] sm:$0xff] %v7043_v15  ;;  %v2964_v25 = vmax.f32 %v7036_v23, %v7040_v62  ;;  %2870 = vmatprep.mubr.f32.mxu0 %v8341_v19  ;;  %v3060_v14 = vmax.f32 %v7038_v43, %v7043_v15  ;;  %v2545_v8 = vpop.trf.xlu1 }
 0x4d0   : > { %2965 = vmax.xlane.f32.xlu1 %v2964_v25  ;;  %v7050_v16 = vpop.f32.mrb[70].mxu1  ;;  %3058 = vmax.xlane.f32.xlu0 %v3057_v60  ;;  %v7052_v5 = vpop.f32.mrb[90].mxu0 }
 0x4d1   : > { %8383 = vst [vmem:[#allocation70_spill] sm:$0xff] %v7050_v16  ;;  %8384 = vst [vmem:[#allocation71_spill] sm:$0xff] %v7052_v5  ;;  %v7054_v2 = vpop.f32.mrb[71].mxu1  ;;  %4897 = vmatmul.mubr.msk.f32.gmra.mrb[164].mxu0 %vm1296_vm1, %v2543_v41  ;;  %v7057_v61 = vpop.f32.mrb[91].mxu0 }
 0x4d2   : > { %8385 = vst [vmem:[#allocation72_spill] sm:$0xff] %v7054_v2  ;;  %8386 = vst [vmem:[#allocation73_spill] sm:$0xff] %v7057_v61  ;;  %v2967_v62 = vmax.f32 %v7050_v16, %v7054_v2  ;;  %2876 = vmatprep.mubr.f32.mxu0 %v8341_v19  ;;  %v3063_v15 = vmax.f32 %v7052_v5, %v7057_v61 }
 0x4d4   : > { %3061 = vmax.xlane.f32.xlu1 %v3060_v14  ;;  %v7064_v25 = vpop.f32.mrb[72].mxu1  ;;  %2968 = vmax.xlane.f32.xlu0 %v2967_v62  ;;  %v7066_v60 = vpop.f32.mrb[92].mxu0 }
 0x4d5   : > { %8387 = vst [vmem:[#allocation74_spill] sm:$0xff] %v7064_v25  ;;  %8388 = vst [vmem:[#allocation75_spill] sm:$0xff] %v7066_v60  ;;  %v7068_v43 = vpop.f32.mrb[73].mxu1  ;;  %4898 = vmatmul.mubr.msk.f32.gmra.mrb[166].mxu0 %vm1296_vm1, %v2544_v59  ;;  %v7071_v41 = vpop.f32.mrb[93].mxu0 }
 0x4d6   : > { %8389 = vst [vmem:[#allocation76_spill] sm:$0xff] %v7068_v43  ;;  %8390 = vst [vmem:[#allocation77_spill] sm:$0xff] %v7071_v41  ;;  %v2970_v2 = vmax.f32 %v7064_v25, %v7068_v43  ;;  %2882 = vmatprep.mubr.f32.mxu0 %v8341_v19  ;;  %v3066_v61 = vmax.f32 %v7066_v60, %v7071_v41  ;;  %v2546_v14 = vpop.trf.xlu1 }
 0x4d8   : > { %2971 = vmax.xlane.f32.xlu1 %v2970_v2  ;;  %v7078_v5 = vpop.f32.mrb[74].mxu1  ;;  %3064 = vmax.xlane.f32.xlu0 %v3063_v15  ;;  %v7080_v62 = vpop.f32.mrb[94].mxu0 }
 0x4d9   : > { %8391 = vst [vmem:[#allocation78_spill] sm:$0xff] %v7078_v5  ;;  %8392 = vst [vmem:[#allocation79_spill] sm:$0xff] %v7080_v62  ;;  %v7082_v16 = vpop.f32.mrb[75].mxu1  ;;  %4899 = vmatmul.mubr.msk.f32.gmra.mrb[168].mxu0 %vm1296_vm1, %v2545_v8  ;;  %v7085_v59 = vpop.f32.mrb[95].mxu0 }
 0x4da   : > { %8393 = vst [vmem:[#allocation80_spill] sm:$0xff] %v7082_v16  ;;  %8394 = vst [vmem:[#allocation81_spill] sm:$0xff] %v7085_v59  ;;  %v2973_v43 = vmax.f32 %v7078_v5, %v7082_v16  ;;  %2888 = vmatprep.mubr.f32.mxu0 %v8341_v19  ;;  %v3069_v41 = vmax.f32 %v7080_v62, %v7085_v59  ;;  %v2547_v5 = vpop.trf.xlu1 }
 0x4dc   : > { %3067 = vmax.xlane.f32.xlu1 %v3066_v61  ;;  %v7092_v2 = vpop.f32.mrb[76].mxu1  ;;  %2974 = vmax.xlane.f32.xlu0 %v2973_v43  ;;  %v7094_v15 = vpop.f32.mrb[96].mxu0  ;;  %v1182_v43 = vadd.f32 %v6345_v21, %v6418_v12 }
 0x4dd   : > { %8395 = vst [vmem:[#allocation82_spill] sm:$0xff] %v7092_v2  ;;  %8396 = vst [vmem:[#allocation83_spill] sm:$0xff] %v7094_v15  ;;  %v7096_v60 = vpop.f32.mrb[77].mxu1  ;;  %4900 = vmatmul.mubr.msk.f32.gmra.mrb[170].mxu0 %vm1296_vm1, %v2546_v14  ;;  %v7099_v8 = vpop.f32.mrb[97].mxu0 }
 0x4de   : > { %8397 = vst [vmem:[#allocation84_spill] sm:$0xff] %v7096_v60  ;;  %8398 = vst [vmem:[#allocation85_spill] sm:$0xff] %v7099_v8  ;;  %v2976_v16 = vmax.f32 %v7092_v2, %v7096_v60  ;;  %2894 = vmatprep.mubr.f32.mxu0 %v8341_v19  ;;  %v3072_v61 = vmax.f32 %v7094_v15, %v7099_v8 }
 0x4e0   : > { %2977 = vmax.xlane.f32.xlu1 %v2976_v16  ;;  %v7108_v59 = vpop.f32.mrb[78].mxu1  ;;  %3070 = vmax.xlane.f32.xlu0 %v3069_v41  ;;  %v7110_v62 = vpop.f32.mrb[98].mxu0 }
 0x4e1   : > { %8399 = vst [vmem:[#allocation86_spill] sm:$0xff] %v7108_v59  ;;  %8400 = vst [vmem:[#allocation87_spill] sm:$0xff] %v7110_v62  ;;  %v7112_v14 = vpop.f32.mrb[79].mxu1  ;;  %4901 = vmatmul.mubr.msk.f32.gmra.mrb[172].mxu0 %vm1296_vm1, %v2547_v5  ;;  %v7115_v60 = vpop.f32.mrb[99].mxu0 }
 0x4e2   : > { %8401 = vst [vmem:[#allocation88_spill] sm:$0xff] %v7112_v14  ;;  %8402 = vst [vmem:[#allocation89_spill] sm:$0xff] %v7115_v60  ;;  %v2979_v19 = vmax.f32 %v7108_v59, %v7112_v14  ;;  %4200 = vmatprep.mubr.f32.mxu0 %v1182_v43  ;;  %v3075_v8 = vmax.f32 %v7110_v62, %v7115_v60 }
 0x4e4   : > { %3073 = vmax.xlane.f32.xlu1 %v3072_v61  ;;  %v7121_v21 = vpop.f32.mrb[80].mxu1  ;;  %2980 = vmax.xlane.f32.xlu0 %v2979_v19  ;;  %v7123_v16 = vpop.f32.mrb[100].mxu0 }
 0x4e5   : > { %8403 = vst [vmem:[#allocation90_spill] sm:$0xff] %v7121_v21  ;;  %8404 = vst [vmem:[#allocation91_spill] sm:$0xff] %v7123_v16  ;;  %v7125_v41 = vpop.f32.mrb[81].mxu1  ;;  %v7127_v12 = vpop.f32.mrb[101].mxu0 }
 0x4e6   : > { %8405 = vst [vmem:[#allocation92_spill] sm:$0xff] %v7125_v41  ;;  %8406 = vst [vmem:[#allocation93_spill] sm:$0xff] %v7127_v12  ;;  %v2982_v5 = vmax.f32 %v7121_v21, %v7125_v41  ;;  %v3078_v14 = vmax.f32 %v7123_v16, %v7127_v12 }
 0x4e8   : > { %2983 = vmax.xlane.f32.xlu1 %v2982_v5  ;;  %v7133_v43 = vpop.f32.mrb[82].mxu1  ;;  %3076 = vmax.xlane.f32.xlu0 %v3075_v8  ;;  %v7135_v61 = vpop.f32.mrb[102].mxu0 }
 0x4e9   : > { %8407 = vst [vmem:[#allocation94_spill] sm:$0xff] %v7133_v43  ;;  %8408 = vst [vmem:[#allocation95_spill] sm:$0xff] %v7135_v61  ;;  %v7137_v60 = vpop.f32.mrb[83].mxu1  ;;  %v7139_v19 = vpop.f32.mrb[103].mxu0 }
 0x4ea   : > { %8409 = vst [vmem:[#allocation96_spill] sm:$0xff] %v7137_v60  ;;  %8410 = vst [vmem:[#allocation97_spill] sm:$0xff] %v7139_v19  ;;  %v2985_v62 = vmax.f32 %v7133_v43, %v7137_v60  ;;  %v3081_v59 = vmax.f32 %v7135_v61, %v7139_v19 }
 0x4ec   : > { %3079 = vmax.xlane.f32.xlu1 %v3078_v14  ;;  %v7145_v41 = vpop.f32.mrb[84].mxu1  ;;  %2986 = vmax.xlane.f32.xlu0 %v2985_v62  ;;  %v7147_v5 = vpop.f32.mrb[104].mxu0 }
 0x4ed   : > { %8411 = vst [vmem:[#allocation98_spill] sm:$0xff] %v7145_v41  ;;  %8412 = vst [vmem:[#allocation99_spill] sm:$0xff] %v7147_v5  ;;  %v7149_v12 = vpop.f32.mrb[85].mxu1  ;;  %v7151_v8 = vpop.f32.mrb[105].mxu0 }
 0x4ee   : > { %8413 = vst [vmem:[#allocation100_spill] sm:$0xff] %v7149_v12  ;;  %8414 = vst [vmem:[#allocation101_spill] sm:$0xff] %v7151_v8  ;;  %v2988_v16 = vmax.f32 %v7145_v41, %v7149_v12  ;;  %v3084_v21 = vmax.f32 %v7147_v5, %v7151_v8 }
 0x4f0   : > { %2989 = vmax.xlane.f32.xlu1 %v2988_v16  ;;  %v7157_v60 = vpop.f32.mrb[86].mxu1  ;;  %3082 = vmax.xlane.f32.xlu0 %v3081_v59  ;;  %v7159_v14 = vpop.f32.mrb[106].mxu0 }
 0x4f1   : > { %8415 = vst [vmem:[#allocation102_spill] sm:$0xff] %v7157_v60  ;;  %8416 = vst [vmem:[#allocation103_spill] sm:$0xff] %v7159_v14  ;;  %v7161_v19 = vpop.f32.mrb[87].mxu1  ;;  %v7163_v62 = vpop.f32.mrb[107].mxu0 }
 0x4f2   : > { %8417 = vst [vmem:[#allocation104_spill] sm:$0xff] %v7161_v19  ;;  %8418 = vst [vmem:[#allocation105_spill] sm:$0xff] %v7163_v62  ;;  %v2991_v61 = vmax.f32 %v7157_v60, %v7161_v19  ;;  %v3087_v43 = vmax.f32 %v7159_v14, %v7163_v62  ;;  %v7181_v19 = vpop.permute.xlu0 %862 }
 0x4f3   : > { %8423 = vst [vmem:[#allocation110_spill] sm:$0xff] %v7181_v19 }
 0x4f4   : > { %3085 = vmax.xlane.f32.xlu1 %v3084_v21  ;;  %v7169_v12 = vpop.f32.mrb[88].mxu1  ;;  %2992 = vmax.xlane.f32.xlu0 %v2991_v61  ;;  %v7171_v16 = vpop.f32.mrb[108].mxu0 }
 0x4f5   : > { %8419 = vst [vmem:[#allocation106_spill] sm:$0xff] %v7169_v12  ;;  %8420 = vst [vmem:[#allocation107_spill] sm:$0xff] %v7171_v16  ;;  %v7173_v8 = vpop.f32.mrb[89].mxu1  ;;  %v7175_v59 = vpop.f32.mrb[109].mxu0 }
 0x4f6   : > { %8421 = vst [vmem:[#allocation108_spill] sm:$0xff] %v7173_v8  ;;  %8422 = vst [vmem:[#allocation109_spill] sm:$0xff] %v7175_v59  ;;  %v2994_v5 = vmax.f32 %v7169_v12, %v7173_v8  ;;  %v3090_v41 = vmax.f32 %v7171_v16, %v7175_v59  ;;  %v7191_v60 = vpop.permute.xlu0 %882 }
 0x4f7   : > { %8427 = vst [vmem:[#allocation114_spill] sm:$0xff] %v7191_v60 }
 0x4f8   : > { %2995 = vmax.xlane.f32.xlu1 %v2994_v5  ;;  %v7183_v62 = vpop.f32.mrb[90].mxu1  ;;  %3088 = vmax.xlane.f32.xlu0 %v3087_v43 }
 0x4f9   : > { %8424 = vst [vmem:[#allocation111_spill] sm:$0xff] %v7183_v62  ;;  %v7185_v21 = vpop.f32.mrb[91].mxu1 }
 0x4fa   : > { %8425 = vst [vmem:[#allocation112_spill] sm:$0xff] %v7185_v21  ;;  %v3093_v61 = vmax.f32 %v7183_v62, %v7185_v21 }
 0x4fc   : > { %3091 = vmax.xlane.f32.xlu1 %v3090_v41  ;;  %v7189_v14 = vpop.f32.mrb[92].mxu1  ;;  %3094 = vmax.xlane.f32.xlu0 %v3093_v61 }
 0x4fd   : > { %8426 = vst [vmem:[#allocation113_spill] sm:$0xff] %v7189_v14  ;;  %v7193_v8 = vpop.f32.mrb[93].mxu1 }
 0x4fe   : > { %8428 = vst [vmem:[#allocation115_spill] sm:$0xff] %v7193_v8  ;;  %v3096_v19 = vmax.f32 %v7189_v14, %v7193_v8 }
 0x500   : > { %3097 = vmax.xlane.f32.xlu1 %v3096_v19  ;;  %v7197_v5 = vpop.f32.mrb[94].mxu1 }
 0x501   : > { %8429 = vst [vmem:[#allocation116_spill] sm:$0xff] %v7197_v5  ;;  %v2903_v43 = vpop.xlane.xlu0 %2902  ;;  %v7199_v59 = vpop.f32.mrb[95].mxu1 }
 0x502   : > { %8430 = vst [vmem:[#allocation117_spill] sm:$0xff] %v7199_v59  ;;  %v3285_v16 = vsub.f32 %v6677_v13, %v2903_v43  ;;  %v3286_v61 = vsub.f32 %v6679_v46, %v2903_v43 }
 0x504   : > { %v7205_v21 = vpop.f32.mrb[96].mxu1  ;;  %v3541_v60 = vmul.f32 1.442695, %v3285_v16  ;;  %v3543_v15 = vmul.f32 1.442695, %v3286_v61 }
 0x505   : > { %8431 = vst [vmem:[#allocation118_spill] sm:$0xff] %v7205_v21  ;;  %v2906_v62 = vpop.xlane.xlu1 %2905  ;;  %v7207_v12 = vpop.f32.mrb[97].mxu1 }
 0x506   : > { %8432 = vst [vmem:[#allocation119_spill] sm:$0xff] %v7207_v12  ;;  %v3287_v19 = vsub.f32 %v6690_v18, %v2906_v62  ;;  %v3288_v8 = vsub.f32 %v6692_v0, %v2906_v62  ;;  %5374 = vpow2.f32 %v3541_v60 }
 0x508   : > { %v3545_v13 = vmul.f32 1.442695, %v3287_v19  ;;  %v3547_v2 = vmul.f32 1.442695, %v3288_v8  ;;  %v7213_v25 = vpop.f32.mrb[98].mxu1 }
 0x509   : > { %8433 = vst [vmem:[#allocation120_spill] sm:$0xff] %v7213_v25  ;;  %v2999_v46 = vpop.xlane.xlu0 %2998  ;;  %v7215_v43 = vpop.f32.mrb[99].mxu1 }
 0x50a   : > { %8434 = vst [vmem:[#allocation121_spill] sm:$0xff] %v7215_v43  ;;  %5376 = vpow2.f32 %v3545_v13  ;;  %v3349_v16 = vsub.f32 %v6703_v42, %v2999_v46  ;;  %v3350_v41 = vsub.f32 %v6705_v37, %v2999_v46 }
 0x50b   : > { %5378 = vpow2.f32 %v3547_v2 }
 0x50c   : > { %5380 = vpow2.f32 %v3543_v15  ;;  %v3669_v0 = vmul.f32 1.442695, %v3349_v16  ;;  %v7221_v62 = vpop.f32.mrb[100].mxu1  ;;  %v3671_v8 = vmul.f32 1.442695, %v3350_v41 }
 0x50d   : > { %8435 = vst [vmem:[#allocation122_spill] sm:$0xff] %v7221_v62  ;;  %v3002_v61 = vpop.xlane.xlu1 %3001  ;;  %v2909_v19 = vpop.xlane.xlu0 %2908 }
 0x50e   : > { %v3351_v60 = vsub.f32 %v6720_v56, %v3002_v61  ;;  %v3352_v14 = vsub.f32 %v6722_v47, %v3002_v61  ;;  %v3289_v13 = vsub.f32 %v6710_v7, %v2909_v19  ;;  %v7226_v42 = vpop.f32.mrb[101].mxu1  ;;  %v3290_v37 = vsub.f32 %v6716_v52, %v2909_v19 }
 0x50f   : > { %8436 = vst [vmem:[#allocation123_spill] sm:$0xff] %v7226_v42  ;;  %5382 = vpow2.f32 %v3669_v0 }
 0x510   : > { %v3673_v15 = vmul.f32 1.442695, %v3351_v60  ;;  %v3675_v46 = vmul.f32 1.442695, %v3352_v14  ;;  %v3549_v16 = vmul.f32 1.442695, %v3289_v13  ;;  %5384 = vpow2.f32 %v3671_v8  ;;  %v5375_v52 = vpop.eup %5374 }
 0x511   : > { %v3551_v41 = vmul.f32 1.442695, %v3290_v37  ;;  %v2912_v18 = vpop.xlane.xlu1 %2911  ;;  %v3005_v23 = vpop.xlane.xlu0 %3004 }
 0x512   : > { %5386 = vpow2.f32 %v3673_v15  ;;  %v3291_v56 = vsub.f32 %v6727_v3, %v2912_v18  ;;  %v3292_v7 = vsub.f32 %v6733_v11, %v2912_v18  ;;  %v3353_v47 = vsub.f32 %v6739_v1, %v3005_v23  ;;  %v7234_v61 = vpop.f32.mrb[102].mxu1 }
 0x513   : > { %8437 = vst [vmem:[#allocation124_spill] sm:$0xff] %v7234_v61  ;;  %5388 = vpow2.f32 %v3675_v46  ;;  %v3354_v0 = vsub.f32 %v6741_v4, %v3005_v23  ;;  %v7237_v19 = vpop.f32.mrb[103].mxu1 }
 0x514   : > { %8438 = vst [vmem:[#allocation125_spill] sm:$0xff] %v7237_v19  ;;  %v5377_v14 = vpop.eup %5376  ;;  %5390 = vpow2.f32 %v3549_v16  ;;  %v3553_v8 = vmul.f32 1.442695, %v3291_v56  ;;  %v3555_v60 = vmul.f32 1.442695, %v3292_v7  ;;  %v7244_v16 = vpop.f32.mrb[104].mxu1 }
 0x515   : > { %v3677_v13 = vmul.f32 1.442695, %v3353_v47  ;;  %v5379_v37 = vpop.eup %5378  ;;  %5392 = vpow2.f32 %v3551_v41  ;;  %v3679_v3 = vmul.f32 1.442695, %v3354_v0  ;;  %v3008_v15 = vpop.xlane.xlu1 %3007  ;;  %v5068_v18 = vpack.c.bf16 %v5377_v14, %v5375_v52  ;;  %8439 = vst [vmem:[#allocation126_spill] sm:$0xff] %v7244_v16 }
 0x516   : > { %v2915_v11 = vpop.xlane.xlu0 %2914  ;;  %v5381_v2 = vpop.eup %5380  ;;  %5394 = vpow2.f32 %v3553_v8  ;;  %v3355_v4 = vsub.f32 %v6756_v29, %v3008_v15  ;;  %v3356_v23 = vsub.f32 %v6758_v36, %v3008_v15 }
 0x517   : > { %v3293_v46 = vsub.f32 %v6746_v63, %v2915_v11  ;;  %5396 = vpow2.f32 %v3555_v60  ;;  %v3294_v41 = vsub.f32 %v6752_v38, %v2915_v11  ;;  %v5066_v56 = vpack.c.bf16 %v5379_v37, %v5381_v2  ;;  %v7247_v7 = vpop.f32.mrb[105].mxu1 }
 0x518   : > { %8440 = vst [vmem:[#allocation127_spill] sm:$0xff] %v7247_v7  ;;  %5398 = vpow2.f32 %v3677_v13  ;;  %v3681_v47 = vmul.f32 1.442695, %v3355_v4  ;;  %v3683_v52 = vmul.f32 1.442695, %v3356_v23  ;;  %v7254_v13 = vpop.f32.mrb[106].mxu1 }
 0x519   : > { %v3557_v0 = vmul.f32 1.442695, %v3293_v46  ;;  %5400 = vpow2.f32 %v3679_v3  ;;  %v3559_v14 = vmul.f32 1.442695, %v3294_v41  ;;  %5067 = vmatprep.subr.bf16.mxu1 %v5066_v56  ;;  %v2918_v29 = vpop.xlane.xlu1 %2917  ;;  %v5383_v36 = vpop.eup %5382  ;;  %8441 = vst [vmem:[#allocation128_spill] sm:$0xff] %v7254_v13 }
 0x51a   : > { %v3011_v8 = vpop.xlane.xlu0 %3010  ;;  %5402 = vpow2.f32 %v3681_v47  ;;  %5069 = vmatpush1.bf16.xpose.msra.mxu1 %v5068_v18  ;;  %v3295_v38 = vsub.f32 %v6763_v30, %v2918_v29  ;;  %v3296_v2 = vsub.f32 %v6769_v20, %v2918_v29  ;;  %v5385_v37 = vpop.eup %5384 }
 0x51b   : > { %v3357_v60 = vsub.f32 %v6775_v48, %v3011_v8  ;;  %5404 = vpow2.f32 %v3683_v52  ;;  %v3358_v3 = vsub.f32 %v6777_v44, %v3011_v8  ;;  %v7257_v15 = vpop.f32.mrb[107].mxu1 }
 0x51c   : > { %8442 = vst [vmem:[#allocation129_spill] sm:$0xff] %v7257_v15  ;;  %v5387_v11 = vpop.eup %5386  ;;  %5406 = vpow2.f32 %v3557_v0  ;;  %v3561_v4 = vmul.f32 1.442695, %v3295_v38  ;;  %v3563_v23 = vmul.f32 1.442695, %v3296_v2  ;;  %v7264_v29 = vpop.f32.mrb[108].mxu1 }
 0x51d   : > { %v3685_v46 = vmul.f32 1.442695, %v3357_v60  ;;  %v5389_v18 = vpop.eup %5388  ;;  %5408 = vpow2.f32 %v3559_v14  ;;  %v3687_v30 = vmul.f32 1.442695, %v3358_v3  ;;  %v3014_v41 = vpop.xlane.xlu1 %3013  ;;  %v5132_v56 = vpack.c.bf16 %v5387_v11, %v5383_v36  ;;  %8443 = vst [vmem:[#allocation130_spill] sm:$0xff] %v7264_v29 }
 0x51e   : > { %v2921_v20 = vpop.xlane.xlu0 %2920  ;;  %v5391_v47 = vpop.eup %5390  ;;  %5410 = vpow2.f32 %v3561_v4  ;;  %v3359_v44 = vsub.f32 %v6792_v17, %v3014_v41  ;;  %v3360_v52 = vsub.f32 %v6794_v45, %v3014_v41  ;;  %v5130_v38 = vpack.c.bf16 %v5389_v18, %v5385_v37 }
 0x51f   : > { %v3297_v0 = vsub.f32 %v6782_v39, %v2921_v20  ;;  %v5393_v8 = vpop.eup %5392  ;;  %5412 = vpow2.f32 %v3563_v23  ;;  %v3298_v14 = vsub.f32 %v6788_v35, %v2921_v20  ;;  %v7267_v2 = vpop.f32.mrb[109].mxu1 }
 0x520   : > { %8444 = vst [vmem:[#allocation131_spill] sm:$0xff] %v7267_v2  ;;  %v5395_v36 = vpop.eup %5394  ;;  %5414 = vpow2.f32 %v3685_v46  ;;  %v3689_v60 = vmul.f32 1.442695, %v3359_v44  ;;  %v3691_v3 = vmul.f32 1.442695, %v3360_v52  ;;  %5131 = vmatprep.subr.bf16.mxu0 %v5130_v38  ;;  %v7274_v18 = vpop.f32.mrb[110].mxu1 }
 0x521   : > { %v3565_v11 = vmul.f32 1.442695, %v3297_v0  ;;  %v5397_v4 = vpop.eup %5396  ;;  %5416 = vpow2.f32 %v3687_v30  ;;  %v3567_v17 = vmul.f32 1.442695, %v3298_v14  ;;  %v2924_v45 = vpop.xlane.xlu1 %2923  ;;  %v5072_v41 = vpack.c.bf16 %v5395_v36, %v5391_v47  ;;  %5133 = vmatpush1.bf16.xpose.msra.mxu0 %v5132_v56  ;;  %8445 = vst [vmem:[#allocation132_spill] sm:$0xff] %v7274_v18 }
 0x522   : > { %v3017_v39 = vpop.xlane.xlu0 %3016  ;;  %v5399_v48 = vpop.eup %5398  ;;  %5418 = vpow2.f32 %v3689_v60  ;;  %v3299_v35 = vsub.f32 %v6799_v22, %v2924_v45  ;;  %v3300_v37 = vsub.f32 %v6805_v50, %v2924_v45  ;;  %v5070_v44 = vpack.c.bf16 %v5397_v4, %v5393_v8 }
 0x523   : > { %v3361_v46 = vsub.f32 %v6811_v53, %v3017_v39  ;;  %v5401_v30 = vpop.eup %5400  ;;  %5420 = vpow2.f32 %v3691_v3  ;;  %v3362_v20 = vsub.f32 %v6813_v26, %v3017_v39  ;;  %v7277_v47 = vpop.f32.mrb[111].mxu1 }
 0x524   : > { %8446 = vst [vmem:[#allocation133_spill] sm:$0xff] %v7277_v47  ;;  %v5403_v52 = vpop.eup %5402  ;;  %5422 = vpow2.f32 %v3565_v11  ;;  %v3569_v0 = vmul.f32 1.442695, %v3299_v35  ;;  %v3571_v14 = vmul.f32 1.442695, %v3300_v37  ;;  %5071 = vmatprep.subr.bf16.mxu1 %v5070_v44  ;;  %v7284_v4 = vpop.f32.mrb[112].mxu1 }
 0x525   : > { %v3693_v56 = vmul.f32 1.442695, %v3361_v46  ;;  %v5405_v38 = vpop.eup %5404  ;;  %5424 = vpow2.f32 %v3567_v17  ;;  %v3695_v22 = vmul.f32 1.442695, %v3362_v20  ;;  %v3020_v50 = vpop.xlane.xlu1 %3019  ;;  %v5136_v36 = vpack.c.bf16 %v5403_v52, %v5399_v48  ;;  %5073 = vmatpush1.bf16.xpose.msra.mxu1 %v5072_v41  ;;  %8447 = vst [vmem:[#allocation134_spill] sm:$0xff] %v7284_v4 }
 0x526   : > { %v2927_v53 = vpop.xlane.xlu0 %2926  ;;  %v5407_v3 = vpop.eup %5406  ;;  %5426 = vpow2.f32 %v3569_v0  ;;  %v3363_v26 = vsub.f32 %v6828_v24, %v3020_v50  ;;  %v3364_v8 = vsub.f32 %v6830_v51, %v3020_v50  ;;  %v5134_v39 = vpack.c.bf16 %v5405_v38, %v5401_v30 }
 0x527   : > { %v3301_v11 = vsub.f32 %v6818_v27, %v2927_v53  ;;  %v5409_v17 = vpop.eup %5408  ;;  %5428 = vpow2.f32 %v3571_v14  ;;  %v3302_v45 = vsub.f32 %v6824_v49, %v2927_v53  ;;  %v7287_v48 = vpop.f32.mrb[113].mxu1 }
 0x528   : > { %8448 = vst [vmem:[#allocation135_spill] sm:$0xff] %v7287_v48  ;;  %v5411_v35 = vpop.eup %5410  ;;  %5430 = vpow2.f32 %v3693_v56  ;;  %v3697_v37 = vmul.f32 1.442695, %v3363_v26  ;;  %v3699_v46 = vmul.f32 1.442695, %v3364_v8  ;;  %5135 = vmatprep.subr.bf16.mxu0 %v5134_v39  ;;  %v7294_v56 = vpop.f32.mrb[114].mxu1 }
 0x529   : > { %v3573_v41 = vmul.f32 1.442695, %v3301_v11  ;;  %v5413_v20 = vpop.eup %5412  ;;  %5432 = vpow2.f32 %v3695_v22  ;;  %v3575_v24 = vmul.f32 1.442695, %v3302_v45  ;;  %v2930_v51 = vpop.xlane.xlu1 %2929  ;;  %v5076_v44 = vpack.c.bf16 %v5411_v35, %v5407_v3  ;;  %5137 = vmatpush1.bf16.xpose.msra.mxu0 %v5136_v36  ;;  %8449 = vst [vmem:[#allocation136_spill] sm:$0xff] %v7294_v56 }
 0x52a   : > { %v3023_v27 = vpop.xlane.xlu0 %3022  ;;  %v5415_v0 = vpop.eup %5414  ;;  %5434 = vpow2.f32 %v3697_v37  ;;  %v3303_v49 = vsub.f32 %v6835_v6, %v2930_v51  ;;  %v3304_v30 = vsub.f32 %v6841_v10, %v2930_v51  ;;  %v5074_v50 = vpack.c.bf16 %v5413_v20, %v5409_v17 }
 0x52b   : > { %v3365_v14 = vsub.f32 %v6847_v57, %v3023_v27  ;;  %v5417_v38 = vpop.eup %5416  ;;  %5436 = vpow2.f32 %v3699_v46  ;;  %v3366_v22 = vsub.f32 %v6849_v28, %v3023_v27  ;;  %v7297_v53 = vpop.f32.mrb[115].mxu1 }
 0x52c   : > { %8450 = vst [vmem:[#allocation137_spill] sm:$0xff] %v7297_v53  ;;  %v5419_v3 = vpop.eup %5418  ;;  %5438 = vpow2.f32 %v3573_v41  ;;  %v3577_v26 = vmul.f32 1.442695, %v3303_v49  ;;  %v3579_v8 = vmul.f32 1.442695, %v3304_v30  ;;  %5075 = vmatprep.subr.bf16.mxu1 %v5074_v50  ;;  %v7304_v46 = vpop.f32.mrb[116].mxu1 }
 0x52d   : > { %v3701_v36 = vmul.f32 1.442695, %v3365_v14  ;;  %v5421_v11 = vpop.eup %5420  ;;  %5440 = vpow2.f32 %v3575_v24  ;;  %v3703_v6 = vmul.f32 1.442695, %v3366_v22  ;;  %v3026_v10 = vpop.xlane.xlu1 %3025  ;;  %v5140_v45 = vpack.c.bf16 %v5419_v3, %v5415_v0  ;;  %5077 = vmatpush1.bf16.xpose.msra.mxu1 %v5076_v44  ;;  %8451 = vst [vmem:[#allocation138_spill] sm:$0xff] %v7304_v46  ;;  %v8453_v49 = vld [vmem:[#allocation29_spill] sm:$0xff] }
 0x52e   : > { %v2933_v57 = vpop.xlane.xlu0 %2932  ;;  %v5423_v35 = vpop.eup %5422  ;;  %5442 = vpow2.f32 %v3577_v26  ;;  %v3367_v28 = vsub.f32 %v6864_v9, %v3026_v10  ;;  %v3368_v17 = vsub.f32 %v6866_v55, %v3026_v10  ;;  %v5138_v20 = vpack.c.bf16 %v5421_v11, %v5417_v38  ;;  %v8454_v3 = vld [vmem:[#allocation30_spill] sm:$0xff] }
 0x52f   : > { %v3305_v37 = vsub.f32 %v6854_v31, %v2933_v57  ;;  %v5425_v41 = vpop.eup %5424  ;;  %5444 = vpow2.f32 %v3579_v8  ;;  %v7306_v24 = vpop.f32.mrb[117].mxu1  ;;  %v3306_v30 = vsub.f32 %v8453_v49, %v2933_v57 }
 0x530   : > { %8452 = vst [vmem:[#allocation139_spill] sm:$0xff] %v7306_v24  ;;  %v5427_v51 = vpop.eup %5426  ;;  %5446 = vpow2.f32 %v3701_v36  ;;  %v3705_v27 = vmul.f32 1.442695, %v3367_v28  ;;  %v3707_v0 = vmul.f32 1.442695, %v3368_v17  ;;  %5139 = vmatprep.subr.bf16.mxu0 %v5138_v20  ;;  %v7314_v36 = vpop.f32.mrb[118].mxu1 }
 0x531   : > { %v5429_v44 = vpop.eup %5428  ;;  %5448 = vpow2.f32 %v3703_v6  ;;  %v3581_v9 = vmul.f32 1.442695, %v3305_v37  ;;  %v2936_v55 = vpop.xlane.xlu1 %2935  ;;  %v5080_v22 = vpack.c.bf16 %v5427_v51, %v5423_v35  ;;  %5141 = vmatpush1.bf16.xpose.msra.mxu0 %v5140_v45  ;;  %8455 = vst [vmem:[#allocation29_spill] sm:$0xff] %v7314_v36  ;;  %v3583_v28 = vmul.f32 1.442695, %v3306_v30  ;;  %v8457_v37 = vld [vmem:[#allocation31_spill] sm:$0xff] }
 0x532   : > { %v3029_v14 = vpop.xlane.xlu0 %3028  ;;  %v5431_v50 = vpop.eup %5430  ;;  %5450 = vpow2.f32 %v3705_v27  ;;  %v3307_v38 = vsub.f32 %v6871_v40, %v2936_v55  ;;  %v3308_v26 = vsub.f32 %v8454_v3, %v2936_v55  ;;  %v5078_v6 = vpack.c.bf16 %v5429_v44, %v5425_v41  ;;  %v8458_v30 = vld [vmem:[#allocation35_spill] sm:$0xff]  ;;  %v8459_v55 = vld [vmem:[#allocation32_spill] sm:$0xff]  ;;  %v8461_v3 = vld [vmem:[#allocation33_spill] sm:$0xff] }
 0x533   : > { %v3369_v8 = vsub.f32 %v6885_v58, %v3029_v14  ;;  %v5433_v11 = vpop.eup %5432  ;;  %5452 = vpow2.f32 %v3707_v0  ;;  %v7316_v10 = vpop.f32.mrb[119].mxu1  ;;  %v3370_v20 = vsub.f32 %v8457_v37, %v3029_v14 }
 0x534   : > { %8456 = vst [vmem:[#allocation30_spill] sm:$0xff] %v7316_v10  ;;  %v5435_v57 = vpop.eup %5434  ;;  %v3585_v17 = vmul.f32 1.442695, %v3307_v38  ;;  %v3587_v35 = vmul.f32 1.442695, %v3308_v26  ;;  %5454 = vpow2.f32 %v3581_v9  ;;  %5079 = vmatprep.subr.bf16.mxu1 %v5078_v6  ;;  %v7324_v14 = vpop.f32.mrb[120].mxu1 }
 0x535   : > { %v5437_v45 = vpop.eup %5436  ;;  %v3709_v40 = vmul.f32 1.442695, %v3369_v8  ;;  %v3032_v51 = vpop.xlane.xlu1 %3031  ;;  %v5144_v49 = vpack.c.bf16 %v5435_v57, %v5431_v50  ;;  %5081 = vmatpush1.bf16.xpose.msra.mxu1 %v5080_v22  ;;  %8460 = vst [vmem:[#allocation31_spill] sm:$0xff] %v7324_v14  ;;  %v3711_v50 = vmul.f32 1.442695, %v3370_v20 }
 0x536   : > { %v2939_v27 = vpop.xlane.xlu0 %2938  ;;  %v5439_v0 = vpop.eup %5438  ;;  %5456 = vpow2.f32 %v3585_v17  ;;  %v3371_v41 = vsub.f32 %v6901_v54, %v3032_v51  ;;  %v3372_v44 = vsub.f32 %v8458_v30, %v3032_v51  ;;  %v5142_v6 = vpack.c.bf16 %v5437_v45, %v5433_v11 }
 0x537   : > { %v3309_v38 = vsub.f32 %v8459_v55, %v2939_v27  ;;  %v5441_v9 = vpop.eup %5440  ;;  %5458 = vpow2.f32 %v3587_v35  ;;  %v3310_v26 = vsub.f32 %v8461_v3, %v2939_v27  ;;  %v7327_v8 = vpop.f32.mrb[121].mxu1 }
 0x538   : > { %8462 = vst [vmem:[#allocation35_spill] sm:$0xff] %v7327_v8  ;;  %v5443_v37 = vpop.eup %5442  ;;  %5460 = vpow2.f32 %v3583_v28  ;;  %v3713_v57 = vmul.f32 1.442695, %v3371_v41  ;;  %v3715_v22 = vmul.f32 1.442695, %v3372_v44  ;;  %5143 = vmatprep.subr.bf16.mxu0 %v5142_v6  ;;  %v7331_v30 = vpop.f32.mrb[122].mxu1 }
 0x539   : > { %v5445_v17 = vpop.eup %5444  ;;  %5462 = vpow2.f32 %v3709_v40  ;;  %v3589_v54 = vmul.f32 1.442695, %v3309_v38  ;;  %v7333_v35 = vpop.f32.mrb[110].mxu0  ;;  %v5084_v27 = vpack.c.bf16 %v5443_v37, %v5439_v0  ;;  %v3591_v11 = vmul.f32 1.442695, %v3310_v26  ;;  %5145 = vmatpush1.bf16.xpose.msra.mxu0 %v5144_v49  ;;  %v8464_v40 = vld [vmem:[#allocation34_spill] sm:$0xff] }
 0x53a   : > { %v5447_v55 = vpop.eup %5446  ;;  %5464 = vpow2.f32 %v3713_v57  ;;  %v2942_v28 = vpop.xlane.xlu1 %2941  ;;  %v5082_v45 = vpack.c.bf16 %v5445_v17, %v5441_v9  ;;  %v8465_v38 = vld [vmem:[#allocation36_spill] sm:$0xff]  ;;  %v8466_v9 = vld [vmem:[#allocation38_spill] sm:$0xff] }
 0x53b   : > { %v7335_v20 = vpop.f32.mrb[123].mxu1  ;;  %v5449_v41 = vpop.eup %5448  ;;  %5466 = vpow2.f32 %v3715_v22  ;;  %v3311_v44 = vsub.f32 %v8464_v40, %v2942_v28  ;;  %v3312_v3 = vsub.f32 %v8465_v38, %v2942_v28 }
 0x53c   : > { %8463 = vst [vmem:[#allocation32_spill] sm:$0xff] %v7335_v20  ;;  %v7341_v58 = vpop.f32.mrb[111].mxu0  ;;  %v3035_v0 = vpop.xlane.xlu0 %3034  ;;  %5468 = vpow2.f32 %v3711_v50  ;;  %5083 = vmatprep.subr.bf16.mxu1 %v5082_v45 }
 0x53d   : > { %v5451_v37 = vpop.eup %5450  ;;  %v3189_v49 = vmax.f32 %v7333_v35, %v7341_v58  ;;  %v3373_v26 = vsub.f32 %v6916_v33, %v3035_v0  ;;  %v3374_v57 = vsub.f32 %v8466_v9, %v3035_v0  ;;  %v7347_v22 = vpop.f32.mrb[124].mxu1  ;;  %5470 = vpow2.f32 %v3589_v54  ;;  %5085 = vmatpush1.bf16.xpose.msra.mxu1 %v5084_v27  ;;  %v8467_v54 = vld [vmem:[#allocation40_spill] sm:$0xff] }
 0x53e   : > { %v7349_v17 = vpop.f32.mrb[112].mxu0  ;;  %v5453_v28 = vpop.eup %5452  ;;  %v3593_v40 = vmul.f32 1.442695, %v3311_v44  ;;  %v3595_v38 = vmul.f32 1.442695, %v3312_v3  ;;  %v5148_v50 = vpack.c.bf16 %v5451_v37, %v5447_v55  ;;  %5472 = vpow2.f32 %v3591_v11  ;;  %v8468_v3 = vld [vmem:[#allocation42_spill] sm:$0xff] }
 0x53f   : > { %v7351_v6 = vpop.f32.mrb[125].mxu1  ;;  %v7353_v51 = vpop.f32.mrb[113].mxu0  ;;  %v3717_v39 = vmul.f32 1.442695, %v3373_v26  ;;  %3190 = vmax.xlane.f32.xlu0 %v3189_v49  ;;  %v5146_v52 = vpack.c.bf16 %v5453_v28, %v5449_v41  ;;  %v3719_v11 = vmul.f32 1.442695, %v3374_v57 }
 0x540   : > { %v3038_v33 = vpop.xlane.xlu1 %3037  ;;  %v3192_v0 = vmax.f32 %v7349_v17, %v7353_v51  ;;  %v5455_v9 = vpop.eup %5454  ;;  %5474 = vpow2.f32 %v3593_v40  ;;  %v8469_v37 = vld [vmem:[#allocation37_spill] sm:$0xff]  ;;  %v8470_v49 = vld [vmem:[#allocation39_spill] sm:$0xff] }
 0x541   : > { %v3375_v44 = vsub.f32 %v8467_v54, %v3038_v33  ;;  %v3376_v31 = vsub.f32 %v8468_v3, %v3038_v33  ;;  %v2945_v60 = vpop.xlane.xlu0 %2944  ;;  %v5457_v55 = vpop.eup %5456  ;;  %5476 = vpow2.f32 %v3595_v38  ;;  %5147 = vmatprep.subr.bf16.mxu0 %v5146_v52  ;;  %v8475_v52 = vld [vmem:[#allocation41_spill] sm:$0xff] }
 0x542   : > { %v3313_v27 = vsub.f32 %v8469_v37, %v2945_v60  ;;  %v3314_v26 = vsub.f32 %v8470_v49, %v2945_v60  ;;  %v7363_v23 = vpop.f32.mrb[126].mxu1  ;;  %3193 = vmax.xlane.f32.xlu1 %v3192_v0  ;;  %v7365_v45 = vpop.f32.mrb[114].mxu0  ;;  %v5088_v41 = vpack.c.bf16 %v5457_v55, %v5455_v9  ;;  %5478 = vpow2.f32 %v3717_v39  ;;  %5149 = vmatpush1.bf16.xpose.msra.mxu0 %v5148_v50  ;;  %v8476_v37 = vld [vmem:[#allocation43_spill] sm:$0xff] }
 0x543   : > { %8471 = vst [vmem:[#allocation33_spill] sm:$0xff] %v7365_v45  ;;  %v5459_v63 = vpop.eup %5458  ;;  %v3721_v40 = vmul.f32 1.442695, %v3375_v44  ;;  %v3723_v1 = vmul.f32 1.442695, %v3376_v31  ;;  %v7367_v54 = vpop.f32.mrb[127].mxu1  ;;  %v8474_v60 = vmax.f32 %v7197_v5, %v7199_v59 }
 0x544   : > { %8472 = vst [vmem:[#allocation34_spill] sm:$0xff] %v7367_v54  ;;  %v7369_v33 = vpop.f32.mrb[115].mxu0  ;;  %v5461_v28 = vpop.eup %5460  ;;  %v3597_v57 = vmul.f32 1.442695, %v3313_v27  ;;  %v3599_v38 = vmul.f32 1.442695, %v3314_v26 }
 0x545   : > { %8473 = vst [vmem:[#allocation36_spill] sm:$0xff] %v7369_v33  ;;  %3100 = vmax.xlane.f32.xlu0 %v8474_v60  ;;  %v2948_v0 = vpop.xlane.xlu1 %2947  ;;  %v5463_v31 = vpop.eup %5462  ;;  %5480 = vpow2.f32 %v3721_v40  ;;  %v3195_v39 = vmax.f32 %v7365_v45, %v7369_v33  ;;  %v8477_v27 = vld [vmem:[#allocation44_spill] sm:$0xff]  ;;  %v8478_v60 = vld [vmem:[#allocation45_spill] sm:$0xff]  ;;  %v5086_v59 = vpack.c.bf16 %v5459_v63, %v5461_v28  ;;  %v8479_v40 = vmax.f32 %v7205_v21, %v7207_v12 }
 0x546   : > { %v3315_v3 = vsub.f32 %v8475_v52, %v2948_v0  ;;  %v3316_v49 = vsub.f32 %v8476_v37, %v2948_v0  ;;  %v3041_v9 = vpop.xlane.xlu0 %3040  ;;  %v5465_v55 = vpop.eup %5464  ;;  %5482 = vpow2.f32 %v3723_v1 }
 0x547   : > { %v3377_v26 = vsub.f32 %v8477_v27, %v3041_v9  ;;  %v3378_v50 = vsub.f32 %v8478_v60, %v3041_v9  ;;  %v7382_v5 = vpop.f32.mrb[128].mxu1  ;;  %3103 = vmax.xlane.f32.xlu1 %v8479_v40  ;;  %v7387_v52 = vpop.f32.mrb[116].mxu0  ;;  %5484 = vpow2.f32 %v3719_v11  ;;  %v5152_v27 = vpack.c.bf16 %v5465_v55, %v5463_v31  ;;  %5087 = vmatprep.subr.bf16.mxu1 %v5086_v59  ;;  %v8482_v11 = vld [vmem:[#allocation46_spill] sm:$0xff] }
 0x548   : > { %8480 = vst [vmem:[#allocation38_spill] sm:$0xff] %v7387_v52  ;;  %v5467_v0 = vpop.eup %5466  ;;  %v3601_v37 = vmul.f32 1.442695, %v3315_v3  ;;  %v3603_v44 = vmul.f32 1.442695, %v3316_v49  ;;  %v7389_v33 = vpop.f32.mrb[129].mxu1  ;;  %5486 = vpow2.f32 %v3597_v57  ;;  %5089 = vmatpush1.bf16.xpose.msra.mxu1 %v5088_v41 }
 0x549   : > { %v7391_v1 = vpop.f32.mrb[117].mxu0  ;;  %v5469_v45 = vpop.eup %5468  ;;  %v3725_v63 = vmul.f32 1.442695, %v3377_v26  ;;  %3196 = vmax.xlane.f32.xlu0 %v3195_v39  ;;  %v8483_v49 = vld [vmem:[#allocation47_spill] sm:$0xff]  ;;  %v3727_v57 = vmul.f32 1.442695, %v3378_v50 }
 0x54a   : > { %8481 = vst [vmem:[#allocation40_spill] sm:$0xff] %v7391_v1  ;;  %v3044_v28 = vpop.xlane.xlu1 %3043  ;;  %v5471_v60 = vpop.eup %5470  ;;  %5488 = vpow2.f32 %v3601_v37  ;;  %v3198_v12 = vmax.f32 %v7387_v52, %v7391_v1  ;;  %v5150_v55 = vpack.c.bf16 %v5467_v0, %v5469_v45 }
 0x54b   : > { %v3379_v3 = vsub.f32 %v8482_v11, %v3044_v28  ;;  %v3380_v40 = vsub.f32 %v8483_v49, %v3044_v28  ;;  %v5473_v31 = vpop.eup %5472  ;;  %5490 = vpow2.f32 %v3603_v44  ;;  %v7399_v59 = vpop.f32.mrb[130].mxu1  ;;  %v8486_v44 = vmax.f32 %v7213_v25, %v7215_v43  ;;  %v8488_v49 = vld [vmem:[#allocation50_spill] sm:$0xff] }
 0x54c   : > { %v7401_v39 = vpop.f32.mrb[118].mxu0  ;;  %v5475_v26 = vpop.eup %5474  ;;  %5492 = vpow2.f32 %v3599_v38  ;;  %3199 = vmax.xlane.f32.xlu1 %v3198_v12  ;;  %5151 = vmatprep.subr.bf16.mxu0 %v5150_v55  ;;  %v8487_v12 = vld [vmem:[#allocation48_spill] sm:$0xff] }
 0x54d   : > { %8484 = vst [vmem:[#allocation42_spill] sm:$0xff] %v7401_v39  ;;  %v3729_v9 = vmul.f32 1.442695, %v3379_v3  ;;  %v3731_v37 = vmul.f32 1.442695, %v3380_v40  ;;  %v7403_v41 = vpop.f32.mrb[131].mxu1  ;;  %v5477_v28 = vpop.eup %5476  ;;  %5494 = vpow2.f32 %v3725_v63  ;;  %3106 = vmax.xlane.f32.xlu0 %v8486_v44  ;;  %v5092_v0 = vpack.c.bf16 %v5475_v26, %v5471_v60  ;;  %5153 = vmatpush1.bf16.xpose.msra.mxu0 %v5152_v27 }
 0x54e   : > { %v7405_v11 = vpop.f32.mrb[119].mxu0  ;;  %v2951_v50 = vpop.xlane.xlu0 %2950  ;;  %v5090_v63 = vpack.c.bf16 %v5477_v28, %v5473_v31 }
 0x54f   : > { %8485 = vst [vmem:[#allocation37_spill] sm:$0xff] %v7405_v11  ;;  %v3201_v38 = vmax.f32 %v7401_v39, %v7405_v11  ;;  %5496 = vpow2.f32 %v3729_v9  ;;  %v3317_v3 = vsub.f32 %v8487_v12, %v2951_v50  ;;  %v3318_v40 = vsub.f32 %v8488_v49, %v2951_v50  ;;  %v5479_v55 = vpop.eup %5478  ;;  %v7416_v1 = vpop.f32.mrb[132].mxu1  ;;  %v8494_v11 = vld [vmem:[#allocation51_spill] sm:$0xff] }
 0x550   : > { %5498 = vpow2.f32 %v3731_v37  ;;  %v7418_v44 = vpop.f32.mrb[120].mxu0  ;;  %v5481_v43 = vpop.eup %5480  ;;  %5091 = vmatprep.subr.bf16.mxu1 %v5090_v63  ;;  %v8490_v9 = vmax.f32 %v7221_v62, %v7226_v42  ;;  %v8491_v37 = vld [vmem:[#allocation53_spill] sm:$0xff] }
 0x551   : > { %8489 = vst [vmem:[#allocation39_spill] sm:$0xff] %v7418_v44  ;;  %5500 = vpow2.f32 %v3727_v57  ;;  %v3605_v45 = vmul.f32 1.442695, %v3317_v3  ;;  %v3607_v25 = vmul.f32 1.442695, %v3318_v40  ;;  %v2954_v27 = vpop.xlane.xlu1 %2953  ;;  %v7423_v60 = vpop.f32.mrb[133].mxu1  ;;  %3202 = vmax.xlane.f32.xlu0 %v3201_v38  ;;  %v5156_v3 = vpack.c.bf16 %v5481_v43, %v5479_v55  ;;  %5093 = vmatpush1.bf16.xpose.msra.mxu1 %v5092_v0 }
 0x552   : > { %3109 = vmax.xlane.f32.xlu1 %v8490_v9  ;;  %v5483_v26 = vpop.eup %5482  ;;  %v3319_v31 = vsub.f32 %v6979_v32, %v2954_v27  ;;  %v3320_v28 = vsub.f32 %v8491_v37, %v2954_v27  ;;  %v7429_v57 = vpop.f32.mrb[121].mxu0  ;;  %v8493_v63 = vld [vmem:[#allocation49_spill] sm:$0xff]  ;;  %v8496_v55 = vmax.f32 %v7234_v61, %v7237_v19 }
 0x553   : > { %8492 = vst [vmem:[#allocation41_spill] sm:$0xff] %v7429_v57  ;;  %v3047_v12 = vpop.xlane.xlu0 %3046  ;;  %v5485_v49 = vpop.eup %5484  ;;  %v3204_v40 = vmax.f32 %v7418_v44, %v7429_v57  ;;  %5502 = vpow2.f32 %v3605_v45  ;;  %v8497_v45 = vld [vmem:[#allocation52_spill] sm:$0xff] }
 0x554   : > { %v3381_v9 = vsub.f32 %v8493_v63, %v3047_v12  ;;  %v3382_v38 = vsub.f32 %v8494_v11, %v3047_v12  ;;  %v5487_v39 = vpop.eup %5486  ;;  %v3609_v32 = vmul.f32 1.442695, %v3319_v31  ;;  %v3611_v27 = vmul.f32 1.442695, %v3320_v28  ;;  %v7435_v42 = vpop.f32.mrb[134].mxu1  ;;  %v8498_v31 = vld [vmem:[#allocation54_spill] sm:$0xff] }
 0x555   : > { %v5154_v37 = vpack.c.bf16 %v5483_v26, %v5485_v49  ;;  %v7437_v50 = vpop.f32.mrb[122].mxu0  ;;  %v5489_v62 = vpop.eup %5488  ;;  %5504 = vpow2.f32 %v3607_v25 }
 0x556   : > { %8495 = vst [vmem:[#allocation43_spill] sm:$0xff] %v7437_v50  ;;  %v3733_v43 = vmul.f32 1.442695, %v3381_v9  ;;  %v3735_v0 = vmul.f32 1.442695, %v3382_v38  ;;  %3112 = vmax.xlane.f32.xlu1 %v8496_v55  ;;  %v3050_v63 = vpop.xlane.xlu1 %3049  ;;  %v7442_v57 = vpop.f32.mrb[135].mxu1  ;;  %5506 = vpow2.f32 %v3609_v32 }
 0x557   : > { %v5491_v11 = vpop.eup %5490  ;;  %5155 = vmatprep.subr.bf16.mxu0 %v5154_v37  ;;  %v3383_v26 = vsub.f32 %v8497_v45, %v3050_v63  ;;  %v3384_v28 = vsub.f32 %v8498_v31, %v3050_v63  ;;  %v7448_v25 = vpop.f32.mrb[123].mxu0  ;;  %5508 = vpow2.f32 %v3611_v27  ;;  %v8500_v55 = vld [vmem:[#allocation55_spill] sm:$0xff]  ;;  %v8501_v32 = vld [vmem:[#allocation56_spill] sm:$0xff] }
 0x558   : > { %8499 = vst [vmem:[#allocation44_spill] sm:$0xff] %v7448_v25  ;;  %v2957_v49 = vpop.xlane.xlu0 %2956  ;;  %v5493_v9 = vpop.eup %5492  ;;  %5157 = vmatpush1.bf16.xpose.msra.mxu0 %v5156_v3  ;;  %v3207_v38 = vmax.f32 %v7437_v50, %v7448_v25  ;;  %5510 = vpow2.f32 %v3733_v43  ;;  %v5096_v25 = vpack.c.bf16 %v5489_v62, %v5487_v39  ;;  %v8505_v39 = vld [vmem:[#allocation57_spill] sm:$0xff] }
 0x559   : > { %v3321_v44 = vsub.f32 %v8500_v55, %v2957_v49  ;;  %v3322_v37 = vsub.f32 %v8501_v32, %v2957_v49  ;;  %v5495_v19 = vpop.eup %5494  ;;  %v3737_v45 = vmul.f32 1.442695, %v3383_v26  ;;  %v3739_v63 = vmul.f32 1.442695, %v3384_v28  ;;  %v7454_v61 = vpop.f32.mrb[136].mxu1 }
 0x55a   : > { %v5094_v31 = vpack.c.bf16 %v5491_v11, %v5493_v9  ;;  %v7456_v12 = vpop.f32.mrb[124].mxu0  ;;  %v5497_v52 = vpop.eup %5496  ;;  %5512 = vpow2.f32 %v3735_v0  ;;  %3205 = vmax.xlane.f32.xlu1 %v3204_v40  ;;  %3208 = vmax.xlane.f32.xlu0 %v3207_v38  ;;  %v8503_v11 = vld [vmem:[#allocation59_spill] sm:$0xff]  ;;  %v8506_v38 = vld [vmem:[#allocation58_spill] sm:$0xff] }
 0x55b   : > { %8502 = vst [vmem:[#allocation45_spill] sm:$0xff] %v7456_v12  ;;  %v3613_v27 = vmul.f32 1.442695, %v3321_v44  ;;  %v3615_v3 = vmul.f32 1.442695, %v3322_v37  ;;  %v2960_v50 = vpop.xlane.xlu1 %2959  ;;  %v7458_v55 = vpop.f32.mrb[137].mxu1  ;;  %5514 = vpow2.f32 %v3737_v45 }
 0x55c   : > { %v5499_v49 = vpop.eup %5498  ;;  %5095 = vmatprep.subr.bf16.mxu1 %v5094_v31  ;;  %v3323_v43 = vsub.f32 %v7008_v34, %v2960_v50  ;;  %v3324_v26 = vsub.f32 %v8503_v11, %v2960_v50  ;;  %v7464_v9 = vpop.f32.mrb[125].mxu0  ;;  %5516 = vpow2.f32 %v3739_v63  ;;  %v8509_v63 = vmax.f32 %v7254_v13, %v7257_v15 }
 0x55d   : > { %8504 = vst [vmem:[#allocation46_spill] sm:$0xff] %v7464_v9  ;;  %v3053_v44 = vpop.xlane.xlu0 %3052  ;;  %v5501_v0 = vpop.eup %5500  ;;  %5097 = vmatpush1.bf16.xpose.msra.mxu1 %v5096_v25  ;;  %v3210_v62 = vmax.f32 %v7456_v12, %v7464_v9  ;;  %5518 = vpow2.f32 %v3613_v27  ;;  %v8508_v25 = vmax.f32 %v7244_v16, %v7247_v7 }
 0x55e   : > { %v3385_v40 = vsub.f32 %v8505_v39, %v3053_v44  ;;  %v3386_v32 = vsub.f32 %v8506_v38, %v3053_v44  ;;  %v3617_v34 = vmul.f32 1.442695, %v3323_v43  ;;  %v3619_v37 = vmul.f32 1.442695, %v3324_v26  ;;  %v7470_v45 = vpop.f32.mrb[138].mxu1  ;;  %v7472_v31 = vpop.f32.mrb[126].mxu0  ;;  %3118 = vmax.xlane.f32.xlu0 %v8509_v63 }
 0x55f   : > { %v5158_v50 = vpack.c.bf16 %v5499_v49, %v5501_v0  ;;  %8507 = vst [vmem:[#allocation47_spill] sm:$0xff] %v7472_v31  ;;  %5520 = vpow2.f32 %v3615_v3  ;;  %3115 = vmax.xlane.f32.xlu1 %v8508_v25  ;;  %v5160_v44 = vpack.c.bf16 %v5497_v52, %v5495_v19  ;;  %v3056_v27 = vpop.xlane.xlu1 %3055  ;;  %v7480_v43 = vpop.f32.mrb[139].mxu1  ;;  %v8510_v26 = vld [vmem:[#allocation60_spill] sm:$0xff]  ;;  %v8511_v0 = vld [vmem:[#allocation61_spill] sm:$0xff]  ;;  %v8513_v52 = vld [vmem:[#allocation62_spill] sm:$0xff] }
 0x560   : > { %v3741_v11 = vmul.f32 1.442695, %v3385_v40  ;;  %v3743_v28 = vmul.f32 1.442695, %v3386_v32  ;;  %v7482_v49 = vpop.eup %5502  ;;  %5522 = vpow2.f32 %v3617_v34  ;;  %v3387_v3 = vsub.f32 %v8510_v26, %v3056_v27  ;;  %v7488_v38 = vpop.f32.mrb[127].mxu0  ;;  %v8514_v34 = vld [vmem:[#allocation64_spill] sm:$0xff] }
 0x561   : > { %5159 = vmatprep.subr.bf16.mxu0 %v5158_v50  ;;  %v3388_v39 = vsub.f32 %v8511_v0, %v3056_v27  ;;  %8512 = vst [vmem:[#allocation48_spill] sm:$0xff] %v7488_v38  ;;  %v2963_v32 = vpop.xlane.xlu0 %2962  ;;  %v5505_v25 = vpop.eup %5504  ;;  %5524 = vpow2.f32 %v3619_v37  ;;  %v3213_v19 = vmax.f32 %v7472_v31, %v7488_v38 }
 0x562   : > { %5161 = vmatpush1.bf16.xpose.msra.mxu0 %v5160_v44  ;;  %v3325_v63 = vsub.f32 %v8513_v52, %v2963_v32  ;;  %v3326_v50 = vsub.f32 %v8514_v34, %v2963_v32  ;;  %v5507_v9 = vpop.eup %5506  ;;  %5526 = vpow2.f32 %v3741_v11  ;;  %v3745_v26 = vmul.f32 1.442695, %v3387_v3  ;;  %v7494_v0 = vpop.f32.mrb[140].mxu1  ;;  %v8518_v34 = vld [vmem:[#allocation68_spill] sm:$0xff] }
 0x563   : > { %v3747_v27 = vmul.f32 1.442695, %v3388_v39  ;;  %v7496_v40 = vpop.f32.mrb[128].mxu0  ;;  %v5509_v12 = vpop.eup %5508  ;;  %5528 = vpow2.f32 %v3743_v28  ;;  %3211 = vmax.xlane.f32.xlu1 %v3210_v62  ;;  %v8516_v44 = vmax.f32 %v7264_v29, %v7267_v2  ;;  %v5100_v11 = vpack.c.bf16 %v5507_v9, %v7482_v49  ;;  %v8517_v39 = vld [vmem:[#allocation66_spill] sm:$0xff]  ;;  %v8520_v2 = vld [vmem:[#allocation63_spill] sm:$0xff]  ;;  %v8521_v49 = vld [vmem:[#allocation65_spill] sm:$0xff] }
 0x564   : > { %8515 = vst [vmem:[#allocation50_spill] sm:$0xff] %v7496_v40  ;;  %v3621_v15 = vmul.f32 1.442695, %v3325_v63  ;;  %v3623_v37 = vmul.f32 1.442695, %v3326_v50  ;;  %v2966_v52 = vpop.xlane.xlu1 %2965  ;;  %v7501_v38 = vpop.f32.mrb[141].mxu1  ;;  %5530 = vpow2.f32 %v3745_v26 }
 0x565   : > { %3121 = vmax.xlane.f32.xlu0 %v8516_v44  ;;  %v7504_v3 = vpop.eup %5510  ;;  %v3327_v32 = vsub.f32 %v8517_v39, %v2966_v52  ;;  %v3328_v31 = vsub.f32 %v8518_v34, %v2966_v52  ;;  %v7510_v62 = vpop.f32.mrb[129].mxu0  ;;  %5532 = vpow2.f32 %v3747_v27  ;;  %v5098_v52 = vpack.c.bf16 %v5509_v12, %v5505_v25 }
 0x566   : > { %8519 = vst [vmem:[#allocation53_spill] sm:$0xff] %v7510_v62  ;;  %v3059_v63 = vpop.xlane.xlu0 %3058  ;;  %v5513_v50 = vpop.eup %5512  ;;  %v3216_v44 = vmax.f32 %v7496_v40, %v7510_v62  ;;  %5534 = vpow2.f32 %v3621_v15  ;;  %v8524_v15 = vld [vmem:[#allocation67_spill] sm:$0xff] }
 0x567   : > { %v3389_v9 = vsub.f32 %v8520_v2, %v3059_v63  ;;  %v3390_v29 = vsub.f32 %v8521_v49, %v3059_v63  ;;  %v5515_v26 = vpop.eup %5514  ;;  %v3625_v39 = vmul.f32 1.442695, %v3327_v32  ;;  %v3627_v13 = vmul.f32 1.442695, %v3328_v31  ;;  %v7516_v34 = vpop.f32.mrb[142].mxu1  ;;  %5099 = vmatprep.subr.bf16.mxu1 %v5098_v52  ;;  %v8525_v31 = vld [vmem:[#allocation69_spill] sm:$0xff] }
 0x568   : > { %v7518_v28 = vpop.f32.mrb[130].mxu0  ;;  %v5517_v7 = vpop.eup %5516  ;;  %5536 = vpow2.f32 %v3623_v37  ;;  %3217 = vmax.xlane.f32.xlu1 %v3216_v44  ;;  %v5164_v2 = vpack.c.bf16 %v5515_v26, %v7504_v3  ;;  %5101 = vmatpush1.bf16.xpose.msra.mxu1 %v5100_v11  ;;  %v8527_v44 = vld [vmem:[#allocation70_spill] sm:$0xff]  ;;  %v8528_v49 = vld [vmem:[#allocation72_spill] sm:$0xff] }
 0x569   : > { %8522 = vst [vmem:[#allocation49_spill] sm:$0xff] %v7518_v28  ;;  %v3749_v16 = vmul.f32 1.442695, %v3389_v9  ;;  %v3751_v27 = vmul.f32 1.442695, %v3390_v29  ;;  %3214 = vmax.xlane.f32.xlu0 %v3213_v19  ;;  %v3062_v62 = vpop.xlane.xlu1 %3061  ;;  %v7520_v40 = vpop.f32.mrb[143].mxu1  ;;  %5538 = vpow2.f32 %v3625_v39 }
 0x56a   : > { %8523 = vst [vmem:[#allocation51_spill] sm:$0xff] %v7520_v40  ;;  %v7523_v63 = vpop.eup %5518  ;;  %v3391_v12 = vsub.f32 %v8524_v15, %v3062_v62  ;;  %v3392_v25 = vsub.f32 %v8525_v31, %v3062_v62  ;;  %v7529_v32 = vpop.f32.mrb[131].mxu0  ;;  %5540 = vpow2.f32 %v3627_v13  ;;  %v5162_v15 = vpack.c.bf16 %v5517_v7, %v5513_v50 }
 0x56b   : > { %8526 = vst [vmem:[#allocation52_spill] sm:$0xff] %v7529_v32  ;;  %v2969_v29 = vpop.xlane.xlu0 %2968  ;;  %v5521_v19 = vpop.eup %5520  ;;  %v3219_v3 = vmax.f32 %v7518_v28, %v7529_v32  ;;  %5542 = vpow2.f32 %v3749_v16  ;;  %v8530_v32 = vmax.f32 %v7284_v4, %v7287_v48 }
 0x56c   : > { %v3329_v9 = vsub.f32 %v8527_v44, %v2969_v29  ;;  %v3330_v26 = vsub.f32 %v8528_v49, %v2969_v29  ;;  %v5523_v39 = vpop.eup %5522  ;;  %v3753_v52 = vmul.f32 1.442695, %v3391_v12  ;;  %v3755_v62 = vmul.f32 1.442695, %v3392_v25  ;;  %v7535_v31 = vpop.f32.mrb[144].mxu1  ;;  %5163 = vmatprep.subr.bf16.mxu0 %v5162_v15  ;;  %v8534_v44 = vld [vmem:[#allocation76_spill] sm:$0xff] }
 0x56d   : > { %v7537_v37 = vpop.f32.mrb[132].mxu0  ;;  %v5525_v21 = vpop.eup %5524  ;;  %5544 = vpow2.f32 %v3751_v27  ;;  %3127 = vmax.xlane.f32.xlu1 %v8530_v32  ;;  %v8531_v29 = vmax.f32 %v7274_v18, %v7277_v47  ;;  %v5104_v7 = vpack.c.bf16 %v5523_v39, %v7523_v63  ;;  %v8533_v27 = vld [vmem:[#allocation74_spill] sm:$0xff]  ;;  %5165 = vmatpush1.bf16.xpose.msra.mxu0 %v5164_v2  ;;  %v8536_v39 = vld [vmem:[#allocation71_spill] sm:$0xff] }
 0x56e   : > { %8529 = vst [vmem:[#allocation54_spill] sm:$0xff] %v7537_v37  ;;  %v3629_v13 = vmul.f32 1.442695, %v3329_v9  ;;  %v3631_v11 = vmul.f32 1.442695, %v3330_v26  ;;  %v2972_v16 = vpop.xlane.xlu1 %2971  ;;  %v7545_v12 = vpop.f32.mrb[145].mxu1  ;;  %5546 = vpow2.f32 %v3753_v52 }
 0x56f   : > { %3124 = vmax.xlane.f32.xlu0 %v8531_v29  ;;  %8532 = vst [vmem:[#allocation55_spill] sm:$0xff] %v7545_v12  ;;  %v7548_v50 = vpop.eup %5526  ;;  %v3331_v25 = vsub.f32 %v8533_v27, %v2972_v16  ;;  %v3332_v9 = vsub.f32 %v8534_v44, %v2972_v16  ;;  %v7554_v49 = vpop.f32.mrb[133].mxu0  ;;  %5548 = vpow2.f32 %v3755_v62  ;;  %v8537_v52 = vld [vmem:[#allocation73_spill] sm:$0xff]  ;;  %v5102_v44 = vpack.c.bf16 %v5525_v21, %v5521_v19  ;;  %v8541_v21 = vld [vmem:[#allocation75_spill] sm:$0xff] }
 0x570   : > { %8535 = vst [vmem:[#allocation56_spill] sm:$0xff] %v7554_v49  ;;  %v3065_v26 = vpop.xlane.xlu0 %3064  ;;  %v5529_v29 = vpop.eup %5528  ;;  %v3222_v63 = vmax.f32 %v7537_v37, %v7554_v49  ;;  %5550 = vpow2.f32 %v3629_v13  ;;  %v8542_v13 = vld [vmem:[#allocation77_spill] sm:$0xff] }
 0x571   : > { %v3393_v28 = vsub.f32 %v8536_v39, %v3065_v26  ;;  %v3394_v15 = vsub.f32 %v8537_v52, %v3065_v26  ;;  %v5531_v47 = vpop.eup %5530  ;;  %v3633_v27 = vmul.f32 1.442695, %v3331_v25  ;;  %v3635_v16 = vmul.f32 1.442695, %v3332_v9  ;;  %v7560_v18 = vpop.f32.mrb[146].mxu1  ;;  %5103 = vmatprep.subr.bf16.mxu1 %v5102_v44  ;;  %v8545_v52 = vld [vmem:[#allocation80_spill] sm:$0xff] }
 0x572   : > { %8538 = vst [vmem:[#allocation59_spill] sm:$0xff] %v7560_v18  ;;  %v7562_v32 = vpop.f32.mrb[134].mxu0  ;;  %v5533_v48 = vpop.eup %5532  ;;  %5552 = vpow2.f32 %v3631_v11  ;;  %3223 = vmax.xlane.f32.xlu1 %v3222_v63  ;;  %v5168_v26 = vpack.c.bf16 %v5531_v47, %v7548_v50  ;;  %5105 = vmatpush1.bf16.xpose.msra.mxu1 %v5104_v7  ;;  %v8544_v50 = vld [vmem:[#allocation78_spill] sm:$0xff] }
 0x573   : > { %8539 = vst [vmem:[#allocation57_spill] sm:$0xff] %v7562_v32  ;;  %v3757_v62 = vmul.f32 1.442695, %v3393_v28  ;;  %v3759_v2 = vmul.f32 1.442695, %v3394_v15  ;;  %3220 = vmax.xlane.f32.xlu0 %v3219_v3  ;;  %v3068_v49 = vpop.xlane.xlu1 %3067  ;;  %v7564_v37 = vpop.f32.mrb[147].mxu1  ;;  %5554 = vpow2.f32 %v3633_v27 }
 0x574   : > { %8540 = vst [vmem:[#allocation58_spill] sm:$0xff] %v7564_v37  ;;  %v7567_v39 = vpop.eup %5534  ;;  %v3395_v19 = vsub.f32 %v8541_v21, %v3068_v49  ;;  %v3396_v25 = vsub.f32 %v8542_v13, %v3068_v49  ;;  %v7573_v28 = vpop.f32.mrb[135].mxu0  ;;  %5556 = vpow2.f32 %v3635_v16  ;;  %v5166_v21 = vpack.c.bf16 %v5533_v48, %v5529_v29 }
 0x575   : > { %8543 = vst [vmem:[#allocation60_spill] sm:$0xff] %v7573_v28  ;;  %v2975_v9 = vpop.xlane.xlu0 %2974  ;;  %v5537_v3 = vpop.eup %5536  ;;  %v3225_v47 = vmax.f32 %v7562_v32, %v7573_v28  ;;  %5558 = vpow2.f32 %v3757_v62  ;;  %v8547_v28 = vmax.f32 %v7304_v46, %v7306_v24 }
 0x576   : > { %v3333_v63 = vsub.f32 %v8544_v50, %v2975_v9  ;;  %v3334_v15 = vsub.f32 %v8545_v52, %v2975_v9  ;;  %v5539_v27 = vpop.eup %5538  ;;  %v3761_v44 = vmul.f32 1.442695, %v3395_v19  ;;  %v3763_v49 = vmul.f32 1.442695, %v3396_v25  ;;  %v7579_v13 = vpop.f32.mrb[148].mxu1  ;;  %5167 = vmatprep.subr.bf16.mxu0 %v5166_v21  ;;  %v8550_v50 = vld [vmem:[#allocation84_spill] sm:$0xff] }
 0x577   : > { %v7581_v11 = vpop.f32.mrb[136].mxu0  ;;  %v5541_v4 = vpop.eup %5540  ;;  %5560 = vpow2.f32 %v3759_v2  ;;  %3133 = vmax.xlane.f32.xlu1 %v8547_v28  ;;  %v8548_v9 = vmax.f32 %v7294_v56, %v7297_v53  ;;  %v5108_v48 = vpack.c.bf16 %v5539_v27, %v7567_v39  ;;  %v8549_v2 = vld [vmem:[#allocation82_spill] sm:$0xff]  ;;  %5169 = vmatpush1.bf16.xpose.msra.mxu0 %v5168_v26  ;;  %v8552_v27 = vld [vmem:[#allocation79_spill] sm:$0xff] }
 0x578   : > { %8546 = vst [vmem:[#allocation61_spill] sm:$0xff] %v7581_v11  ;;  %v3637_v16 = vmul.f32 1.442695, %v3333_v63  ;;  %v3639_v7 = vmul.f32 1.442695, %v3334_v15  ;;  %v2978_v62 = vpop.xlane.xlu1 %2977  ;;  %v7589_v19 = vpop.f32.mrb[149].mxu1  ;;  %5562 = vpow2.f32 %v3761_v44 }
 0x579   : > { %3130 = vmax.xlane.f32.xlu0 %v8548_v9  ;;  %v7592_v29 = vpop.eup %5542  ;;  %v3335_v25 = vsub.f32 %v8549_v2, %v2978_v62  ;;  %v3336_v63 = vsub.f32 %v8550_v50, %v2978_v62  ;;  %v7598_v52 = vpop.f32.mrb[137].mxu0  ;;  %5564 = vpow2.f32 %v3763_v49  ;;  %v8553_v44 = vld [vmem:[#allocation81_spill] sm:$0xff]  ;;  %v5106_v50 = vpack.c.bf16 %v5541_v4, %v5537_v3  ;;  %v8557_v4 = vld [vmem:[#allocation83_spill] sm:$0xff] }
 0x57a   : > { %8551 = vst [vmem:[#allocation62_spill] sm:$0xff] %v7598_v52  ;;  %v3071_v15 = vpop.xlane.xlu0 %3070  ;;  %v5545_v9 = vpop.eup %5544  ;;  %v3228_v39 = vmax.f32 %v7581_v11, %v7598_v52  ;;  %5566 = vpow2.f32 %v3637_v16  ;;  %v8558_v16 = vld [vmem:[#allocation85_spill] sm:$0xff] }
 0x57b   : > { %v3397_v32 = vsub.f32 %v8552_v27, %v3071_v15  ;;  %v3398_v21 = vsub.f32 %v8553_v44, %v3071_v15  ;;  %v5547_v53 = vpop.eup %5546  ;;  %v3641_v2 = vmul.f32 1.442695, %v3335_v25  ;;  %v3643_v62 = vmul.f32 1.442695, %v3336_v63  ;;  %v7604_v56 = vpop.f32.mrb[150].mxu1  ;;  %5107 = vmatprep.subr.bf16.mxu1 %v5106_v50  ;;  %v8561_v44 = vld [vmem:[#allocation88_spill] sm:$0xff] }
 0x57c   : > { %8554 = vst [vmem:[#allocation64_spill] sm:$0xff] %v7604_v56  ;;  %v7606_v28 = vpop.f32.mrb[138].mxu0  ;;  %v5549_v24 = vpop.eup %5548  ;;  %5568 = vpow2.f32 %v3639_v7  ;;  %3229 = vmax.xlane.f32.xlu1 %v3228_v39  ;;  %v5172_v15 = vpack.c.bf16 %v5547_v53, %v7592_v29  ;;  %5109 = vmatpush1.bf16.xpose.msra.mxu1 %v5108_v48  ;;  %v8560_v29 = vld [vmem:[#allocation86_spill] sm:$0xff] }
 0x57d   : > { %8555 = vst [vmem:[#allocation66_spill] sm:$0xff] %v7606_v28  ;;  %v3765_v49 = vmul.f32 1.442695, %v3397_v32  ;;  %v3767_v26 = vmul.f32 1.442695, %v3398_v21  ;;  %3226 = vmax.xlane.f32.xlu0 %v3225_v47  ;;  %v3074_v52 = vpop.xlane.xlu1 %3073  ;;  %v7608_v11 = vpop.f32.mrb[151].mxu1  ;;  %5570 = vpow2.f32 %v3641_v2 }
 0x57e   : > { %8556 = vst [vmem:[#allocation68_spill] sm:$0xff] %v7608_v11  ;;  %v7611_v27 = vpop.eup %5550  ;;  %v3399_v3 = vsub.f32 %v8557_v4, %v3074_v52  ;;  %v3400_v25 = vsub.f32 %v8558_v16, %v3074_v52  ;;  %v7617_v32 = vpop.f32.mrb[139].mxu0  ;;  %5572 = vpow2.f32 %v3643_v62  ;;  %v5170_v4 = vpack.c.bf16 %v5549_v24, %v5545_v9 }
 0x57f   : > { %8559 = vst [vmem:[#allocation63_spill] sm:$0xff] %v7617_v32  ;;  %v2981_v63 = vpop.xlane.xlu0 %2980  ;;  %v5553_v47 = vpop.eup %5552  ;;  %v3231_v53 = vmax.f32 %v7606_v28, %v7617_v32  ;;  %5574 = vpow2.f32 %v3765_v49  ;;  %v8563_v32 = vmax.f32 %v7324_v14, %v7327_v8 }
 0x580   : > { %v3337_v39 = vsub.f32 %v8560_v29, %v2981_v63  ;;  %v3338_v21 = vsub.f32 %v8561_v44, %v2981_v63  ;;  %v5555_v2 = vpop.eup %5554  ;;  %v3769_v50 = vmul.f32 1.442695, %v3399_v3  ;;  %v3771_v52 = vmul.f32 1.442695, %v3400_v25  ;;  %v7623_v16 = vpop.f32.mrb[152].mxu1  ;;  %5171 = vmatprep.subr.bf16.mxu0 %v5170_v4  ;;  %v8567_v29 = vld [vmem:[#allocation92_spill] sm:$0xff] }
 0x581   : > { %8562 = vst [vmem:[#allocation65_spill] sm:$0xff] %v7623_v16  ;;  %v7625_v7 = vpop.f32.mrb[140].mxu0  ;;  %v5557_v46 = vpop.eup %5556  ;;  %5576 = vpow2.f32 %v3767_v26  ;;  %3139 = vmax.xlane.f32.xlu1 %v8563_v32  ;;  %v8564_v63 = vmax.f32 %v7314_v36, %v7316_v10  ;;  %v5112_v24 = vpack.c.bf16 %v5555_v2, %v7611_v27  ;;  %v8566_v26 = vld [vmem:[#allocation90_spill] sm:$0xff]  ;;  %5173 = vmatpush1.bf16.xpose.msra.mxu0 %v5172_v15  ;;  %v8569_v2 = vld [vmem:[#allocation87_spill] sm:$0xff] }
 0x582   : > { %v3645_v62 = vmul.f32 1.442695, %v3337_v39  ;;  %v3647_v48 = vmul.f32 1.442695, %v3338_v21  ;;  %v2984_v49 = vpop.xlane.xlu1 %2983  ;;  %v7633_v3 = vpop.f32.mrb[153].mxu1  ;;  %5578 = vpow2.f32 %v3769_v50  ;;  %v8570_v50 = vld [vmem:[#allocation89_spill] sm:$0xff] }
 0x583   : > { %3136 = vmax.xlane.f32.xlu0 %v8564_v63  ;;  %8565 = vst [vmem:[#allocation67_spill] sm:$0xff] %v7633_v3  ;;  %v7636_v9 = vpop.eup %5558  ;;  %v3339_v25 = vsub.f32 %v8566_v26, %v2984_v49  ;;  %v3340_v39 = vsub.f32 %v8567_v29, %v2984_v49  ;;  %v7642_v44 = vpop.f32.mrb[141].mxu0  ;;  %5580 = vpow2.f32 %v3771_v52  ;;  %v5110_v29 = vpack.c.bf16 %v5557_v46, %v5553_v47  ;;  %v8574_v46 = vld [vmem:[#allocation93_spill] sm:$0xff] }
 0x584   : > { %8568 = vst [vmem:[#allocation69_spill] sm:$0xff] %v7642_v44  ;;  %v3077_v21 = vpop.xlane.xlu0 %3076  ;;  %v5561_v63 = vpop.eup %5560  ;;  %v3234_v27 = vmax.f32 %v7625_v7, %v7642_v44  ;;  %5582 = vpow2.f32 %v3645_v62  ;;  %v8573_v62 = vld [vmem:[#allocation91_spill] sm:$0xff] }
 0x585   : > { %v3401_v28 = vsub.f32 %v8569_v2, %v3077_v21  ;;  %v3402_v4 = vsub.f32 %v8570_v50, %v3077_v21  ;;  %v5563_v10 = vpop.eup %5562  ;;  %v3649_v26 = vmul.f32 1.442695, %v3339_v25  ;;  %v3651_v49 = vmul.f32 1.442695, %v3340_v39  ;;  %v7648_v36 = vpop.f32.mrb[142].mxu0  ;;  %5111 = vmatprep.subr.bf16.mxu1 %v5110_v29 }
 0x586   : > { %8571 = vst [vmem:[#allocation70_spill] sm:$0xff] %v7648_v36  ;;  %v5565_v32 = vpop.eup %5564  ;;  %5584 = vpow2.f32 %v3647_v48  ;;  %3235 = vmax.xlane.f32.xlu1 %v3234_v27  ;;  %v3080_v15 = vpop.xlane.xlu1 %3079  ;;  %v5176_v2 = vpack.c.bf16 %v5563_v10, %v7636_v9  ;;  %5113 = vmatpush1.bf16.xpose.msra.mxu1 %v5112_v24  ;;  %v8576_v27 = vld [vmem:[#allocation96_spill] sm:$0xff] }
 0x587   : > { %v3773_v8 = vmul.f32 1.442695, %v3401_v28  ;;  %v3775_v14 = vmul.f32 1.442695, %v3402_v4  ;;  %3232 = vmax.xlane.f32.xlu0 %v3231_v53  ;;  %v7650_v52 = vpop.f32.mrb[143].mxu0  ;;  %v7653_v44 = vpop.eup %5566  ;;  %5586 = vpow2.f32 %v3649_v26  ;;  %v3403_v25 = vsub.f32 %v8573_v62, %v3080_v15  ;;  %v8575_v53 = vld [vmem:[#allocation94_spill] sm:$0xff] }
 0x588   : > { %8572 = vst [vmem:[#allocation72_spill] sm:$0xff] %v7650_v52  ;;  %v3404_v47 = vsub.f32 %v8574_v46, %v3080_v15  ;;  %v3237_v48 = vmax.f32 %v7648_v36, %v7650_v52  ;;  %v2987_v28 = vpop.xlane.xlu0 %2986  ;;  %v5569_v39 = vpop.eup %5568  ;;  %5588 = vpow2.f32 %v3651_v49  ;;  %v5174_v10 = vpack.c.bf16 %v5565_v32, %v5561_v63 }
 0x589   : > { %v3341_v21 = vsub.f32 %v8575_v53, %v2987_v28  ;;  %v3342_v50 = vsub.f32 %v8576_v27, %v2987_v28  ;;  %v5571_v9 = vpop.eup %5570  ;;  %5590 = vpow2.f32 %v3773_v8  ;;  %v3777_v4 = vmul.f32 1.442695, %v3403_v25  ;;  %v7661_v29 = vpop.f32.mrb[144].mxu0 }
 0x58a   : > { %v3779_v26 = vmul.f32 1.442695, %v3404_v47  ;;  %v5573_v62 = vpop.eup %5572  ;;  %5592 = vpow2.f32 %v3775_v14  ;;  %5175 = vmatprep.subr.bf16.mxu0 %v5174_v10  ;;  %v8577_v49 = vmax.f32 %v7347_v22, %v7351_v6  ;;  %v2990_v24 = vpop.xlane.xlu1 %2989  ;;  %v5116_v32 = vpack.c.bf16 %v5571_v9, %v7653_v44  ;;  %v8580_v14 = vld [vmem:[#allocation98_spill] sm:$0xff]  ;;  %v8581_v47 = vld [vmem:[#allocation100_spill] sm:$0xff]  ;;  %v8582_v10 = vld [vmem:[#allocation95_spill] sm:$0xff] }
 0x58b   : > { %v3653_v15 = vmul.f32 1.442695, %v3341_v21  ;;  %v3655_v46 = vmul.f32 1.442695, %v3342_v50  ;;  %v7666_v53 = vpop.f32.mrb[145].mxu0  ;;  %v7669_v63 = vpop.eup %5574  ;;  %5594 = vpow2.f32 %v3777_v4  ;;  %v8579_v8 = vmax.f32 %v7331_v30, %v7335_v20  ;;  %5177 = vmatpush1.bf16.xpose.msra.mxu0 %v5176_v2  ;;  %v8583_v9 = vld [vmem:[#allocation97_spill] sm:$0xff] }
 0x58c   : > { %3145 = vmax.xlane.f32.xlu1 %v8577_v49  ;;  %8578 = vst [vmem:[#allocation74_spill] sm:$0xff] %v7666_v53  ;;  %v3343_v25 = vsub.f32 %v8580_v14, %v2990_v24  ;;  %v3344_v28 = vsub.f32 %v8581_v47, %v2990_v24  ;;  %v3240_v21 = vmax.f32 %v7661_v29, %v7666_v53  ;;  %v3083_v27 = vpop.xlane.xlu0 %3082  ;;  %v5577_v50 = vpop.eup %5576  ;;  %5596 = vpow2.f32 %v3779_v26 }
 0x58d   : > { %3142 = vmax.xlane.f32.xlu0 %v8579_v8  ;;  %v3405_v44 = vsub.f32 %v8582_v10, %v3083_v27  ;;  %v3406_v49 = vsub.f32 %v8583_v9, %v3083_v27  ;;  %v5114_v4 = vpack.c.bf16 %v5573_v62, %v5569_v39  ;;  %v5579_v52 = vpop.eup %5578  ;;  %5598 = vpow2.f32 %v3653_v15  ;;  %v7680_v20 = vpop.f32.mrb[146].mxu0  ;;  %v8586_v39 = vld [vmem:[#allocation99_spill] sm:$0xff]  ;;  %v8587_v15 = vld [vmem:[#allocation101_spill] sm:$0xff]  ;;  %v8589_v9 = vld [vmem:[#allocation104_spill] sm:$0xff] }
 0x58e   : > { %v3657_v36 = vmul.f32 1.442695, %v3343_v25  ;;  %v3659_v8 = vmul.f32 1.442695, %v3344_v28  ;;  %8584 = vst [vmem:[#allocation76_spill] sm:$0xff] %v7680_v20  ;;  %v5581_v14 = vpop.eup %5580  ;;  %5600 = vpow2.f32 %v3655_v46  ;;  %v3086_v53 = vpop.xlane.xlu1 %3085  ;;  %v5180_v2 = vpack.c.bf16 %v5579_v52, %v7669_v63 }
 0x58f   : > { %v3781_v24 = vmul.f32 1.442695, %v3405_v44  ;;  %v3783_v47 = vmul.f32 1.442695, %v3406_v49  ;;  %5115 = vmatprep.subr.bf16.mxu1 %v5114_v4  ;;  %v7682_v26 = vpop.f32.mrb[147].mxu0  ;;  %v7685_v10 = vpop.eup %5582  ;;  %v3407_v62 = vsub.f32 %v8586_v39, %v3086_v53  ;;  %v3408_v25 = vsub.f32 %v8587_v15, %v3086_v53 }
 0x590   : > { %3241 = vmax.xlane.f32.xlu1 %v3240_v21  ;;  %8585 = vst [vmem:[#allocation71_spill] sm:$0xff] %v7682_v26  ;;  %5602 = vpow2.f32 %v3657_v36  ;;  %v3243_v46 = vmax.f32 %v7680_v20, %v7682_v26  ;;  %v2993_v28 = vpop.xlane.xlu0 %2992  ;;  %v5585_v27 = vpop.eup %5584  ;;  %5117 = vmatpush1.bf16.xpose.msra.mxu1 %v5116_v32  ;;  %v8588_v21 = vld [vmem:[#allocation102_spill] sm:$0xff]  ;;  %v5178_v52 = vpack.c.bf16 %v5581_v14, %v5577_v50 }
 0x591   : > { %3238 = vmax.xlane.f32.xlu0 %v3237_v48  ;;  %5604 = vpow2.f32 %v3659_v8  ;;  %v3345_v44 = vsub.f32 %v8588_v21, %v2993_v28  ;;  %v3346_v49 = vsub.f32 %v8589_v9, %v2993_v28  ;;  %v5587_v63 = vpop.eup %5586  ;;  %v3785_v36 = vmul.f32 1.442695, %v3407_v62  ;;  %v7693_v4 = vpop.f32.mrb[148].mxu0  ;;  %v8593_v62 = vld [vmem:[#allocation106_spill] sm:$0xff] }
 0x592   : > { %5606 = vpow2.f32 %v3781_v24  ;;  %v3787_v48 = vmul.f32 1.442695, %v3408_v25  ;;  %v5589_v39 = vpop.eup %5588  ;;  %5179 = vmatprep.subr.bf16.mxu0 %v5178_v52  ;;  %v8590_v8 = vmax.f32 %v7382_v5, %v7389_v33  ;;  %v2996_v32 = vpop.xlane.xlu1 %2995  ;;  %v5120_v50 = vpack.c.bf16 %v5587_v63, %v7685_v10  ;;  %v8594_v25 = vld [vmem:[#allocation108_spill] sm:$0xff]  ;;  %v8595_v52 = vld [vmem:[#allocation103_spill] sm:$0xff]  ;;  %v8596_v10 = vld [vmem:[#allocation105_spill] sm:$0xff] }
 0x593   : > { %5608 = vpow2.f32 %v3783_v47  ;;  %v3661_v53 = vmul.f32 1.442695, %v3345_v44  ;;  %v3663_v15 = vmul.f32 1.442695, %v3346_v49  ;;  %v7698_v21 = vpop.f32.mrb[149].mxu0  ;;  %v5591_v14 = vpop.eup %5590  ;;  %v8592_v24 = vmax.f32 %v7363_v23, %v7367_v54  ;;  %5181 = vmatpush1.bf16.xpose.msra.mxu0 %v5180_v2 }
 0x594   : > { %3151 = vmax.xlane.f32.xlu1 %v8590_v8  ;;  %8591 = vst [vmem:[#allocation73_spill] sm:$0xff] %v7698_v21  ;;  %5610 = vpow2.f32 %v3785_v36  ;;  %v3347_v47 = vsub.f32 %v8593_v62, %v2996_v32  ;;  %v3348_v28 = vsub.f32 %v8594_v25, %v2996_v32  ;;  %v3246_v44 = vmax.f32 %v7693_v4, %v7698_v21  ;;  %v3089_v9 = vpop.xlane.xlu0 %3088  ;;  %v5593_v49 = vpop.eup %5592 }
 0x595   : > { %3148 = vmax.xlane.f32.xlu0 %v8592_v24  ;;  %5612 = vpow2.f32 %v3787_v48  ;;  %v3409_v8 = vsub.f32 %v8595_v52, %v3089_v9  ;;  %v3410_v63 = vsub.f32 %v8596_v10, %v3089_v9  ;;  %v5118_v36 = vpack.c.bf16 %v5589_v39, %v5585_v27  ;;  %v5595_v26 = vpop.eup %5594  ;;  %v7710_v54 = vpop.f32.mrb[150].mxu0  ;;  %v8597_v27 = vld [vmem:[#allocation107_spill] sm:$0xff]  ;;  %v8600_v10 = vld [vmem:[#allocation112_spill] sm:$0xff] }
 0x596   : > { %5614 = vpow2.f32 %v3661_v53  ;;  %v3665_v20 = vmul.f32 1.442695, %v3347_v47  ;;  %v3667_v24 = vmul.f32 1.442695, %v3348_v28  ;;  %v5597_v62 = vpop.eup %5596  ;;  %v3092_v21 = vpop.xlane.xlu1 %3091  ;;  %v5184_v2 = vpack.c.bf16 %v5595_v26, %v5591_v14  ;;  %v8598_v53 = vld [vmem:[#allocation109_spill] sm:$0xff] }
 0x597   : > { %5616 = vpow2.f32 %v3663_v15  ;;  %v3789_v32 = vmul.f32 1.442695, %v3409_v8  ;;  %v3791_v25 = vmul.f32 1.442695, %v3410_v63  ;;  %5119 = vmatprep.subr.bf16.mxu1 %v5118_v36  ;;  %v7712_v48 = vpop.f32.mrb[151].mxu0  ;;  %v5599_v52 = vpop.eup %5598  ;;  %v3411_v39 = vsub.f32 %v8597_v27, %v3092_v21  ;;  %v8599_v8 = vld [vmem:[#allocation111_spill] sm:$0xff] }
 0x598   : > { %3247 = vmax.xlane.f32.xlu1 %v3246_v44  ;;  %5618 = vpow2.f32 %v3665_v20  ;;  %v3412_v47 = vsub.f32 %v8598_v53, %v3092_v21  ;;  %v3249_v28 = vmax.f32 %v7710_v54, %v7712_v48  ;;  %v3095_v9 = vpop.xlane.xlu0 %3094  ;;  %v5601_v15 = vpop.eup %5600  ;;  %5121 = vmatpush1.bf16.xpose.msra.mxu1 %v5120_v50  ;;  %v5182_v36 = vpack.c.bf16 %v5597_v62, %v5593_v49 }
 0x599   : > { %3244 = vmax.xlane.f32.xlu0 %v3243_v46  ;;  %5620 = vpow2.f32 %v3667_v24  ;;  %v3413_v44 = vsub.f32 %v8599_v8, %v3095_v9  ;;  %v3414_v63 = vsub.f32 %v8600_v10, %v3095_v9  ;;  %v3793_v20 = vmul.f32 1.442695, %v3411_v39  ;;  %v7720_v14 = vpop.f32.mrb[152].mxu0 }
 0x59a   : > { %v5603_v26 = vpop.eup %5602  ;;  %5622 = vpow2.f32 %v3789_v32  ;;  %v3795_v46 = vmul.f32 1.442695, %v3412_v47  ;;  %5183 = vmatprep.subr.bf16.mxu0 %v5182_v36  ;;  %v8601_v24 = vmax.f32 %v7416_v1, %v7423_v60  ;;  %v3098_v50 = vpop.xlane.xlu1 %3097  ;;  %v8602_v62 = vmax.f32 %v7399_v59, %v7403_v41  ;;  %v8603_v32 = vld [vmem:[#allocation113_spill] sm:$0xff] }
 0x59b   : > { %v5605_v27 = vpop.eup %5604  ;;  %5624 = vpow2.f32 %v3791_v25  ;;  %v3797_v21 = vmul.f32 1.442695, %v3413_v44  ;;  %v3799_v53 = vmul.f32 1.442695, %v3414_v63  ;;  %v7725_v8 = vpop.f32.mrb[153].mxu0  ;;  %v5124_v9 = vpack.c.bf16 %v5603_v26, %v5599_v52  ;;  %v8604_v25 = vld [vmem:[#allocation115_spill] sm:$0xff]  ;;  %5185 = vmatpush1.bf16.xpose.msra.mxu0 %v5184_v2 }
 0x59c   : > { %3157 = vmax.xlane.f32.xlu1 %v8601_v24  ;;  %v5607_v49 = vpop.eup %5606  ;;  %5626 = vpow2.f32 %v3793_v20  ;;  %v3415_v39 = vsub.f32 %v8603_v32, %v3098_v50  ;;  %v3416_v47 = vsub.f32 %v8604_v25, %v3098_v50  ;;  %v3252_v44 = vmax.f32 %v7720_v14, %v7725_v8  ;;  %v7734_v20 = vpop.f32.mrb[154].mxu0 }
 0x59d   : > { %3154 = vmax.xlane.f32.xlu0 %v8602_v62  ;;  %v5609_v10 = vpop.eup %5608  ;;  %5628 = vpow2.f32 %v3795_v46  ;;  %v5122_v63 = vpack.c.bf16 %v5605_v27, %v5601_v15  ;;  %v7736_v62 = vpop.f32.mrb[155].mxu0 }
 0x59e   : > { %v5611_v36 = vpop.eup %5610  ;;  %5630 = vpow2.f32 %v3797_v21  ;;  %v3801_v52 = vmul.f32 1.442695, %v3415_v39  ;;  %v3803_v26 = vmul.f32 1.442695, %v3416_v47  ;;  %v3255_v2 = vmax.f32 %v7734_v20, %v7736_v62  ;;  %v7740_v21 = vpop.f32.mrb[156].mxu0 }
 0x59f   : > { %v5613_v24 = vpop.eup %5612  ;;  %5632 = vpow2.f32 %v3799_v53  ;;  %5123 = vmatprep.subr.bf16.mxu1 %v5122_v63  ;;  %v5188_v50 = vpack.c.bf16 %v5611_v36, %v5607_v49  ;;  %v8605_v39 = vmax.f32 %v7454_v61, %v7458_v55  ;;  %v7745_v49 = vpop.f32.mrb[157].mxu0  ;;  %v8606_v47 = vmax.f32 %v7435_v42, %v7442_v57 }
 0x5a0   : > { %3253 = vmax.xlane.f32.xlu1 %v3252_v44  ;;  %v5615_v32 = vpop.eup %5614  ;;  %5634 = vpow2.f32 %v3801_v52  ;;  %v5186_v15 = vpack.c.bf16 %v5613_v24, %v5609_v10  ;;  %5125 = vmatpush1.bf16.xpose.msra.mxu1 %v5124_v9  ;;  %v3258_v9 = vmax.f32 %v7740_v21, %v7745_v49  ;;  %v7752_v36 = vpop.f32.mrb[158].mxu0 }
 0x5a1   : > { %3250 = vmax.xlane.f32.xlu0 %v3249_v28  ;;  %v5617_v46 = vpop.eup %5616  ;;  %5636 = vpow2.f32 %v3803_v26  ;;  %8607 = vst [vmem:[#allocation75_spill] sm:$0xff] %v7752_v36  ;;  %v7754_v26 = vpop.f32.mrb[159].mxu0 }
 0x5a2   : > { %v5619_v27 = vpop.eup %5618  ;;  %5187 = vmatprep.subr.bf16.mxu0 %v5186_v15  ;;  %8608 = vst [vmem:[#allocation77_spill] sm:$0xff] %v7754_v26  ;;  %v3261_v15 = vmax.f32 %v7752_v36, %v7754_v26  ;;  %v8614_v26 = vld [vmem:[#allocation110_spill] sm:$0xff] }
 0x5a3   : > { %v5621_v53 = vpop.eup %5620  ;;  %v5128_v25 = vpack.c.bf16 %v5619_v27, %v5615_v32  ;;  %5189 = vmatpush1.bf16.xpose.msra.mxu0 %v5188_v50  ;;  %v7758_v50 = vpop.f32.mrb[160].mxu0 }
 0x5a4   : > { %3163 = vmax.xlane.f32.xlu1 %v8605_v39  ;;  %v5623_v28 = vpop.eup %5622  ;;  %v5126_v44 = vpack.c.bf16 %v5621_v53, %v5617_v46 }
 0x5a5   : > { %3160 = vmax.xlane.f32.xlu0 %v8606_v47  ;;  %v5625_v10 = vpop.eup %5624  ;;  %v8609_v47 = vmax.f32 %v7494_v0, %v7501_v38 }
 0x5a6   : > { %v5627_v63 = vpop.eup %5626  ;;  %5127 = vmatprep.subr.bf16.mxu1 %v5126_v44 }
 0x5a7   : > { %v5629_v52 = vpop.eup %5628  ;;  %v5192_v24 = vpack.c.bf16 %v5627_v63, %v5623_v28  ;;  %v8612_v63 = vld [vmem:[#allocation9_spill] sm:$0xff] }
 0x5a8   : > { %3259 = vmax.xlane.f32.xlu1 %v3258_v9  ;;  %v5631_v32 = vpop.eup %5630  ;;  %v5190_v27 = vpack.c.bf16 %v5629_v52, %v5625_v10  ;;  %5129 = vmatpush1.bf16.xpose.msra.mxu1 %v5128_v25  ;;  %v7763_v9 = vpop.f32.mrb[161].mxu0  ;;  %v8611_v10 = vld [vmem:[#allocation18_spill] sm:$0xff] }
 0x5a9   : > { %3256 = vmax.xlane.f32.xlu0 %v3255_v2  ;;  %v5633_v39 = vpop.eup %5632  ;;  %v8610_v2 = vmax.f32 %v7470_v45, %v7480_v43  ;;  %v3264_v44 = vmax.f32 %v7758_v50, %v7763_v9  ;;  %v1162_v52 = vadd.f32 %v8612_v63, %v8611_v10  ;;  %v8621_v63 = vld [vmem:[#allocation15_spill] sm:$0xff] }
 0x5aa   : > { %v5635_v46 = vpop.eup %5634  ;;  %5191 = vmatprep.subr.bf16.mxu0 %v5190_v27  ;;  %v7772_v27 = vpop.f32.mrb[162].mxu0 }
 0x5ab   : > { %v5637_v53 = vpop.eup %5636  ;;  %v5196_v28 = vpack.c.bf16 %v5635_v46, %v5631_v32  ;;  %5193 = vmatpush1.bf16.xpose.msra.mxu0 %v5192_v24  ;;  %8613 = vst [vmem:[#allocation78_spill] sm:$0xff] %v7772_v27  ;;  %v7776_v32 = vpop.f32.mrb[163].mxu0  ;;  %v8617_v24 = vld [vmem:[#allocation14_spill] sm:$0xff] }
 0x5ac   : > { %3169 = vmax.xlane.f32.xlu1 %v8609_v47  ;;  %v5194_v25 = vpack.c.bf16 %v5637_v53, %v5633_v39  ;;  %v8615_v47 = vld [vmem:[#allocation11_spill] sm:$0xff]  ;;  %8616 = vst [vmem:[#allocation80_spill] sm:$0xff] %v7776_v32  ;;  %v3267_v46 = vmax.f32 %v7772_v27, %v7776_v32  ;;  %v8618_v39 = vld [vmem:[#allocation2_spill] sm:$0xff]  ;;  %v7784_v10 = vpop.f32.mrb[164].mxu0  ;;  %v8625_v32 = vld [vmem:[#allocation16_spill] sm:$0xff] }
 0x5ad   : > { %3166 = vmax.xlane.f32.xlu0 %v8610_v2  ;;  %v1170_v36 = vadd.f32 %v8615_v47, %v8614_v26  ;;  %v1180_v53 = vadd.f32 %v8618_v39, %v8617_v24  ;;  %v8619_v2 = vld [vmem:[#allocation10_spill] sm:$0xff]  ;;  %8620 = vst [vmem:[#allocation82_spill] sm:$0xff] %v7784_v10  ;;  %v8622_v47 = vld [vmem:[#allocation13_spill] sm:$0xff]  ;;  %v8628_v39 = vld [vmem:[#allocation3_spill] sm:$0xff] }
 0x5ae   : > { %5195 = vmatprep.subr.bf16.mxu1 %v5194_v25  ;;  %v1168_v25 = vadd.f32 %v8619_v2, %v8614_v26  ;;  %v8627_v26 = vmax.f32 %v7516_v34, %v7520_v40  ;;  %v1186_v2 = vadd.f32 %v8628_v39, %v8625_v32 }
 0x5af   : > { %4118 = vmatmul.mubr.f32.vlgmr.msra.gmra.mrb[154].mxu1 %v1162_v52  ;;  %v8623_v52 = vmax.f32 %v7535_v31, %v7545_v12 }
 0x5b0   : > { %3265 = vmax.xlane.f32.xlu1 %v3264_v44  ;;  %4123 = vmatprep.mubr.f32.mxu1 %v1170_v36  ;;  %v1176_v44 = vadd.f32 %v8622_v47, %v8621_v63  ;;  %v8626_v36 = vld [vmem:[#allocation4_spill] sm:$0xff] }
 0x5b1   : > { %3262 = vmax.xlane.f32.xlu0 %v3261_v15  ;;  %5197 = vmatpush1.bf16.xpose.msra.mxu1 %v5196_v28  ;;  %v7791_v15 = vpop.f32.mrb[165].mxu0  ;;  %v1188_v28 = vadd.f32 %v8626_v36, %v8625_v32  ;;  %v8629_v47 = vld [vmem:[#allocation12_spill] sm:$0xff]  ;;  %v8631_v36 = vld [vmem:[#allocation114_spill] sm:$0xff] }
 0x5b2   : > { %8624 = vst [vmem:[#allocation84_spill] sm:$0xff] %v7791_v15  ;;  %4201 = vmatmul.mubr.f32.vlgmr.msra.gmra.mrb[174].mxu0 %v1180_v53  ;;  %v3270_v24 = vmax.f32 %v7784_v10, %v7791_v15  ;;  %v7804_v27 = vpop.f32.mrb[166].mxu0  ;;  %v8634_v15 = vld [vmem:[#allocation17_spill] sm:$0xff]  ;;  %v8635_v10 = vld [vmem:[#allocation8_spill] sm:$0xff] }
 0x5b3   : > { %4124 = vmatmul.mubr.f32.gmra.mrb[156].mxu1 %v1168_v25  ;;  %4206 = vmatprep.mubr.f32.mxu0 %v1188_v28  ;;  %8630 = vst [vmem:[#allocation79_spill] sm:$0xff] %v7804_v27  ;;  %v8632_v25 = vld [vmem:[#allocation6_spill] sm:$0xff]  ;;  %v7808_v12 = vpop.f32.mrb[167].mxu0  ;;  %v1200_v40 = vadd.f32 %v8635_v10, %v8634_v15  ;;  %v8646_v15 = vld [vmem:[#allocation116_spill] sm:$0xff] }
 0x5b4   : > { %3175 = vmax.xlane.f32.xlu1 %v8623_v52  ;;  %4129 = vmatprep.mubr.f32.mxu1 %v1176_v44  ;;  %v1174_v52 = vadd.f32 %v8629_v47, %v8621_v63  ;;  %v1194_v53 = vadd.f32 %v8632_v25, %v8631_v36  ;;  %8633 = vst [vmem:[#allocation81_spill] sm:$0xff] %v7808_v12  ;;  %v8636_v63 = vld [vmem:[#allocation5_spill] sm:$0xff]  ;;  %v7816_v28 = vpop.f32.mrb[168].mxu0 }
 0x5b5   : > { %3172 = vmax.xlane.f32.xlu0 %v8627_v26  ;;  %v3273_v32 = vmax.f32 %v7804_v27, %v7808_v12  ;;  %v1192_v44 = vadd.f32 %v8636_v63, %v8631_v36  ;;  %8637 = vst [vmem:[#allocation83_spill] sm:$0xff] %v7816_v28  ;;  %v7821_v26 = vpop.f32.mrb[169].mxu0 }
 0x5b6   : > { %4207 = vmatmul.mubr.f32.gmra.mrb[176].mxu0 %v1186_v2  ;;  %8639 = vst [vmem:[#allocation85_spill] sm:$0xff] %v7821_v26  ;;  %v3276_v10 = vmax.f32 %v7816_v28, %v7821_v26  ;;  %v7828_v39 = vpop.f32.mrb[170].mxu0 }
 0x5b7   : > { %4130 = vmatmul.mubr.f32.gmra.mrb[158].mxu1 %v1174_v52  ;;  %4212 = vmatprep.mubr.f32.mxu0 %v1194_v53  ;;  %8641 = vst [vmem:[#allocation86_spill] sm:$0xff] %v7828_v39  ;;  %v8643_v52 = vmax.f32 %v7623_v16, %v7633_v3  ;;  %v8645_v53 = vmax.f32 %v7604_v56, %v7608_v11  ;;  %v771_v56 = vld [vmem:[%s8131_s3 + $0xc0] sm:$0xff] }
 0x5b8   : > { %3271 = vmax.xlane.f32.xlu1 %v3270_v24  ;;  %4283 = vmatprep.mubr.f32.mxu1 %v1200_v40  ;;  %v8638_v24 = vmax.f32 %v7579_v13, %v7589_v19  ;;  %v7830_v40 = vpop.f32.mrb[171].mxu0 }
 0x5b9   : > { %3268 = vmax.xlane.f32.xlu0 %v3267_v46  ;;  %v8640_v46 = vmax.f32 %v7560_v18, %v7564_v37  ;;  %8642 = vst [vmem:[#allocation88_spill] sm:$0xff] %v7830_v40  ;;  %v3279_v2 = vmax.f32 %v7828_v39, %v7830_v40  ;;  %v7834_v47 = vpop.f32.mrb[172].mxu0 }
 0x5ba   : > { %4213 = vmatmul.mubr.f32.gmra.mrb[178].mxu0 %v1192_v44  ;;  %v7839_v36 = vpop.f32.mrb[173].mxu0 }
 0x5bb   : > { %8644 = vst [vmem:[#allocation90_spill] sm:$0xff] %v7839_v36 }
 0x5bc   : > { %3181 = vmax.xlane.f32.xlu1 %v8638_v24 }
 0x5bd   : > { %3178 = vmax.xlane.f32.xlu0 %v8640_v46 }
 0x5c0   : > { %3277 = vmax.xlane.f32.xlu1 %v3276_v10 }
 0x5c1   : > { %3274 = vmax.xlane.f32.xlu0 %v3273_v32  ;;  %v772_v32 = vld [vmem:[%s8131_s3 + $0xc8] sm:$0xff] }
 0x5c4   : > { %3187 = vmax.xlane.f32.xlu1 %v8643_v52 }
 0x5c5   : > { %3184 = vmax.xlane.f32.xlu0 %v8645_v53 }
 0x5c9   : > { %3280 = vmax.xlane.f32.xlu0 %v3279_v2  ;;  %v770_v2 = vld [vmem:[%s8131_s3 + $0xb8] sm:$0xff] }
 0x5cc   : > { %v3191_v63 = vpop.xlane.xlu0 %3190 }
 0x5cd   : > { %v3477_v44 = vsub.f32 %v7333_v35, %v3191_v63  ;;  %v3478_v24 = vsub.f32 %v7341_v58, %v3191_v63  ;;  %v8647_v35 = vld [vmem:[#allocation117_spill] sm:$0xff] }
 0x5cf   : > { %v3194_v10 = vpop.xlane.xlu1 %3193  ;;  %v3925_v46 = vmul.f32 1.442695, %v3477_v44  ;;  %v3927_v52 = vmul.f32 1.442695, %v3478_v24 }
 0x5d0   : > { %v3479_v25 = vsub.f32 %v7349_v17, %v3194_v10  ;;  %v3480_v40 = vsub.f32 %v7353_v51, %v3194_v10  ;;  %v8648_v17 = vld [vmem:[#allocation118_spill] sm:$0xff]  ;;  %v8649_v51 = vld [vmem:[#allocation119_spill] sm:$0xff] }
 0x5d1   : > { %5638 = vpow2.f32 %v3925_v46 }
 0x5d2   : > { %v3101_v53 = vpop.xlane.xlu0 %3100  ;;  %v3929_v39 = vmul.f32 1.442695, %v3479_v25  ;;  %5640 = vpow2.f32 %v3927_v52  ;;  %v8650_v52 = vld [vmem:[#allocation33_spill] sm:$0xff] }
 0x5d3   : > { %v3417_v11 = vsub.f32 %v8646_v15, %v3101_v53  ;;  %v3418_v58 = vsub.f32 %v8647_v35, %v3101_v53 }
 0x5d4   : > { %v3104_v63 = vpop.xlane.xlu1 %3103  ;;  %5642 = vpow2.f32 %v3929_v39 }
 0x5d5   : > { %902 = vperm.xlu1 %5356, %v772_v32   ;;  %v3931_v32 = vmul.f32 1.442695, %v3480_v40  ;;  %v3805_v44 = vmul.f32 1.442695, %v3417_v11  ;;  %v3419_v24 = vsub.f32 %v8648_v17, %v3104_v63  ;;  %v3420_v10 = vsub.f32 %v8649_v51, %v3104_v63  ;;  %v774_v63 = vld [vmem:[%s8131_s3 + $0xd8] sm:$0xff] }
 0x5d6   : > { %v3807_v25 = vmul.f32 1.442695, %v3418_v58  ;;  %v3197_v40 = vpop.xlane.xlu0 %3196  ;;  %v8652_v58 = vld [vmem:[#allocation38_spill] sm:$0xff] }
 0x5d7   : > { %5644 = vpow2.f32 %v3931_v32  ;;  %v3809_v15 = vmul.f32 1.442695, %v3419_v24  ;;  %v3811_v46 = vmul.f32 1.442695, %v3420_v10  ;;  %v3481_v53 = vsub.f32 %v8650_v52, %v3197_v40  ;;  %v8654_v10 = vld [vmem:[#allocation120_spill] sm:$0xff] }
 0x5d8   : > { %5646 = vpow2.f32 %v3805_v44  ;;  %v8653_v44 = vld [vmem:[#allocation40_spill] sm:$0xff] }
 0x5d9   : > { %5648 = vpow2.f32 %v3807_v25  ;;  %v3933_v11 = vmul.f32 1.442695, %v3481_v53  ;;  %v3200_v35 = vpop.xlane.xlu1 %3199 }
 0x5da   : > { %5650 = vpow2.f32 %v3809_v15  ;;  %v3483_v17 = vsub.f32 %v8652_v58, %v3200_v35  ;;  %v3484_v24 = vsub.f32 %v8653_v44, %v3200_v35  ;;  %v3107_v51 = vpop.xlane.xlu0 %3106  ;;  %v8656_v35 = vld [vmem:[#allocation122_spill] sm:$0xff]  ;;  %v8657_v44 = vld [vmem:[#allocation123_spill] sm:$0xff] }
 0x5db   : > { %5652 = vpow2.f32 %v3811_v46  ;;  %v3421_v52 = vsub.f32 %v8654_v10, %v3107_v51  ;;  %v5639_v53 = vpop.eup %5638  ;;  %v4450_v46 = vld [vmem:[%s8133_s5 + $0x8] sm:$0xff] }
 0x5dc   : > { %5654 = vpow2.f32 %v3933_v11  ;;  %v3937_v25 = vmul.f32 1.442695, %v3483_v17 }
 0x5de   : > { %v3203_v11 = vpop.xlane.xlu0 %3202 }
 0x5df   : > { %892 = vperm.xlu0 %5357, %v770_v2   ;;  %v8651_v2 = vld [vmem:[#allocation36_spill] sm:$0xff]  ;;  %v3110_v3 = vpop.xlane.xlu1 %3109 }
 0x5e0   : > { %v3482_v39 = vsub.f32 %v8651_v2, %v3197_v40  ;;  %v3939_v40 = vmul.f32 1.442695, %v3484_v24  ;;  %v3813_v2 = vmul.f32 1.442695, %v3421_v52  ;;  %v3423_v58 = vsub.f32 %v8656_v35, %v3110_v3  ;;  %v8658_v24 = vld [vmem:[#allocation42_spill] sm:$0xff] }
 0x5e1   : > { %v3424_v10 = vsub.f32 %v8657_v44, %v3110_v3  ;;  %v4452_v3 = vld [vmem:[%s8133_s5 + $0x18] sm:$0xff] }
 0x5e2   : > { %v3935_v32 = vmul.f32 1.442695, %v3482_v39  ;;  %v5641_v39 = vpop.eup %5640  ;;  %v3817_v16 = vmul.f32 1.442695, %v3423_v58 }
 0x5e3   : > { %897 = vperm.xlu0 %5357, %v771_v56   ;;  %v8655_v56 = vld [vmem:[#allocation121_spill] sm:$0xff]  ;;  %v5643_v17 = vpop.eup %5642  ;;  %v3819_v12 = vmul.f32 1.442695, %v3424_v10 }
 0x5e4   : > { %v3422_v15 = vsub.f32 %v8655_v56, %v3107_v51  ;;  %5656 = vpow2.f32 %v3935_v32  ;;  %v3485_v51 = vsub.f32 %v8658_v24, %v3203_v11  ;;  %v5645_v32 = vpop.eup %5644  ;;  %v5260_v27 = vpack.c.bf16 %v5643_v17, %v5639_v53  ;;  %v8660_v24 = vld [vmem:[#allocation124_spill] sm:$0xff] }
 0x5e5   : > { %5658 = vpow2.f32 %v3937_v25  ;;  %v5647_v26 = vpop.eup %5646  ;;  %v3113_v25 = vpop.xlane.xlu1 %3112  ;;  %v5258_v35 = vpack.c.bf16 %v5645_v32, %v5641_v39 }
 0x5e6   : > { %5660 = vpow2.f32 %v3939_v40  ;;  %v3815_v52 = vmul.f32 1.442695, %v3422_v15  ;;  %v5649_v44 = vpop.eup %5648  ;;  %v3941_v40 = vmul.f32 1.442695, %v3485_v51  ;;  %v3425_v28 = vsub.f32 %v8660_v24, %v3113_v25  ;;  %v8664_v24 = vld [vmem:[#allocation43_spill] sm:$0xff] }
 0x5e7   : > { %912 = vperm.xlu0 %5357, %v774_v63   ;;  %v8659_v63 = vld [vmem:[#allocation37_spill] sm:$0xff]  ;;  %5662 = vpow2.f32 %v3813_v2  ;;  %v5651_v15 = vpop.eup %5650  ;;  %5259 = vmatprep.subr.bf16.mxu0 %v5258_v35  ;;  %v3209_v39 = vpop.xlane.xlu0 %3208 }
 0x5e8   : > { %v3486_v56 = vsub.f32 %v8659_v63, %v3203_v11  ;;  %5664 = vpow2.f32 %v3817_v16  ;;  %v8661_v11 = vld [vmem:[#allocation125_spill] sm:$0xff]  ;;  %v5653_v53 = vpop.eup %5652  ;;  %v3821_v2 = vmul.f32 1.442695, %v3425_v28  ;;  %5261 = vmatpush1.bf16.xpose.msra.mxu0 %v5260_v27  ;;  %v4454_v16 = vld [vmem:[%s8133_s5 + $0x28] sm:$0xff]  ;;  %v8665_v27 = vld [vmem:[#allocation44_spill] sm:$0xff] }
 0x5e9   : > { %v3426_v63 = vsub.f32 %v8661_v11, %v3113_v25  ;;  %5666 = vpow2.f32 %v3819_v12  ;;  %v3206_v17 = vpop.xlane.xlu1 %3205  ;;  %v5198_v51 = vpack.c.bf16 %v5653_v53, %v5649_v44  ;;  %v5655_v32 = vpop.eup %5654  ;;  %v8662_v25 = vld [vmem:[#allocation39_spill] sm:$0xff] }
 0x5ea   : > { %v3943_v58 = vmul.f32 1.442695, %v3486_v56  ;;  %5668 = vpow2.f32 %v3815_v52  ;;  %v3487_v12 = vsub.f32 %v8662_v25, %v3206_v17  ;;  %v8663_v56 = vld [vmem:[#allocation41_spill] sm:$0xff]  ;;  %v3489_v52 = vsub.f32 %v8664_v24, %v3209_v39 }
 0x5eb   : > { %4464 = vperm.xlu0 %5357, %v4450_v46   ;;  %v5200_v46 = vpack.c.bf16 %v5651_v15, %v5647_v26  ;;  %v3823_v10 = vmul.f32 1.442695, %v3426_v63  ;;  %5670 = vpow2.f32 %v3941_v40  ;;  %v3488_v35 = vsub.f32 %v8663_v56, %v3206_v17  ;;  %5199 = vmatprep.subr.bf16.mxu1 %v5198_v51  ;;  %v3119_v25 = vpop.xlane.xlu0 %3118  ;;  %v4456_v17 = vld [vmem:[%s8133_s5 + $0x38] sm:$0xff]  ;;  %v8667_v56 = vld [vmem:[#allocation127_spill] sm:$0xff] }
 0x5ec   : > { %5672 = vpow2.f32 %v3943_v58  ;;  %v3490_v26 = vsub.f32 %v8665_v27, %v3209_v39  ;;  %v3945_v11 = vmul.f32 1.442695, %v3487_v12  ;;  %v3949_v15 = vmul.f32 1.442695, %v3489_v52  ;;  %v8666_v39 = vld [vmem:[#allocation126_spill] sm:$0xff]  ;;  %v8668_v12 = vld [vmem:[#allocation128_spill] sm:$0xff] }
 0x5ed   : > { %5674 = vpow2.f32 %v3821_v2  ;;  %v3947_v63 = vmul.f32 1.442695, %v3488_v35  ;;  %5201 = vmatpush1.bf16.xpose.msra.mxu1 %v5200_v46  ;;  %v3116_v53 = vpop.xlane.xlu1 %3115  ;;  %v3429_v35 = vsub.f32 %v8668_v12, %v3119_v25  ;;  %v8669_v46 = vld [vmem:[#allocation129_spill] sm:$0xff] }
 0x5ee   : > { %v5657_v28 = vpop.eup %5656  ;;  %5676 = vpow2.f32 %v3823_v10  ;;  %v3951_v40 = vmul.f32 1.442695, %v3490_v26  ;;  %v3427_v51 = vsub.f32 %v8666_v39, %v3116_v53  ;;  %v3428_v2 = vsub.f32 %v8667_v56, %v3116_v53 }
 0x5ef   : > { %4474 = vperm.xlu0 %5357, %v4452_v3   ;;  %v5659_v3 = vpop.eup %5658  ;;  %5678 = vpow2.f32 %v3945_v11  ;;  %v3829_v37 = vmul.f32 1.442695, %v3429_v35  ;;  %v8670_v11 = vmax.f32 %v7834_v47, %v7839_v36 }
 0x5f0   : > { %v5661_v44 = vpop.eup %5660  ;;  %v5264_v58 = vpack.c.bf16 %v5659_v3, %v5655_v32  ;;  %5680 = vpow2.f32 %v3947_v63  ;;  %v3825_v27 = vmul.f32 1.442695, %v3427_v51  ;;  %v3827_v26 = vmul.f32 1.442695, %v3428_v2  ;;  %v8673_v51 = vld [vmem:[#allocation130_spill] sm:$0xff] }
 0x5f1   : > { %v5663_v24 = vpop.eup %5662  ;;  %v5262_v10 = vpack.c.bf16 %v5661_v44, %v5657_v28  ;;  %5682 = vpow2.f32 %v3949_v15  ;;  %v3212_v3 = vpop.xlane.xlu1 %3211  ;;  %v8671_v28 = vld [vmem:[#allocation45_spill] sm:$0xff]  ;;  %v8672_v44 = vld [vmem:[#allocation46_spill] sm:$0xff] }
 0x5f2   : > { %v5665_v52 = vpop.eup %5664  ;;  %5684 = vpow2.f32 %v3951_v40  ;;  %v3122_v53 = vpop.xlane.xlu0 %3121  ;;  %v3491_v15 = vsub.f32 %v8671_v28, %v3212_v3  ;;  %v8674_v40 = vld [vmem:[#allocation131_spill] sm:$0xff]  ;;  %v8678_v28 = vld [vmem:[#allocation48_spill] sm:$0xff] }
 0x5f3   : > { %4484 = vperm.xlu0 %5357, %v4454_v16   ;;  %v3430_v16 = vsub.f32 %v8669_v46, %v3119_v25  ;;  %v5667_v18 = vpop.eup %5666  ;;  %5263 = vmatprep.subr.bf16.mxu0 %v5262_v10  ;;  %v5204_v63 = vpack.c.bf16 %v5665_v52, %v5663_v24  ;;  %5686 = vpow2.f32 %v3825_v27  ;;  %v3492_v25 = vsub.f32 %v8672_v44, %v3212_v3  ;;  %v8675_v3 = vld [vmem:[#allocation50_spill] sm:$0xff] }
 0x5f4   : > { %v5669_v39 = vpop.eup %5668  ;;  %5265 = vmatpush1.bf16.xpose.msra.mxu0 %v5264_v58  ;;  %5688 = vpow2.f32 %v3827_v26  ;;  %v3432_v56 = vsub.f32 %v8674_v40, %v3122_v53  ;;  %v3953_v35 = vmul.f32 1.442695, %v3491_v15 }
 0x5f5   : > { %v3831_v32 = vmul.f32 1.442695, %v3430_v16  ;;  %v5202_v2 = vpack.c.bf16 %v5667_v18, %v5669_v39  ;;  %v5671_v12 = vpop.eup %5670  ;;  %5690 = vpow2.f32 %v3829_v37  ;;  %v3955_v46 = vmul.f32 1.442695, %v3492_v25  ;;  %v3218_v58 = vpop.xlane.xlu1 %3217  ;;  %v8677_v18 = vld [vmem:[#allocation47_spill] sm:$0xff] }
 0x5f6   : > { %v5673_v10 = vpop.eup %5672  ;;  %v3835_v24 = vmul.f32 1.442695, %v3432_v56  ;;  %v3215_v52 = vpop.xlane.xlu0 %3214  ;;  %v3495_v26 = vsub.f32 %v8675_v3, %v3218_v58 }
 0x5f7   : > { %4494 = vperm.xlu0 %5357, %v4456_v17   ;;  %v3431_v17 = vsub.f32 %v8673_v51, %v3122_v53  ;;  %5692 = vpow2.f32 %v3831_v32  ;;  %5203 = vmatprep.subr.bf16.mxu1 %v5202_v2  ;;  %v7905_v27 = vpop.eup %5674  ;;  %v3493_v39 = vsub.f32 %v8677_v18, %v3215_v52  ;;  %v3494_v15 = vsub.f32 %v8678_v28, %v3215_v52  ;;  %v8681_v18 = vld [vmem:[#allocation132_spill] sm:$0xff] }
 0x5f8   : > { %5694 = vpow2.f32 %v3953_v35  ;;  %5205 = vmatpush1.bf16.xpose.msra.mxu1 %v5204_v63  ;;  %v5677_v37 = vpop.eup %5676  ;;  %v3961_v32 = vmul.f32 1.442695, %v3495_v26 }
 0x5f9   : > { %3283 = vmax.xlane.f32.xlu1 %v8670_v11  ;;  %v3833_v16 = vmul.f32 1.442695, %v3431_v17  ;;  %v8676_v11 = vld [vmem:[#allocation53_spill] sm:$0xff]  ;;  %5696 = vpow2.f32 %v3955_v46  ;;  %v5679_v44 = vpop.eup %5678  ;;  %v3957_v51 = vmul.f32 1.442695, %v3493_v39 }
 0x5fa   : > { %v3496_v53 = vsub.f32 %v8676_v11, %v3218_v58  ;;  %v5681_v17 = vpop.eup %5680  ;;  %v3959_v40 = vmul.f32 1.442695, %v3494_v15  ;;  %v3128_v56 = vpop.xlane.xlu1 %3127  ;;  %v5268_v2 = vpack.c.bf16 %v5679_v44, %v5671_v12  ;;  %v8679_v58 = vld [vmem:[#allocation134_spill] sm:$0xff]  ;;  %v8680_v11 = vld [vmem:[#allocation135_spill] sm:$0xff] }
 0x5fb   : > { %5698 = vpow2.f32 %v3833_v16  ;;  %v7911_v35 = vpop.eup %5682  ;;  %v3435_v3 = vsub.f32 %v8679_v58, %v3128_v56  ;;  %v3436_v46 = vsub.f32 %v8680_v11, %v3128_v56  ;;  %v8682_v16 = vld [vmem:[#allocation133_spill] sm:$0xff] }
 0x5fc   : > { %v3963_v25 = vmul.f32 1.442695, %v3496_v53  ;;  %5700 = vpow2.f32 %v3835_v24  ;;  %v3125_v63 = vpop.xlane.xlu0 %3124  ;;  %v5685_v28 = vpop.eup %5684  ;;  %v5266_v53 = vpack.c.bf16 %v5681_v17, %v5673_v10  ;;  %v8684_v10 = vld [vmem:[#allocation56_spill] sm:$0xff] }
 0x5fd   : > { %5702 = vpow2.f32 %v3961_v32  ;;  %v3433_v52 = vsub.f32 %v8681_v18, %v3125_v63  ;;  %v3434_v26 = vsub.f32 %v8682_v16, %v3125_v63  ;;  %v5687_v39 = vpop.eup %5686  ;;  %v3841_v24 = vmul.f32 1.442695, %v3435_v3  ;;  %v8686_v18 = vld [vmem:[#allocation52_spill] sm:$0xff] }
 0x5fe   : > { %5704 = vpow2.f32 %v3963_v25  ;;  %v3843_v15 = vmul.f32 1.442695, %v3436_v46  ;;  %v5689_v12 = vpop.eup %5688  ;;  %5267 = vmatprep.subr.bf16.mxu0 %v5266_v53  ;;  %v5208_v56 = vpack.c.bf16 %v5687_v39, %v7905_v27  ;;  %v8683_v25 = vld [vmem:[#allocation54_spill] sm:$0xff]  ;;  %v773_v16 = vld [vmem:[%s8131_s3 + $0xd0] sm:$0xff] }
 0x5ff   : > { %5706 = vpow2.f32 %v3957_v51  ;;  %v3837_v36 = vmul.f32 1.442695, %v3433_v52  ;;  %v3839_v44 = vmul.f32 1.442695, %v3434_v26  ;;  %v3224_v32 = vpop.xlane.xlu1 %3223  ;;  %v7918_v11 = vpop.eup %5690  ;;  %5269 = vmatpush1.bf16.xpose.msra.mxu0 %v5268_v2  ;;  %v8685_v51 = vld [vmem:[#allocation49_spill] sm:$0xff]  ;;  %v5206_v52 = vpack.c.bf16 %v5689_v12, %v5677_v37  ;;  %v8687_v37 = vld [vmem:[#allocation138_spill] sm:$0xff] }
 0x600   : > { %5708 = vpow2.f32 %v3959_v40  ;;  %v3221_v58 = vpop.xlane.xlu0 %3220  ;;  %v3499_v63 = vsub.f32 %v8683_v25, %v3224_v32  ;;  %v3500_v17 = vsub.f32 %v8684_v10, %v3224_v32 }
 0x601   : > { %5710 = vpow2.f32 %v3841_v24  ;;  %v3497_v3 = vsub.f32 %v8685_v51, %v3221_v58  ;;  %v5693_v46 = vpop.eup %5692  ;;  %v3498_v40 = vsub.f32 %v8686_v18, %v3221_v58  ;;  %5207 = vmatprep.subr.bf16.mxu1 %v5206_v52  ;;  %v8688_v58 = vld [vmem:[#allocation139_spill] sm:$0xff]  ;;  %v8689_v18 = vld [vmem:[#allocation136_spill] sm:$0xff] }
 0x602   : > { %5712 = vpow2.f32 %v3843_v15  ;;  %v5695_v27 = vpop.eup %5694  ;;  %v3969_v26 = vmul.f32 1.442695, %v3499_v63  ;;  %v3971_v53 = vmul.f32 1.442695, %v3500_v17  ;;  %5209 = vmatpush1.bf16.xpose.msra.mxu1 %v5208_v56  ;;  %v8690_v17 = vld [vmem:[#allocation137_spill] sm:$0xff] }
 0x603   : > { %5714 = vpow2.f32 %v3837_v36  ;;  %v3965_v2 = vmul.f32 1.442695, %v3497_v3  ;;  %v5697_v39 = vpop.eup %5696  ;;  %v3967_v24 = vmul.f32 1.442695, %v3498_v40  ;;  %v5272_v15 = vpack.c.bf16 %v5695_v27, %v7911_v35  ;;  %v4449_v40 = vld [vmem:[%s8133_s5] sm:$0xff] }
 0x604   : > { %5716 = vpow2.f32 %v3839_v44  ;;  %v3134_v32 = vpop.xlane.xlu1 %3133  ;;  %v5270_v3 = vpack.c.bf16 %v5697_v39, %v5685_v28  ;;  %v8691_v28 = vld [vmem:[#allocation61_spill] sm:$0xff] }
 0x605   : > { %v5699_v10 = vpop.eup %5698  ;;  %5718 = vpow2.f32 %v3969_v26  ;;  %v3439_v12 = vsub.f32 %v8687_v37, %v3134_v32  ;;  %v3440_v51 = vsub.f32 %v8688_v58, %v3134_v32 }
 0x606   : > { %v3131_v25 = vpop.xlane.xlu0 %3130  ;;  %v5701_v63 = vpop.eup %5700  ;;  %5720 = vpow2.f32 %v3971_v53  ;;  %v5212_v35 = vpack.c.bf16 %v5699_v10, %v7918_v11  ;;  %5271 = vmatprep.subr.bf16.mxu0 %v5270_v3  ;;  %v8693_v11 = vld [vmem:[#allocation57_spill] sm:$0xff] }
 0x607   : > { %v3437_v36 = vsub.f32 %v8689_v18, %v3131_v25  ;;  %v3438_v44 = vsub.f32 %v8690_v17, %v3131_v25  ;;  %v5703_v52 = vpop.eup %5702  ;;  %5722 = vpow2.f32 %v3965_v2  ;;  %v3849_v56 = vmul.f32 1.442695, %v3439_v12  ;;  %5273 = vmatpush1.bf16.xpose.msra.mxu0 %v5272_v15  ;;  %v8692_v18 = vld [vmem:[#allocation62_spill] sm:$0xff]  ;;  %v8694_v12 = vld [vmem:[#allocation60_spill] sm:$0xff] }
 0x608   : > { %v3851_v27 = vmul.f32 1.442695, %v3440_v51  ;;  %v5705_v32 = vpop.eup %5704  ;;  %5724 = vpow2.f32 %v3967_v24 }
 0x609   : > { %v3845_v26 = vmul.f32 1.442695, %v3437_v36  ;;  %v3847_v37 = vmul.f32 1.442695, %v3438_v44  ;;  %v3230_v53 = vpop.xlane.xlu1 %3229  ;;  %v5707_v25 = vpop.eup %5706  ;;  %5726 = vpow2.f32 %v3849_v56 }
 0x60a   : > { %907 = vperm.xlu1 %5356, %v773_v16   ;;  %v5210_v16 = vpack.c.bf16 %v5701_v63, %v5693_v46  ;;  %v3227_v58 = vpop.xlane.xlu0 %3226  ;;  %v3503_v39 = vsub.f32 %v8691_v28, %v3230_v53  ;;  %v3504_v17 = vsub.f32 %v8692_v18, %v3230_v53  ;;  %v5709_v2 = vpop.eup %5708  ;;  %5728 = vpow2.f32 %v3851_v27  ;;  %v4451_v46 = vld [vmem:[%s8133_s5 + $0x10] sm:$0xff]  ;;  %v8696_v18 = vld [vmem:[#allocation35_spill] sm:$0xff] }
 0x60b   : > { %v3501_v10 = vsub.f32 %v8693_v11, %v3227_v58  ;;  %v3502_v24 = vsub.f32 %v8694_v12, %v3227_v58  ;;  %v5276_v51 = vpack.c.bf16 %v5703_v52, %v5707_v25  ;;  %v5711_v36 = vpop.eup %5710  ;;  %5730 = vpow2.f32 %v3845_v26  ;;  %v8697_v12 = vld [vmem:[#allocation29_spill] sm:$0xff]  ;;  %v8698_v25 = vld [vmem:[#allocation30_spill] sm:$0xff] }
 0x60c   : > { %5211 = vmatprep.subr.bf16.mxu1 %v5210_v16  ;;  %v3977_v15 = vmul.f32 1.442695, %v3503_v39  ;;  %v3979_v63 = vmul.f32 1.442695, %v3504_v17  ;;  %v5713_v3 = vpop.eup %5712  ;;  %5732 = vpow2.f32 %v3847_v37  ;;  %v5274_v53 = vpack.c.bf16 %v5705_v32, %v5709_v2  ;;  %v8695_v16 = vld [vmem:[#allocation31_spill] sm:$0xff]  ;;  %v4453_v32 = vld [vmem:[%s8133_s5 + $0x20] sm:$0xff] }
 0x60d   : > { %v3973_v44 = vmul.f32 1.442695, %v3501_v10  ;;  %v3975_v56 = vmul.f32 1.442695, %v3502_v24  ;;  %v5715_v27 = vpop.eup %5714  ;;  %5213 = vmatpush1.bf16.xpose.msra.mxu1 %v5212_v35 }
 0x60e   : > { %4459 = vperm.xlu1 %5356, %v4449_v40   ;;  %v3140_v40 = vpop.xlane.xlu1 %3139  ;;  %5734 = vpow2.f32 %v3977_v15  ;;  %v5717_v26 = vpop.eup %5716  ;;  %5275 = vmatprep.subr.bf16.mxu0 %v5274_v53  ;;  %v5216_v37 = vpack.c.bf16 %v5711_v36, %v5715_v27  ;;  %v8701_v27 = vld [vmem:[#allocation63_spill] sm:$0xff] }
 0x60f   : > { %v3443_v58 = vsub.f32 %v8695_v16, %v3140_v40  ;;  %v3444_v11 = vsub.f32 %v8696_v18, %v3140_v40  ;;  %5736 = vpow2.f32 %v3979_v63  ;;  %v5719_v17 = vpop.eup %5718  ;;  %v5214_v40 = vpack.c.bf16 %v5713_v3, %v5717_v26  ;;  %5277 = vmatpush1.bf16.xpose.msra.mxu0 %v5276_v51  ;;  %v4455_v3 = vld [vmem:[%s8133_s5 + $0x30] sm:$0xff] }
 0x610   : > { %v3137_v28 = vpop.xlane.xlu0 %3136  ;;  %5738 = vpow2.f32 %v3973_v44  ;;  %v5721_v24 = vpop.eup %5720 }
 0x611   : > { %v3441_v52 = vsub.f32 %v8697_v12, %v3137_v28  ;;  %v3442_v39 = vsub.f32 %v8698_v25, %v3137_v28  ;;  %v3857_v35 = vmul.f32 1.442695, %v3443_v58  ;;  %v3859_v10 = vmul.f32 1.442695, %v3444_v11  ;;  %v5723_v63 = vpop.eup %5722  ;;  %v8699_v28 = vld [vmem:[#allocation69_spill] sm:$0xff]  ;;  %v8700_v12 = vld [vmem:[#allocation66_spill] sm:$0xff]  ;;  %5215 = vmatprep.subr.bf16.mxu1 %v5214_v40 }
 0x612   : > { %4469 = vperm.xlu1 %5356, %v4451_v46   ;;  %5740 = vpow2.f32 %v3975_v56  ;;  %v5725_v44 = vpop.eup %5724  ;;  %v5280_v56 = vpack.c.bf16 %v5719_v17, %v5723_v63 }
 0x613   : > { %v3853_v2 = vmul.f32 1.442695, %v3441_v52  ;;  %v3855_v15 = vmul.f32 1.442695, %v3442_v39  ;;  %v3236_v46 = vpop.xlane.xlu1 %3235  ;;  %5742 = vpow2.f32 %v3857_v35  ;;  %v5727_v11 = vpop.eup %5726  ;;  %v5278_v39 = vpack.c.bf16 %v5721_v24, %v5725_v44 }
 0x614   : > { %v3233_v16 = vpop.xlane.xlu0 %3232  ;;  %v3507_v53 = vsub.f32 %v7625_v7, %v3236_v46  ;;  %v3508_v18 = vsub.f32 %v8699_v28, %v3236_v46  ;;  %5744 = vpow2.f32 %v3859_v10  ;;  %v5729_v26 = vpop.eup %5728 }
 0x615   : > { %v3505_v36 = vsub.f32 %v8700_v12, %v3233_v16  ;;  %v3506_v58 = vsub.f32 %v8701_v27, %v3233_v16  ;;  %5746 = vpow2.f32 %v3853_v2  ;;  %v5731_v35 = vpop.eup %5730  ;;  %5217 = vmatpush1.bf16.xpose.msra.mxu1 %v5216_v37  ;;  %5279 = vmatprep.subr.bf16.mxu0 %v5278_v39  ;;  %v8702_v16 = vld [vmem:[#allocation32_spill] sm:$0xff] }
 0x616   : > { %4479 = vperm.xlu1 %5356, %v4453_v32   ;;  %v3985_v51 = vmul.f32 1.442695, %v3507_v53  ;;  %v3987_v52 = vmul.f32 1.442695, %v3508_v18  ;;  %5748 = vpow2.f32 %v3855_v15  ;;  %v5733_v17 = vpop.eup %5732  ;;  %v5220_v15 = vpack.c.bf16 %v5727_v11, %v5731_v35  ;;  %v8704_v11 = vld [vmem:[#allocation70_spill] sm:$0xff] }
 0x617   : > { %v3981_v7 = vmul.f32 1.442695, %v3505_v36  ;;  %v3983_v25 = vmul.f32 1.442695, %v3506_v58  ;;  %v5218_v18 = vpack.c.bf16 %v5729_v26, %v5733_v17  ;;  %5281 = vmatpush1.bf16.xpose.msra.mxu0 %v5280_v56 }
 0x618   : > { %5750 = vpow2.f32 %v3985_v51  ;;  %v5735_v53 = vpop.eup %5734 }
 0x619   : > { %v3146_v32 = vpop.xlane.xlu1 %3145  ;;  %5752 = vpow2.f32 %v3987_v52  ;;  %v5737_v37 = vpop.eup %5736  ;;  %5219 = vmatprep.subr.bf16.mxu1 %v5218_v18  ;;  %v8705_v52 = vld [vmem:[#allocation72_spill] sm:$0xff] }
 0x61a   : > { %v3447_v10 = vsub.f32 %v7347_v22, %v3146_v32  ;;  %v3448_v40 = vsub.f32 %v7351_v6, %v3146_v32  ;;  %v3143_v46 = vpop.xlane.xlu0 %3142  ;;  %4489 = vperm.xlu1 %5356, %v4455_v3   ;;  %5754 = vpow2.f32 %v3981_v7  ;;  %v5739_v36 = vpop.eup %5738 }
 0x61b   : > { %v3445_v2 = vsub.f32 %v7331_v30, %v3143_v46  ;;  %v3446_v63 = vsub.f32 %v8702_v16, %v3143_v46  ;;  %5756 = vpow2.f32 %v3983_v25  ;;  %v8703_v30 = vld [vmem:[#allocation74_spill] sm:$0xff]  ;;  %v5284_v26 = vpack.c.bf16 %v5735_v53, %v5739_v36 }
 0x61c   : > { %v3865_v24 = vmul.f32 1.442695, %v3447_v10  ;;  %v3867_v28 = vmul.f32 1.442695, %v3448_v40  ;;  %v5741_v3 = vpop.eup %5740 }
 0x61d   : > { %v3861_v22 = vmul.f32 1.442695, %v3445_v2  ;;  %v3863_v12 = vmul.f32 1.442695, %v3446_v63  ;;  %v3242_v6 = vpop.xlane.xlu1 %3241  ;;  %v5743_v25 = vpop.eup %5742  ;;  %v5282_v35 = vpack.c.bf16 %v5737_v37, %v5741_v3  ;;  %5221 = vmatpush1.bf16.xpose.msra.mxu1 %v5220_v15 }
 0x61e   : > { %5758 = vpow2.f32 %v3865_v24  ;;  %v3511_v44 = vsub.f32 %v7661_v29, %v3242_v6  ;;  %v3512_v27 = vsub.f32 %v8703_v30, %v3242_v6  ;;  %v3239_v58 = vpop.xlane.xlu0 %3238  ;;  %v5745_v10 = vpop.eup %5744  ;;  %v8706_v24 = vld [vmem:[#allocation34_spill] sm:$0xff] }
 0x61f   : > { %5760 = vpow2.f32 %v3867_v28  ;;  %v3509_v51 = vsub.f32 %v8704_v11, %v3239_v58  ;;  %v3510_v7 = vsub.f32 %v8705_v52, %v3239_v58  ;;  %v5747_v46 = vpop.eup %5746  ;;  %5283 = vmatprep.subr.bf16.mxu0 %v5282_v35  ;;  %v8708_v11 = vld [vmem:[#allocation76_spill] sm:$0xff]  ;;  %v8709_v52 = vld [vmem:[#allocation71_spill] sm:$0xff] }
 0x620   : > { %5762 = vpow2.f32 %v3861_v22  ;;  %v3993_v39 = vmul.f32 1.442695, %v3511_v44  ;;  %v3995_v32 = vmul.f32 1.442695, %v3512_v27  ;;  %v5749_v63 = vpop.eup %5748  ;;  %v5224_v18 = vpack.c.bf16 %v5743_v25, %v5747_v46  ;;  %5285 = vmatpush1.bf16.xpose.msra.mxu0 %v5284_v26 }
 0x621   : > { %5764 = vpow2.f32 %v3863_v12  ;;  %v3989_v56 = vmul.f32 1.442695, %v3509_v51  ;;  %v3991_v40 = vmul.f32 1.442695, %v3510_v7  ;;  %v3152_v29 = vpop.xlane.xlu1 %3151  ;;  %v5222_v6 = vpack.c.bf16 %v5745_v10, %v5749_v63 }
 0x622   : > { %5766 = vpow2.f32 %v3993_v39  ;;  %v3451_v17 = vsub.f32 %v7382_v5, %v3152_v29  ;;  %v3452_v2 = vsub.f32 %v7389_v33, %v3152_v29  ;;  %v3149_v16 = vpop.xlane.xlu0 %3148  ;;  %v5751_v37 = vpop.eup %5750 }
 0x623   : > { %5768 = vpow2.f32 %v3995_v32  ;;  %v3449_v53 = vsub.f32 %v7363_v23, %v3149_v16  ;;  %v3450_v28 = vsub.f32 %v8706_v24, %v3149_v16  ;;  %v5753_v36 = vpop.eup %5752  ;;  %5223 = vmatprep.subr.bf16.mxu1 %v5222_v6  ;;  %v8707_v23 = vld [vmem:[#allocation73_spill] sm:$0xff] }
 0x624   : > { %5770 = vpow2.f32 %v3989_v56  ;;  %v3873_v22 = vmul.f32 1.442695, %v3451_v17  ;;  %v3875_v12 = vmul.f32 1.442695, %v3452_v2  ;;  %v5755_v30 = vpop.eup %5754 }
 0x625   : > { %5772 = vpow2.f32 %v3991_v40  ;;  %v3869_v15 = vmul.f32 1.442695, %v3449_v53  ;;  %v3871_v44 = vmul.f32 1.442695, %v3450_v28  ;;  %v3248_v5 = vpop.xlane.xlu1 %3247  ;;  %v5757_v3 = vpop.eup %5756  ;;  %v5288_v25 = vpack.c.bf16 %v5751_v37, %v5755_v30  ;;  %5225 = vmatpush1.bf16.xpose.msra.mxu1 %v5224_v18 }
 0x626   : > { %5774 = vpow2.f32 %v3873_v22  ;;  %v3515_v33 = vsub.f32 %v7693_v4, %v3248_v5  ;;  %v3516_v27 = vsub.f32 %v8707_v23, %v3248_v5  ;;  %v3245_v58 = vpop.xlane.xlu0 %3244  ;;  %v5286_v10 = vpack.c.bf16 %v5753_v36, %v5757_v3 }
 0x627   : > { %5776 = vpow2.f32 %v3875_v12  ;;  %v3513_v51 = vsub.f32 %v8708_v11, %v3245_v58  ;;  %v3514_v7 = vsub.f32 %v8709_v52, %v3245_v58 }
 0x628   : > { %v5759_v39 = vpop.eup %5758  ;;  %5778 = vpow2.f32 %v3869_v15  ;;  %v4001_v32 = vmul.f32 1.442695, %v3515_v33  ;;  %v4003_v35 = vmul.f32 1.442695, %v3516_v27  ;;  %5287 = vmatprep.subr.bf16.mxu0 %v5286_v10 }
 0x629   : > { %v5761_v56 = vpop.eup %5760  ;;  %5780 = vpow2.f32 %v3871_v44  ;;  %v3997_v26 = vmul.f32 1.442695, %v3513_v51  ;;  %v3999_v40 = vmul.f32 1.442695, %v3514_v7  ;;  %v3158_v4 = vpop.xlane.xlu1 %3157  ;;  %5289 = vmatpush1.bf16.xpose.msra.mxu0 %v5288_v25 }
 0x62a   : > { %v5763_v29 = vpop.eup %5762  ;;  %5782 = vpow2.f32 %v4001_v32  ;;  %v3455_v46 = vsub.f32 %v7416_v1, %v3158_v4  ;;  %v3456_v17 = vsub.f32 %v7423_v60, %v3158_v4  ;;  %v3155_v2 = vpop.xlane.xlu0 %3154 }
 0x62b   : > { %v5765_v16 = vpop.eup %5764  ;;  %5784 = vpow2.f32 %v4003_v35  ;;  %v3453_v63 = vsub.f32 %v7399_v59, %v3155_v2  ;;  %v3454_v53 = vsub.f32 %v7403_v41, %v3155_v2  ;;  %v5228_v24 = vpack.c.bf16 %v5759_v39, %v5763_v29 }
 0x62c   : > { %v5767_v28 = vpop.eup %5766  ;;  %5786 = vpow2.f32 %v3997_v26  ;;  %v3881_v37 = vmul.f32 1.442695, %v3455_v46  ;;  %v3883_v22 = vmul.f32 1.442695, %v3456_v17  ;;  %v5226_v12 = vpack.c.bf16 %v5761_v56, %v5765_v16 }
 0x62d   : > { %v5769_v6 = vpop.eup %5768  ;;  %5788 = vpow2.f32 %v3999_v40  ;;  %v3877_v18 = vmul.f32 1.442695, %v3453_v63  ;;  %v3879_v36 = vmul.f32 1.442695, %v3454_v53  ;;  %v3254_v1 = vpop.xlane.xlu1 %3253 }
 0x62e   : > { %v5771_v15 = vpop.eup %5770  ;;  %5790 = vpow2.f32 %v3881_v37  ;;  %5227 = vmatprep.subr.bf16.mxu1 %v5226_v12  ;;  %v3519_v60 = vsub.f32 %v7720_v14, %v3254_v1  ;;  %v3520_v59 = vsub.f32 %v7725_v8, %v3254_v1  ;;  %v3251_v41 = vpop.xlane.xlu0 %3250 }
 0x62f   : > { %v5773_v44 = vpop.eup %5772  ;;  %5792 = vpow2.f32 %v3883_v22  ;;  %v3517_v5 = vsub.f32 %v7710_v54, %v3251_v41  ;;  %v3518_v30 = vsub.f32 %v7712_v48, %v3251_v41  ;;  %v5292_v33 = vpack.c.bf16 %v5767_v28, %v5771_v15  ;;  %5229 = vmatpush1.bf16.xpose.msra.mxu1 %v5228_v24 }
 0x630   : > { %v5775_v23 = vpop.eup %5774  ;;  %5794 = vpow2.f32 %v3877_v18  ;;  %v4009_v27 = vmul.f32 1.442695, %v3519_v60  ;;  %v4011_v58 = vmul.f32 1.442695, %v3520_v59  ;;  %v5290_v3 = vpack.c.bf16 %v5769_v6, %v5773_v44 }
 0x631   : > { %v5777_v11 = vpop.eup %5776  ;;  %5796 = vpow2.f32 %v3879_v36  ;;  %v4005_v51 = vmul.f32 1.442695, %v3517_v5  ;;  %v4007_v52 = vmul.f32 1.442695, %v3518_v30  ;;  %v3164_v14 = vpop.xlane.xlu1 %3163 }
 0x632   : > { %v5779_v7 = vpop.eup %5778  ;;  %5798 = vpow2.f32 %v4009_v27  ;;  %5291 = vmatprep.subr.bf16.mxu0 %v5290_v3  ;;  %v3459_v8 = vsub.f32 %v7454_v61, %v3164_v14  ;;  %v3460_v54 = vsub.f32 %v7458_v55, %v3164_v14  ;;  %v3161_v48 = vpop.xlane.xlu0 %3160 }
 0x633   : > { %v5781_v25 = vpop.eup %5780  ;;  %5800 = vpow2.f32 %v4011_v58  ;;  %v3457_v39 = vsub.f32 %v7435_v42, %v3161_v48  ;;  %v3458_v32 = vsub.f32 %v7442_v57, %v3161_v48  ;;  %v5232_v35 = vpack.c.bf16 %v5775_v23, %v5779_v7  ;;  %5293 = vmatpush1.bf16.xpose.msra.mxu0 %v5292_v33 }
 0x634   : > { %v5783_v10 = vpop.eup %5782  ;;  %5802 = vpow2.f32 %v4005_v51  ;;  %v3889_v56 = vmul.f32 1.442695, %v3459_v8  ;;  %v3891_v26 = vmul.f32 1.442695, %v3460_v54  ;;  %v5230_v40 = vpack.c.bf16 %v5777_v11, %v5781_v25  ;;  %v8710_v11 = vld [vmem:[#allocation75_spill] sm:$0xff] }
 0x635   : > { %v5785_v4 = vpop.eup %5784  ;;  %5804 = vpow2.f32 %v4007_v52  ;;  %v3885_v29 = vmul.f32 1.442695, %v3457_v39  ;;  %v3887_v46 = vmul.f32 1.442695, %v3458_v32  ;;  %v3260_v61 = vpop.xlane.xlu1 %3259  ;;  %v8711_v52 = vld [vmem:[#allocation77_spill] sm:$0xff] }
 0x636   : > { %v5787_v17 = vpop.eup %5786  ;;  %5806 = vpow2.f32 %v3889_v56  ;;  %5231 = vmatprep.subr.bf16.mxu1 %v5230_v40  ;;  %v3523_v55 = vsub.f32 %v7740_v21, %v3260_v61  ;;  %v3524_v42 = vsub.f32 %v7745_v49, %v3260_v61  ;;  %v3257_v57 = vpop.xlane.xlu0 %3256  ;;  %v8712_v56 = vld [vmem:[#allocation55_spill] sm:$0xff] }
 0x637   : > { %v5789_v2 = vpop.eup %5788  ;;  %5808 = vpow2.f32 %v3891_v26  ;;  %v3521_v16 = vsub.f32 %v7734_v20, %v3257_v57  ;;  %v3522_v63 = vsub.f32 %v7736_v62, %v3257_v57  ;;  %v5296_v53 = vpack.c.bf16 %v5783_v10, %v5787_v17  ;;  %5233 = vmatpush1.bf16.xpose.msra.mxu1 %v5232_v35  ;;  %v8713_v57 = vld [vmem:[#allocation51_spill] sm:$0xff] }
 0x638   : > { %v5791_v24 = vpop.eup %5790  ;;  %5810 = vpow2.f32 %v3885_v29  ;;  %v4017_v28 = vmul.f32 1.442695, %v3523_v55  ;;  %v4019_v37 = vmul.f32 1.442695, %v3524_v42  ;;  %v5294_v22 = vpack.c.bf16 %v5785_v4, %v5789_v2 }
 0x639   : > { %v5793_v12 = vpop.eup %5792  ;;  %5812 = vpow2.f32 %v3887_v46  ;;  %v4013_v6 = vmul.f32 1.442695, %v3521_v16  ;;  %v4015_v18 = vmul.f32 1.442695, %v3522_v63  ;;  %v3170_v21 = vpop.xlane.xlu1 %3169 }
 0x63a   : > { %v5795_v36 = vpop.eup %5794  ;;  %5814 = vpow2.f32 %v4017_v28  ;;  %5295 = vmatprep.subr.bf16.mxu0 %v5294_v22  ;;  %v3463_v49 = vsub.f32 %v7494_v0, %v3170_v21  ;;  %v3464_v20 = vsub.f32 %v7501_v38, %v3170_v21  ;;  %v3167_v62 = vpop.xlane.xlu0 %3166 }
 0x63b   : > { %v5797_v1 = vpop.eup %5796  ;;  %5816 = vpow2.f32 %v4019_v37  ;;  %v3461_v15 = vsub.f32 %v7470_v45, %v3167_v62  ;;  %v3462_v60 = vsub.f32 %v7480_v43, %v3167_v62  ;;  %v5236_v59 = vpack.c.bf16 %v5791_v24, %v5795_v36  ;;  %5297 = vmatpush1.bf16.xpose.msra.mxu0 %v5296_v53  ;;  %v8714_v24 = vld [vmem:[#allocation82_spill] sm:$0xff]  ;;  %v8715_v37 = vld [vmem:[#allocation84_spill] sm:$0xff] }
 0x63c   : > { %v5799_v41 = vpop.eup %5798  ;;  %5818 = vpow2.f32 %v4013_v6  ;;  %v3897_v44 = vmul.f32 1.442695, %v3463_v49  ;;  %v3899_v5 = vmul.f32 1.442695, %v3464_v20  ;;  %v5234_v30 = vpack.c.bf16 %v5793_v12, %v5797_v1  ;;  %v8716_v20 = vld [vmem:[#allocation78_spill] sm:$0xff] }
 0x63d   : > { %v5801_v33 = vpop.eup %5800  ;;  %5820 = vpow2.f32 %v4015_v18  ;;  %v3893_v23 = vmul.f32 1.442695, %v3461_v15  ;;  %v3895_v27 = vmul.f32 1.442695, %v3462_v60  ;;  %v3266_v0 = vpop.xlane.xlu1 %3265  ;;  %v8717_v15 = vld [vmem:[#allocation80_spill] sm:$0xff] }
 0x63e   : > { %v5803_v58 = vpop.eup %5802  ;;  %5822 = vpow2.f32 %v3897_v44  ;;  %5235 = vmatprep.subr.bf16.mxu1 %v5234_v30  ;;  %v3527_v38 = vsub.f32 %v7758_v50, %v3266_v0  ;;  %v3528_v45 = vsub.f32 %v7763_v9, %v3266_v0  ;;  %v3263_v43 = vpop.xlane.xlu0 %3262 }
 0x63f   : > { %v5805_v3 = vpop.eup %5804  ;;  %5824 = vpow2.f32 %v3899_v5  ;;  %v3525_v51 = vsub.f32 %v8710_v11, %v3263_v43  ;;  %v3526_v14 = vsub.f32 %v8711_v52, %v3263_v43  ;;  %v5300_v7 = vpack.c.bf16 %v5799_v41, %v5803_v58  ;;  %5237 = vmatpush1.bf16.xpose.msra.mxu1 %v5236_v59  ;;  %v8719_v52 = vld [vmem:[#allocation58_spill] sm:$0xff] }
 0x640   : > { %v5807_v8 = vpop.eup %5806  ;;  %5826 = vpow2.f32 %v3893_v23  ;;  %v4025_v54 = vmul.f32 1.442695, %v3527_v38  ;;  %v4027_v48 = vmul.f32 1.442695, %v3528_v45  ;;  %v5298_v25 = vpack.c.bf16 %v5801_v33, %v5805_v3  ;;  %v8718_v3 = vld [vmem:[#allocation59_spill] sm:$0xff] }
 0x641   : > { %v5809_v39 = vpop.eup %5808  ;;  %5828 = vpow2.f32 %v3895_v27  ;;  %v4021_v32 = vmul.f32 1.442695, %v3525_v51  ;;  %v4023_v35 = vmul.f32 1.442695, %v3526_v14  ;;  %v3176_v50 = vpop.xlane.xlu1 %3175 }
 0x642   : > { %v5811_v10 = vpop.eup %5810  ;;  %5830 = vpow2.f32 %v4025_v54  ;;  %5299 = vmatprep.subr.bf16.mxu0 %v5298_v25  ;;  %v3467_v9 = vsub.f32 %v7535_v31, %v3176_v50  ;;  %v3468_v26 = vsub.f32 %v8712_v56, %v3176_v50  ;;  %v3173_v4 = vpop.xlane.xlu0 %3172  ;;  %v8720_v54 = vld [vmem:[#allocation83_spill] sm:$0xff]  ;;  %v8721_v25 = vld [vmem:[#allocation85_spill] sm:$0xff] }
 0x643   : > { %v5813_v40 = vpop.eup %5812  ;;  %5832 = vpow2.f32 %v4027_v48  ;;  %v5240_v29 = vpack.c.bf16 %v5807_v8, %v5811_v10  ;;  %v3465_v55 = vsub.f32 %v7516_v34, %v3173_v4  ;;  %v3466_v2 = vsub.f32 %v8713_v57, %v3173_v4  ;;  %5301 = vmatpush1.bf16.xpose.msra.mxu0 %v5300_v7 }
 0x644   : > { %v5815_v46 = vpop.eup %5814  ;;  %5834 = vpow2.f32 %v4021_v32  ;;  %v3905_v61 = vmul.f32 1.442695, %v3467_v9  ;;  %v3907_v17 = vmul.f32 1.442695, %v3468_v26  ;;  %v5238_v16 = vpack.c.bf16 %v5809_v39, %v5813_v40  ;;  %v8722_v40 = vld [vmem:[#allocation79_spill] sm:$0xff] }
 0x645   : > { %v5817_v42 = vpop.eup %5816  ;;  %5836 = vpow2.f32 %v4023_v35  ;;  %v3272_v63 = vpop.xlane.xlu1 %3271  ;;  %v3901_v31 = vmul.f32 1.442695, %v3465_v55  ;;  %v3903_v6 = vmul.f32 1.442695, %v3466_v2  ;;  %v8724_v2 = vld [vmem:[#allocation65_spill] sm:$0xff] }
 0x646   : > { %v5819_v53 = vpop.eup %5818  ;;  %5838 = vpow2.f32 %v3905_v61  ;;  %v3531_v28 = vsub.f32 %v8714_v24, %v3272_v63  ;;  %v3532_v22 = vsub.f32 %v8715_v37, %v3272_v63  ;;  %5239 = vmatprep.subr.bf16.mxu1 %v5238_v16  ;;  %v3269_v18 = vpop.xlane.xlu0 %3268  ;;  %v8725_v63 = vld [vmem:[#allocation67_spill] sm:$0xff] }
 0x647   : > { %v5821_v12 = vpop.eup %5820  ;;  %5840 = vpow2.f32 %v3907_v17  ;;  %v5304_v34 = vpack.c.bf16 %v5815_v46, %v5819_v53  ;;  %v3529_v62 = vsub.f32 %v8716_v20, %v3269_v18  ;;  %v3530_v60 = vsub.f32 %v8717_v15, %v3269_v18  ;;  %5241 = vmatpush1.bf16.xpose.msra.mxu1 %v5240_v29  ;;  %v8723_v46 = vld [vmem:[#allocation81_spill] sm:$0xff]  ;;  %v8726_v18 = vld [vmem:[#allocation64_spill] sm:$0xff] }
 0x648   : > { %v5823_v21 = vpop.eup %5822  ;;  %5842 = vpow2.f32 %v3901_v31  ;;  %v4033_v36 = vmul.f32 1.442695, %v3531_v28  ;;  %v4035_v49 = vmul.f32 1.442695, %v3532_v22  ;;  %v5302_v59 = vpack.c.bf16 %v5817_v42, %v5821_v12 }
 0x649   : > { %v5825_v1 = vpop.eup %5824  ;;  %5844 = vpow2.f32 %v3903_v6  ;;  %v3182_v41 = vpop.xlane.xlu1 %3181  ;;  %v4029_v5 = vmul.f32 1.442695, %v3529_v62  ;;  %v4031_v27 = vmul.f32 1.442695, %v3530_v60  ;;  %v8728_v60 = vld [vmem:[#allocation23_spill] sm:$0xff] }
 0x64a   : > { %v5827_v44 = vpop.eup %5826  ;;  %5846 = vpow2.f32 %v4033_v36  ;;  %v3471_v30 = vsub.f32 %v7579_v13, %v3182_v41  ;;  %v3472_v33 = vsub.f32 %v7589_v19, %v3182_v41  ;;  %5303 = vmatprep.subr.bf16.mxu0 %v5302_v59  ;;  %v3179_v0 = vpop.xlane.xlu0 %3178  ;;  %v8727_v36 = vld [vmem:[#allocation68_spill] sm:$0xff] }
 0x64b   : > { %v5829_v23 = vpop.eup %5828  ;;  %5848 = vpow2.f32 %v4035_v49  ;;  %v5244_v58 = vpack.c.bf16 %v5823_v21, %v5827_v44  ;;  %v3469_v11 = vsub.f32 %v8718_v3, %v3179_v0  ;;  %v3470_v14 = vsub.f32 %v8719_v52, %v3179_v0  ;;  %5305 = vmatpush1.bf16.xpose.msra.mxu0 %v5304_v34  ;;  %v8729_v41 = vld [vmem:[#allocation24_spill] sm:$0xff] }
 0x64c   : > { %v5831_v38 = vpop.eup %5830  ;;  %5850 = vpow2.f32 %v4029_v5  ;;  %v3913_v45 = vmul.f32 1.442695, %v3471_v30  ;;  %v3915_v43 = vmul.f32 1.442695, %v3472_v33  ;;  %v5242_v7 = vpack.c.bf16 %v5825_v1, %v5829_v23 }
 0x64d   : > { %v5833_v51 = vpop.eup %5832  ;;  %5852 = vpow2.f32 %v4031_v27  ;;  %v3278_v13 = vpop.xlane.xlu1 %3277  ;;  %v3909_v19 = vmul.f32 1.442695, %v3469_v11  ;;  %v3911_v35 = vmul.f32 1.442695, %v3470_v14 }
 0x64e   : > { %v5835_v8 = vpop.eup %5834  ;;  %5854 = vpow2.f32 %v3913_v45  ;;  %v3535_v48 = vsub.f32 %v8720_v54, %v3278_v13  ;;  %v3536_v39 = vsub.f32 %v8721_v25, %v3278_v13  ;;  %5243 = vmatprep.subr.bf16.mxu1 %v5242_v7  ;;  %v3275_v50 = vpop.xlane.xlu0 %3274 }
 0x64f   : > { %v5837_v32 = vpop.eup %5836  ;;  %5856 = vpow2.f32 %v3915_v43  ;;  %v5308_v10 = vpack.c.bf16 %v5831_v38, %v5835_v8  ;;  %v3533_v4 = vsub.f32 %v8722_v40, %v3275_v50  ;;  %v3534_v61 = vsub.f32 %v8723_v46, %v3275_v50  ;;  %5245 = vmatpush1.bf16.xpose.msra.mxu1 %v5244_v58  ;;  %v8731_v50 = vld [vmem:[#allocation7_spill] sm:$0xff] }
 0x650   : > { %v5839_v9 = vpop.eup %5838  ;;  %5858 = vpow2.f32 %v3909_v19  ;;  %v4041_v56 = vmul.f32 1.442695, %v3535_v48  ;;  %v4043_v26 = vmul.f32 1.442695, %v3536_v39  ;;  %v5306_v17 = vpack.c.bf16 %v5833_v51, %v5837_v32  ;;  %v8733_v40 = vld [vmem:[#allocation19_spill] sm:$0xff] }
 0x651   : > { %v5841_v29 = vpop.eup %5840  ;;  %5860 = vpow2.f32 %v3911_v35  ;;  %v3188_v55 = vpop.xlane.xlu1 %3187  ;;  %v4037_v57 = vmul.f32 1.442695, %v3533_v4  ;;  %v4039_v24 = vmul.f32 1.442695, %v3534_v61  ;;  %v8730_v35 = vld [vmem:[#allocation17_spill] sm:$0xff] }
 0x652   : > { %v5843_v42 = vpop.eup %5842  ;;  %5862 = vpow2.f32 %v4041_v56  ;;  %v3475_v16 = vsub.f32 %v8724_v2, %v3188_v55  ;;  %v3476_v53 = vsub.f32 %v8725_v63, %v3188_v55  ;;  %5307 = vmatprep.subr.bf16.mxu0 %v5306_v17  ;;  %v3185_v28 = vpop.xlane.xlu0 %3184  ;;  %v8735_v61 = vld [vmem:[#allocation21_spill] sm:$0xff]  ;;  %v8736_v55 = vmov 0.0   ;;  %v8738_v2 = vld [vmem:[#allocation88_spill] sm:$0xff] }
 0x653   : > { %v5845_v31 = vpop.eup %5844  ;;  %5864 = vpow2.f32 %v4043_v26  ;;  %v5248_v37 = vpack.c.bf16 %v5839_v9, %v5843_v42  ;;  %v3473_v34 = vsub.f32 %v8726_v18, %v3185_v28  ;;  %v3474_v49 = vsub.f32 %v8727_v36, %v3185_v28  ;;  %5309 = vmatpush1.bf16.xpose.msra.mxu0 %v5308_v10  ;;  %v8732_v9 = vld [vmem:[#allocation20_spill] sm:$0xff]  ;;  %v8737_v42 = vld [vmem:[#allocation86_spill] sm:$0xff] }
 0x654   : > { %v5847_v22 = vpop.eup %5846  ;;  %5866 = vpow2.f32 %v4037_v57  ;;  %v3921_v12 = vmul.f32 1.442695, %v3475_v16  ;;  %v3923_v6 = vmul.f32 1.442695, %v3476_v53  ;;  %v5246_v20 = vpack.c.bf16 %v5841_v29, %v5845_v31  ;;  %v8734_v29 = vld [vmem:[#allocation22_spill] sm:$0xff] }
 0x655   : > { %v5849_v21 = vpop.eup %5848  ;;  %5868 = vpow2.f32 %v4039_v24  ;;  %v903_v62 = vpop.permute.xlu1 %902  ;;  %v3917_v15 = vmul.f32 1.442695, %v3473_v34  ;;  %v3919_v30 = vmul.f32 1.442695, %v3474_v49  ;;  %v1198_v10 = vadd.f32 %v8731_v50, %v8730_v35 }
 0x656   : > { %v5851_v1 = vpop.eup %5850  ;;  %5870 = vpow2.f32 %v3921_v12  ;;  %v8018_v59 = vadd.f32 %v8728_v60, %v903_v62  ;;  %v1218_v44 = vadd.f32 %v8729_v41, %v903_v62  ;;  %5247 = vmatprep.subr.bf16.mxu1 %v5246_v20  ;;  %v3281_v39 = vpop.xlane.xlu0 %3280 }
 0x657   : > { %v5853_v5 = vpop.eup %5852  ;;  %5872 = vpow2.f32 %v3923_v6  ;;  %v5312_v33 = vpack.c.bf16 %v5847_v22, %v5851_v1  ;;  %5249 = vmatpush1.bf16.xpose.msra.mxu1 %v5248_v37  ;;  %v3537_v57 = vsub.f32 %v8737_v42, %v3281_v39  ;;  %v3538_v16 = vsub.f32 %v8738_v2, %v3281_v39  ;;  %v8739_v22 = vld [vmem:[#allocation90_spill] sm:$0xff] }
 0x658   : > { %v5855_v23 = vpop.eup %5854  ;;  %5874 = vpow2.f32 %v3917_v15  ;;  %v5310_v27 = vpack.c.bf16 %v5849_v21, %v5853_v5  ;;  %4366 = vmatprep.mubr.f32.mxu0 %v1218_v44  ;;  %v4393_v1 = vlaneseq }
 0x659   : > { %v5857_v0 = vpop.eup %5856  ;;  %5876 = vpow2.f32 %v3919_v30  ;;  %v4045_v53 = vmul.f32 1.442695, %v3537_v57  ;;  %v4047_v24 = vmul.f32 1.442695, %v3538_v16 }
 0x65a   : > { %v5859_v58 = vpop.eup %5858  ;;  %5311 = vmatprep.subr.bf16.mxu0 %v5310_v27  ;;  %v4394_v41 = vshrl.u32 %v4393_v1, 7 }
 0x65b   : > { %v5861_v38 = vpop.eup %5860  ;;  %v5252_v45 = vpack.c.bf16 %v5855_v23, %v5859_v58  ;;  %5313 = vmatpush1.bf16.xpose.msra.mxu0 %v5312_v33  ;;  %5878 = vpow2.f32 %v4045_v53 }
 0x65c   : > { %v5863_v43 = vpop.eup %5862  ;;  %v5250_v3 = vpack.c.bf16 %v5857_v0, %v5861_v38  ;;  %5880 = vpow2.f32 %v4047_v24  ;;  %v8032_v33 = vsub.s32 0, %v4394_v41 }
 0x65d   : > { %v5865_v11 = vpop.eup %5864 }
 0x65e   : > { %v5867_v51 = vpop.eup %5866  ;;  %5251 = vmatprep.subr.bf16.mxu1 %v5250_v3  ;;  %v893_v32 = vpop.permute.xlu0 %892 }
 0x65f   : > { %v5869_v52 = vpop.eup %5868  ;;  %v5316_v14 = vpack.c.bf16 %v5863_v43, %v5867_v51  ;;  %5253 = vmatpush1.bf16.xpose.msra.mxu1 %v5252_v45  ;;  %v1206_v56 = vadd.f32 %v8732_v9, %v893_v32  ;;  %v1204_v4 = vadd.f32 %v8733_v40, %v893_v32 }
 0x660   : > { %v5871_v7 = vpop.eup %5870  ;;  %v5314_v13 = vpack.c.bf16 %v5865_v11, %v5869_v52 }
 0x661   : > { %v5873_v8 = vpop.eup %5872 }
 0x662   : > { %v5875_v19 = vpop.eup %5874  ;;  %5315 = vmatprep.subr.bf16.mxu0 %v5314_v13  ;;  %v898_v26 = vpop.permute.xlu0 %897 }
 0x663   : > { %v5877_v54 = vpop.eup %5876  ;;  %v5256_v48 = vpack.c.bf16 %v5871_v7, %v5875_v19  ;;  %5317 = vmatpush1.bf16.xpose.msra.mxu0 %v5316_v14  ;;  %v1212_v46 = vadd.f32 %v8734_v29, %v898_v26  ;;  %v1210_v17 = vadd.f32 %v8735_v61, %v898_v26 }
 0x664   : > { %v5254_v25 = vpack.c.bf16 %v5873_v8, %v5877_v54 }
 0x665   : > { %v5879_v5 = vpop.eup %5878 }
 0x666   : > { %5255 = vmatprep.subr.bf16.mxu1 %v5254_v25  ;;  %v5881_v30 = vpop.eup %5880  ;;  %v913_v26 = vpop.permute.xlu0 %912 }
 0x667   : > { %5257 = vmatpush1.bf16.xpose.msra.mxu1 %v5256_v48 }
 0x66e   : > { %4284 = vmatmul.mubr.f32.vlgmr.msra.gmra.mrb[160].mxu1 %v1198_v10  ;;  %v8740_v10 = vld [vmem:[#allocation26_spill] sm:$0xff] }
 0x66f   : > { %4289 = vmatprep.mubr.f32.mxu1 %v1206_v56 }
 0x672   : > { %4290 = vmatmul.mubr.f32.gmra.mrb[162].mxu1 %v1204_v4  ;;  %v8741_v4 = vld [vmem:[#allocation25_spill] sm:$0xff] }
 0x673   : > { %4295 = vmatprep.mubr.f32.mxu1 %v1212_v46  ;;  %v8742_v46 = vld [vmem:[#allocation28_spill] sm:$0xff] }
 0x674   : > { %v1230_v61 = vadd.f32 %v8742_v46, %v913_v26 }
 0x676   : > { %4296 = vmatmul.mubr.f32.gmra.mrb[164].mxu1 %v1210_v17  ;;  %v8743_v17 = vld [vmem:[#allocation27_spill] sm:$0xff] }
 0x677   : > { %4585 = vmatprep.mubr.f32.mxu1 %v8736_v55  ;;  %v1228_v42 = vadd.f32 %v8743_v17, %v913_v26 }
 0x682   : > { %v4119_v63 = vpop.f32.mrb[154].mxu1 }
 0x683   : > { %v4121_v31 = vpop.f32.mrb[155].mxu1 }
 0x685   : > { %v4202_v18 = vpop.f32.mrb[174].mxu0 }
 0x686   : > { %v3284_v28 = vpop.xlane.xlu1 %3283  ;;  %v4125_v6 = vpop.f32.mrb[156].mxu1 }
 0x687   : > { %v3539_v37 = vsub.f32 %v7834_v47, %v3284_v28  ;;  %v3540_v12 = vsub.f32 %v8739_v22, %v3284_v28  ;;  %v4127_v36 = vpop.f32.mrb[157].mxu1  ;;  %v4204_v49 = vpop.f32.mrb[175].mxu0 }
 0x689   : > { %v4049_v34 = vmul.f32 1.442695, %v3539_v37  ;;  %v4051_v21 = vmul.f32 1.442695, %v3540_v12  ;;  %v4208_v62 = vpop.f32.mrb[176].mxu0 }
 0x68a   : > { %v4131_v20 = vpop.f32.mrb[158].mxu1  ;;  %v4210_v60 = vpop.f32.mrb[177].mxu0 }
 0x68b   : > { %5882 = vpow2.f32 %v4049_v34  ;;  %v4133_v15 = vpop.f32.mrb[159].mxu1  ;;  %v908_v54 = vpop.permute.xlu1 %907 }
 0x68c   : > { %5884 = vpow2.f32 %v4051_v21  ;;  %v1224_v9 = vadd.f32 %v8740_v10, %v908_v54  ;;  %v1222_v29 = vadd.f32 %v8741_v4, %v908_v54 }
 0x68d   : > { %5886 = vrcp.f32 %v4131_v20  ;;  %v4214_v47 = vpop.f32.mrb[178].mxu0 }
 0x68e   : > { %5888 = vrcp.f32 %v4133_v15  ;;  %v4216_v44 = vpop.f32.mrb[179].mxu0 }
 0x68f   : > { %5890 = vrcp.f32 %v4214_v47 }
 0x690   : > { %5892 = vrcp.f32 %v4216_v44 }
 0x695   : > { %v5883_v23 = vpop.eup %5882 }
 0x696   : > { %v5885_v27 = vpop.eup %5884  ;;  %v5320_v0 = vpack.c.bf16 %v5883_v23, %v5879_v5 }
 0x697   : > { %v5887_v58 = vpop.eup %5886  ;;  %v5318_v38 = vpack.c.bf16 %v5885_v27, %v5881_v30 }
 0x698   : > { %v5889_v45 = vpop.eup %5888  ;;  %v4396_v43 = vrot.slane %v5887_v58, %v8032_v33 }
 0x699   : > { %5319 = vmatprep.subr.bf16.mxu0 %v5318_v38  ;;  %v4400_v3 = vrot.slane %v5889_v45, %v8032_v33  ;;  %v5891_v52 = vpop.eup %5890  ;;  %v4441_v38 = vld [vmem:[%s8132_s4] sm:$0xff]  ;;  %v4443_v45 = vld [vmem:[%s8132_s4 + $0x10] sm:$0xff] }
 0x69a   : > { %5321 = vmatpush1.bf16.xpose.msra.mxu0 %v5320_v0  ;;  %v4425_v11 = vmul.f32 %v4396_v43, %v4119_v63  ;;  %v4427_v51 = vmul.f32 %v4396_v43, %v4125_v6  ;;  %v5893_v13 = vpop.eup %5892  ;;  %v4404_v19 = vrot.slane %v5891_v52, %v8032_v33  ;;  %v4444_v43 = vld [vmem:[%s8132_s4 + $0x18] sm:$0xff] }
 0x69b   : > { %v4426_v14 = vmul.f32 %v4400_v3, %v4121_v31  ;;  %v4428_v7 = vmul.f32 %v4400_v3, %v4127_v36  ;;  %v4408_v25 = vrot.slane %v5893_v13, %v8032_v33  ;;  %v4445_v3 = vld [vmem:[%s8132_s4 + $0x20] sm:$0xff]  ;;  %v4448_v52 = vld [vmem:[%s8132_s4 + $0x38] sm:$0xff] }
 0x69c   : > { %v5324_v8 = vpack.c.bf16 %v4427_v51, %v4425_v11  ;;  %v4429_v39 = vmul.f32 %v4404_v19, %v4202_v18  ;;  %v4431_v32 = vmul.f32 %v4404_v19, %v4208_v62  ;;  %v4446_v11 = vld [vmem:[%s8132_s4 + $0x28] sm:$0xff]  ;;  %v4447_v51 = vld [vmem:[%s8132_s4 + $0x30] sm:$0xff]  ;;  %v5902_v19 = vld [vmem:[%s5979_s26] sm:$0xff] }
 0x69d   : > { %v5322_v48 = vpack.c.bf16 %v4428_v7, %v4426_v14  ;;  %v4430_v35 = vmul.f32 %v4408_v25, %v4204_v49  ;;  %v4432_v50 = vmul.f32 %v4408_v25, %v4210_v60  ;;  %v4460_v14 = vpop.permute.xlu1 %4459  ;;  %v5903_v25 = vld [vmem:[%s5979_s26 + $0x8] sm:$0xff] }
 0x69e   : > { %v5328_v56 = vpack.c.bf16 %v4431_v32, %v4429_v39 }
 0x69f   : > { %5323 = vmatprep.subr.bf16.mxu1 %v5322_v48  ;;  %v5326_v40 = vpack.c.bf16 %v4432_v50, %v4430_v35  ;;  %v4465_v48 = vpop.permute.xlu0 %4464 }
 0x6a0   : > { %5325 = vmatpush1.bf16.msra.mxu1 %v5324_v8 }
 0x6a1   : > { %4367 = vmatmul.mubr.f32.vlgmr.msra.gmra.mrb[180].mxu0 %v8018_v59  ;;  %5327 = vmatprep.subr.bf16.mxu1 %v5326_v40  ;;  %v4470_v26 = vpop.permute.xlu1 %4469  ;;  %v5905_v40 = vld [vmem:[%s5979_s26 + $0x18] sm:$0xff] }
 0x6a2   : > { %4372 = vmatprep.mubr.f32.mxu0 %v1224_v9  ;;  %v5904_v9 = vld [vmem:[%s5979_s26 + $0x10] sm:$0xff] }
 0x6a4   : > { %5329 = vmatpush1.bf16.msra.mxu1 %v5328_v56 }
 0x6a5   : > { %4373 = vmatmul.mubr.f32.gmra.mrb[182].mxu0 %v1222_v29 }
 0x6a6   : > { %4378 = vmatprep.mubr.f32.mxu0 %v1230_v61 }
 0x6a9   : > { %4379 = vmatmul.mubr.f32.gmra.mrb[184].mxu0 %v1228_v42  ;;  %v5906_v42 = vld [vmem:[%s5979_s26 + $0x20] sm:$0xff] }
 0x741   : > { %v4285_v57 = vpop.f32.mrb[160].mxu1 }
 0x742   : > { %v4287_v2 = vpop.f32.mrb[161].mxu1 }
 0x745   : > { %v4291_v16 = vpop.f32.mrb[162].mxu1 }
 0x746   : > { %v4293_v63 = vpop.f32.mrb[163].mxu1 }
 0x749   : > { %v4297_v53 = vpop.f32.mrb[164].mxu1 }
 0x74a   : > { %5894 = vrcp.f32 %v4297_v53  ;;  %v4299_v59 = vpop.f32.mrb[165].mxu1 }
 0x74b   : > { %5896 = vrcp.f32 %v4299_v59 }
 0x754   : > { %v5895_v31 = vpop.eup %5894 }
 0x755   : > { %v5897_v24 = vpop.eup %5896  ;;  %v4412_v28 = vrot.slane %v5895_v31, %v8032_v33 }
 0x756   : > { %v4416_v37 = vrot.slane %v5897_v24, %v8032_v33 }
 0x757   : > { %v4433_v22 = vmul.f32 %v4412_v28, %v4285_v57  ;;  %v4435_v12 = vmul.f32 %v4412_v28, %v4291_v16  ;;  %v5907_v16 = vld [vmem:[%s5979_s26 + $0x28] sm:$0xff]  ;;  %v5908_v28 = vld [vmem:[%s5979_s26 + $0x30] sm:$0xff] }
 0x758   : > { %v4434_v6 = vmul.f32 %v4416_v37, %v4287_v2  ;;  %v4436_v18 = vmul.f32 %v4416_v37, %v4293_v63  ;;  %v4475_v2 = vpop.permute.xlu0 %4474 }
 0x759   : > { %v5332_v34 = vpack.c.bf16 %v4435_v12, %v4433_v22  ;;  %v4480_v22 = vpop.permute.xlu1 %4479  ;;  %v5909_v12 = vld [vmem:[%s5979_s26 + $0x38] sm:$0xff] }
 0x75a   : > { %v5330_v21 = vpack.c.bf16 %v4436_v18, %v4434_v6 }
 0x75c   : > { %5331 = vmatprep.subr.bf16.mxu1 %v5330_v21 }
 0x75d   : > { %5333 = vmatpush1.bf16.msra.mxu1 %v5332_v34 }
 0x774   : > { %v4368_v36 = vpop.f32.mrb[180].mxu0 }
 0x775   : > { %v4370_v49 = vpop.f32.mrb[181].mxu0 }
 0x778   : > { %v4374_v20 = vpop.f32.mrb[182].mxu0 }
 0x779   : > { %v4376_v62 = vpop.f32.mrb[183].mxu0 }
 0x77c   : > { %v4380_v1 = vpop.f32.mrb[184].mxu0 }
 0x77d   : > { %5898 = vrcp.f32 %v4380_v1  ;;  %v4382_v15 = vpop.f32.mrb[185].mxu0  ;;  %v5911_v1 = vld [vmem:[%s5979_s26 + $0x48] sm:$0xff] }
 0x77e   : > { %5900 = vrcp.f32 %v4382_v15 }
 0x787   : > { %v5899_v60 = vpop.eup %5898 }
 0x788   : > { %v5901_v47 = vpop.eup %5900  ;;  %v4420_v41 = vrot.slane %v5899_v60, %v8032_v33 }
 0x789   : > { %v4424_v44 = vrot.slane %v5901_v47, %v8032_v33  ;;  %v4442_v33 = vld [vmem:[%s8132_s4 + $0x8] sm:$0xff] }
 0x78a   : > { %v4437_v5 = vmul.f32 %v4420_v41, %v4368_v36  ;;  %v4439_v30 = vmul.f32 %v4420_v41, %v4374_v20 }
 0x78b   : > { %v4438_v23 = vmul.f32 %v4424_v44, %v4370_v49  ;;  %v4440_v27 = vmul.f32 %v4424_v44, %v4376_v62  ;;  %v5910_v49 = vld [vmem:[%s5979_s26 + $0x40] sm:$0xff]  ;;  %v4485_v62 = vpop.permute.xlu0 %4484 }
 0x78c   : > { %v5336_v0 = vpack.c.bf16 %v4439_v30, %v4437_v5  ;;  %v5912_v5 = vld [vmem:[%s5979_s26 + $0x50] sm:$0xff] }
 0x78d   : > { %v5334_v58 = vpack.c.bf16 %v4440_v27, %v4438_v23  ;;  %v4490_v23 = vpop.permute.xlu1 %4489  ;;  %v5913_v27 = vld [vmem:[%s5979_s26 + $0x58] sm:$0xff] }
 0x78f   : > { %5335 = vmatprep.subr.bf16.mxu1 %v5334_v58 }
 0x790   : > { %5337 = vmatpush1.bf16.msra.mxu1 %v5336_v0 }
 0x793   : > { %4902 = vmatmul.mubr.msk.f32.vlgmr.msra.gmra.mrb[166].mxu1 %vm340_vm0, %v4441_v38 }
 0x794   : > { %4591 = vmatprep.mubr.f32.mxu1 %v8736_v55 }
 0x797   : > { %4903 = vmatmul.mubr.msk.f32.gmra.mrb[168].mxu1 %vm340_vm0, %v4442_v33 }
 0x798   : > { %4597 = vmatprep.mubr.f32.mxu1 %v8736_v55 }
 0x79b   : > { %4904 = vmatmul.mubr.msk.f32.gmra.mrb[170].mxu1 %vm340_vm0, %v4443_v45 }
 0x79c   : > { %4603 = vmatprep.mubr.f32.mxu1 %v8736_v55 }
 0x79f   : > { %4905 = vmatmul.mubr.msk.f32.gmra.mrb[172].mxu1 %vm340_vm0, %v4444_v43  ;;  %v5914_v43 = vld [vmem:[%s5979_s26 + $0x60] sm:$0xff] }
 0x7a0   : > { %4609 = vmatprep.mubr.f32.mxu1 %v8736_v55 }
 0x7a3   : > { %4906 = vmatmul.mubr.msk.f32.gmra.mrb[174].mxu1 %vm340_vm0, %v4445_v3 }
 0x7a4   : > { %4615 = vmatprep.mubr.f32.mxu1 %v8736_v55 }
 0x7a7   : > { %4907 = vmatmul.mubr.msk.f32.gmra.mrb[176].mxu1 %vm340_vm0, %v4446_v11  ;;  %v4495_v11 = vpop.permute.xlu0 %4494 }
 0x7a8   : > { %4621 = vmatprep.mubr.f32.mxu1 %v8736_v55 }
 0x7ab   : > { %4908 = vmatmul.mubr.msk.f32.gmra.mrb[178].mxu1 %vm340_vm0, %v4447_v51  ;;  %v5915_v51 = vld [vmem:[%s5979_s26 + $0x68] sm:$0xff] }
 0x7ac   : > { %4627 = vmatprep.mubr.f32.mxu1 %v8736_v55 }
 0x7af   : > { %4909 = vmatmul.mubr.msk.f32.gmra.mrb[180].mxu1 %vm340_vm0, %v4448_v52 }
 0x866   : > { %v4587_v7 = vpop.f32.mrb[166].mxu1 }
 0x867   : > { %v4588_v13 = vadd.f32 %v4587_v7, %v4460_v14  ;;  %v4589_v8 = vpop.f32.mrb[167].mxu1 }
 0x868   : > { %v4590_v55 = vadd.f32 %v4589_v8, %v4460_v14 }
 0x869   : > { %v4634_v54 = vadd.f32 %v5902_v19, %v4588_v13 }
 0x86a   : > { %v4635_v39 = vadd.f32 %v5903_v25, %v4590_v55  ;;  %v4593_v32 = vpop.f32.mrb[168].mxu1  ;;  %v5916_v55 = vld [vmem:[%s5979_s26 + $0x70] sm:$0xff] }
 0x86b   : > { %4650 = vst [vmem:[%s8091_s29] sm:$0xff] %v4634_v54  ;;  %v4594_v35 = vadd.f32 %v4593_v32, %v4465_v48  ;;  %v4595_v50 = vpop.f32.mrb[169].mxu1  ;;  %v5917_v54 = vld [vmem:[%s5979_s26 + $0x78] sm:$0xff] }
 0x86c   : > { %4651 = vst [vmem:[%s8091_s29 + $0x8] sm:$0xff] %v4635_v39  ;;  %v4596_v10 = vadd.f32 %v4595_v50, %v4465_v48 }
 0x86d   : > { %v4636_v56 = vadd.f32 %v5904_v9, %v4594_v35 }
 0x86e   : > { %v4637_v4 = vadd.f32 %v5905_v40, %v4596_v10  ;;  %v4599_v29 = vpop.f32.mrb[170].mxu1 }
 0x86f   : > { %4652 = vst [vmem:[%s8091_s29 + $0x10] sm:$0xff] %v4636_v56  ;;  %v4600_v46 = vadd.f32 %v4599_v29, %v4470_v26  ;;  %v4601_v61 = vpop.f32.mrb[171].mxu1 }
 0x870   : > { %4653 = vst [vmem:[%s8091_s29 + $0x18] sm:$0xff] %v4637_v4  ;;  %v4602_v17 = vadd.f32 %v4601_v61, %v4470_v26 }
 0x871   : > { %v4638_v57 = vadd.f32 %v5906_v42, %v4600_v46 }
 0x872   : > { %v4639_v63 = vadd.f32 %v5907_v16, %v4602_v17  ;;  %v4605_v53 = vpop.f32.mrb[172].mxu1 }
 0x873   : > { %4654 = vst [vmem:[%s8091_s29 + $0x20] sm:$0xff] %v4638_v57  ;;  %v4606_v59 = vadd.f32 %v4605_v53, %v4475_v2  ;;  %v4607_v31 = vpop.f32.mrb[173].mxu1 }
 0x874   : > { %4655 = vst [vmem:[%s8091_s29 + $0x28] sm:$0xff] %v4639_v63  ;;  %v4608_v24 = vadd.f32 %v4607_v31, %v4475_v2 }
 0x875   : > { %v4640_v37 = vadd.f32 %v5908_v28, %v4606_v59 }
 0x876   : > { %v4641_v6 = vadd.f32 %v5909_v12, %v4608_v24  ;;  %v4611_v18 = vpop.f32.mrb[174].mxu1 }
 0x877   : > { %4656 = vst [vmem:[%s8091_s29 + $0x30] sm:$0xff] %v4640_v37  ;;  %v4612_v34 = vadd.f32 %v4611_v18, %v4480_v22  ;;  %v4613_v21 = vpop.f32.mrb[175].mxu1 }
 0x878   : > { %4657 = vst [vmem:[%s8091_s29 + $0x38] sm:$0xff] %v4641_v6  ;;  %v4614_v36 = vadd.f32 %v4613_v21, %v4480_v22 }
 0x879   : > { %v4642_v20 = vadd.f32 %v5910_v49, %v4612_v34 }
 0x87a   : > { %v4643_v15 = vadd.f32 %v5911_v1, %v4614_v36  ;;  %v4617_v60 = vpop.f32.mrb[176].mxu1 }
 0x87b   : > { %4658 = vst [vmem:[%s8091_s29 + $0x40] sm:$0xff] %v4642_v20  ;;  %v4618_v47 = vadd.f32 %v4617_v60, %v4485_v62  ;;  %v4619_v41 = vpop.f32.mrb[177].mxu1 }
 0x87c   : > { %4659 = vst [vmem:[%s8091_s29 + $0x48] sm:$0xff] %v4643_v15  ;;  %v4620_v44 = vadd.f32 %v4619_v41, %v4485_v62 }
 0x87d   : > { %v4644_v30 = vadd.f32 %v5912_v5, %v4618_v47 }
 0x87e   : > { %v4645_v0 = vadd.f32 %v5913_v27, %v4620_v44  ;;  %v4623_v58 = vpop.f32.mrb[178].mxu1 }
 0x87f   : > { %4660 = vst [vmem:[%s8091_s29 + $0x50] sm:$0xff] %v4644_v30  ;;  %v4624_v38 = vadd.f32 %v4623_v58, %v4490_v23  ;;  %v4625_v33 = vpop.f32.mrb[179].mxu1 }
 0x880   : > { %4661 = vst [vmem:[%s8091_s29 + $0x58] sm:$0xff] %v4645_v0  ;;  %v4626_v45 = vadd.f32 %v4625_v33, %v4490_v23 }
 0x881   : > { %v4646_v3 = vadd.f32 %v5914_v43, %v4624_v38 }
 0x882   : > { %v4647_v52 = vadd.f32 %v5915_v51, %v4626_v45  ;;  %v4629_v14 = vpop.f32.mrb[180].mxu1 }
 0x883   : > { %4662 = vst [vmem:[%s8091_s29 + $0x60] sm:$0xff] %v4646_v3  ;;  %v4630_v7 = vadd.f32 %v4629_v14, %v4495_v11  ;;  %v4631_v13 = vpop.f32.mrb[181].mxu1 }
 0x884   : > { %4663 = vst [vmem:[%s8091_s29 + $0x68] sm:$0xff] %v4647_v52  ;;  %v4632_v8 = vadd.f32 %v4631_v13, %v4495_v11 }
 0x885   : > { %v4648_v19 = vadd.f32 %v5916_v55, %v4630_v7 }
 0x886   : > { %v4649_v48 = vadd.f32 %v5917_v54, %v4632_v8 }
 0x887   : > { %4664 = vst [vmem:[%s8091_s29 + $0x70] sm:$0xff] %v4648_v19 }
 0x888   : > { %4665 = vst [vmem:[%s8091_s29 + $0x78] sm:$0xff] %v4649_v48 }
 0x889 PF: > { %s16_s21 = sadd.s32 1, %s5924_s21  }
 0x88a   : > { %p13_p4 = scmp.ge.s32.totalorder %s16_s21, 4  }
 0x88c   :  { %15 = sbr.rel (!%p13_p4) target bundleno = 1 (0x1), region = 74 }

</bundles_post_ra>
